<compile_context>
chip_gen: v6e
topology: v6e:2x2x1
jax: 0.10.0
libtpu: 0.0.40
codegen_flags: <defaults>
</compile_context>

<pallas_src>
import functools

import jax
import jax.numpy as jnp
from jax.experimental import pallas as pl
from jax.experimental.pallas import tpu as pltpu


def _round_up(x, m):
    return ((x + m - 1) // m) * m


def _pick_tile(nout, target):
    """Largest multiple of 128 that divides nout and is <= max(target, 128)."""
    target = max(int(target), 128)
    best = 128
    t = 128
    while t <= nout:
        if nout % t == 0 and t <= target:
            best = t
        t += 128
    return best


def prepare_conv_params(weight_oihw, bias, *, mxu_dtype=jnp.bfloat16):
    """Relayout conv params once (hoist this call out of any time scan).

    Returns w_taps of shape (k*k, 4*hidden, Ctot+1): one (4*hid, Ctot+1) MXU
    slab per conv tap.  The extra input channel carries the bias: it is only
    non-zero on the centre tap and multiplies the all-ones activation channel
    appended by the wrapper, so bias is folded into the contraction for free.
    """
    out_c, ctot, k, _ = weight_oihw.shape
    p = k // 2
    bias_tap = jnp.zeros((out_c, 1, k, k), jnp.float32)
    bias_tap = bias_tap.at[:, 0, p, p].set(bias.astype(jnp.float32))
    w_aug = jnp.concatenate([weight_oihw.astype(jnp.float32), bias_tap], axis=1)
    # (O, C+1, kh, kw) -> (kh, kw, O, C+1) -> (k*k, O, C+1), tap index = kh*k+kw
    w_taps = jnp.transpose(w_aug, (2, 3, 0, 1)).reshape(k * k, out_c, ctot + 1)
    return w_taps.astype(mxu_dtype)


def _convlstm_kernel(x_ref, c_ref, w_ref, h_out_ref, c_out_ref, *,
                     k, wp, tn, halo, tiled):
    # x_ref:    (1, Ctot+1, Next)  bf16  padded activation, flat + halo-extended
    # c_ref:    (1, hid, TN)       f32   previous cell state (padded-grid layout)
    # w_ref:    (k*k, 4*hid, Ctot+1) bf16  per-tap weight slabs (bias folded in)
    # h_out_ref:(1, hid, TN)       bf16
    # c_out_ref:(1, hid, TN)       f32
    hid = c_out_ref.shape[1]

    if tiled:
        base = pl.multiple_of(pl.program_id(1) * tn, 128)
        win = x_ref[0, :, pl.ds(base, tn + halo)]      # (Ctot+1, TN+halo)
    else:
        win = x_ref[0]                                 # whole extended row

    # In-kernel "im2col": tap (kh, kw) is a static lane-shifted slice of `win`.
    # k*k accumulating MXU matmuls, f32 accumulation.
    acc = None
    for kh in range(k):
        for kw in range(k):
            off = kh * wp + kw
            rhs = win[:, off:off + tn]                 # (Ctot+1, TN) bf16
            lhs = w_ref[kh * k + kw]                   # (4*hid, Ctot+1) bf16
            part = jnp.dot(lhs, rhs, preferred_element_type=jnp.float32)
            acc = part if acc is None else acc + part  # (4*hid, TN) f32

    # Gate splits are sublane (row) slices; gate math stays f32 (v5e-safe).
    i = jax.nn.sigmoid(acc[0 * hid:1 * hid])
    f = jax.nn.sigmoid(acc[1 * hid:2 * hid])
    o = jax.nn.sigmoid(acc[2 * hid:3 * hid])
    g = jnp.tanh(acc[3 * hid:4 * hid])

    c_prev = c_ref[0]
    c_new = f * c_prev + i * g
    h_new = o * jnp.tanh(c_new)

    c_out_ref[0] = c_new                               # f32 cell state
    h_out_ref[0] = h_new.astype(h_out_ref.dtype)       # bf16 hidden state


def conv_lstm_cell(x_nchw, h_nchw, c_nchw, weight_oihw, bias, *, kernel,
                   hw_tile=2048, mxu_dtype=jnp.bfloat16, prepared_params=None):
    """ConvLSTMCell forward.  I/O is NCHW / PyTorch layout.

    weight_oihw: (4*hidden, inChannel+hidden, k, k)   (nn.Conv2d layout)
    bias:        (4*hidden,)
    Returns (h_new, c_new): h_new bf16, c_new float32, both (B, hidden, H, W).
    When scanning over time, call prepare_conv_params once outside the scan and
    pass it as prepared_params.
    """
    B, Cin, H, W = x_nchw.shape
    hidden = h_nchw.shape[1]
    Ctot = Cin + hidden
    Ctot1 = Ctot + 1                      # + all-ones bias channel
    k = kernel
    p = k // 2                            # 'same' conv, matches padding=k//2
    Hp, Wp = H + 2 * p, W + 2 * p
    Npad = Hp * Wp                        # flattened padded grid
    Nout = _round_up(Npad, 128)           # lane-dense output extent
    G = p * Wp + p                        # max |flat tap offset|
    halo = 2 * G
    Next = Nout + halo

    w_taps = prepared_params if prepared_params is not None else \
        prepare_conv_params(weight_oihw, bias, mxu_dtype=mxu_dtype)

    # Activation: concat(x, h, ones) in bf16, zero-pad spatially, flatten the
    # padded grid, extend by G zeros on each side so every tap is a contiguous
    # static slice.  This is the ONLY activation stream (no k*k expansion).
    ones = jnp.ones((B, 1, H, W), mxu_dtype)
    xh = jnp.concatenate(
        [x_nchw.astype(mxu_dtype), h_nchw.astype(mxu_dtype), ones], axis=1)
    xpad = jnp.pad(xh, ((0, 0), (0, 0), (p, p), (p, p)))
    x_ext = jnp.pad(xpad.reshape(B, Ctot1, Npad),
                    ((0, 0), (0, 0), (G, Next - Npad - G)))

    # Cell state laid out on the same padded flat grid so lanes line up.
    c2d = jnp.pad(c_nchw.astype(jnp.float32), ((0, 0), (0, 0), (p, p), (p, p)))
    c2d = c2d.reshape(B, hidden, Npad)
    c2d = jnp.pad(c2d, ((0, 0), (0, 0), (0, Nout - Npad)))

    # Lane tiling: biggest 128-multiple that divides Nout and fits the target.
    tn = _pick_tile(Nout, hw_tile)
    n_t = Nout // tn
    if B == 1 and n_t == 1 and Nout > 128:
        # v7x megacore: guarantee >= 2 parallel programs.
        tn = _pick_tile(Nout, Nout // 2)
        n_t = Nout // tn
    tiled = n_t > 1
    # TODO(synk): for very large images (Next block > a few MiB) switch the x
    # input to memory_space=pl.ANY + manual halo'd row-tile DMA.

    kern = functools.partial(_convlstm_kernel, k=k, wp=Wp, tn=tn, halo=halo,
                             tiled=tiled)

    h_out, c_out = pl.pallas_call(
        kern,
        out_shape=(
            jax.ShapeDtypeStruct((B, hidden, Nout), mxu_dtype),    # h: bf16
            jax.ShapeDtypeStruct((B, hidden, Nout), jnp.float32),  # c: f32
        ),
        grid_spec=pltpu.PrefetchScalarGridSpec(
            num_scalar_prefetch=0,
            grid=(B, n_t),
            in_specs=[
                # whole extended activation per batch; resident across HW tiles
                pl.BlockSpec((1, Ctot1, Next), lambda b, t: (b, 0, 0)),
                pl.BlockSpec((1, hidden, tn), lambda b, t: (b, 0, t)),
                pl.BlockSpec((k * k, 4 * hidden, Ctot1), lambda b, t: (0, 0, 0)),
            ],
            out_specs=[
                pl.BlockSpec((1, hidden, tn), lambda b, t: (b, 0, t)),
                pl.BlockSpec((1, hidden, tn), lambda b, t: (b, 0, t)),
            ],
        ),
        input_output_aliases={1: 1},      # c2d -> c_out: cell state in place
        compiler_params=pltpu.CompilerParams(
            dimension_semantics=("parallel", "parallel"),
            vmem_limit_bytes=32 * 1024 * 1024,
        ),
    )(x_ext, c2d, w_taps)

    # Back to NCHW: drop lane padding, un-flatten the padded grid, strip halo.
    h_out = h_out[:, :, :Npad].reshape(B, hidden, Hp, Wp)[:, :, p:p + H, p:p + W]
    c_out = c_out[:, :, :Npad].reshape(B, hidden, Hp, Wp)[:, :, p:p + H, p:p + W]
    return h_out, c_out


def _reference(x, h, c, w, b, kernel):
    """Pure-JAX f32 reference (lax conv) for a correctness check."""
    p = kernel // 2
    xh = jnp.concatenate([x, h], axis=1)
    comb = jax.lax.conv_general_dilated(
        xh, w, window_strides=(1, 1), padding=((p, p), (p, p)),
        dimension_numbers=("NCHW", "OIHW", "NCHW"))
    comb = comb + b[None, :, None, None]
    i, f, o, g = jnp.split(comb, 4, axis=1)
    i = jax.nn.sigmoid(i)
    f = jax.nn.sigmoid(f)
    o = jax.nn.sigmoid(o)
    g = jnp.tanh(g)
    c_new = f * c + i * g
    h_new = o * jnp.tanh(c_new)
    return h_new, c_new


if __name__ == "__main__":
    # Shapes consistent with ConvLSTMCell(inChannel=4, hidden=32, kernel=3)
    B, Cin, H, W = 2, 4, 16, 16
    hidden, kernel = 32, 3
    Ctot = Cin + hidden

    key = jax.random.PRNGKey(0)
    kx, kh, kc, kw, kb = jax.random.split(key, 5)
    x = jax.random.normal(kx, (B, Cin, H, W), jnp.float32)
    h = jax.random.normal(kh, (B, hidden, H, W), jnp.float32)
    c = jax.random.normal(kc, (B, hidden, H, W), jnp.float32)
    weight = 0.05 * jax.random.normal(kw, (4 * hidden, Ctot, kernel, kernel),
                                      jnp.float32)
    bias = 0.05 * jax.random.normal(kb, (4 * hidden,), jnp.float32)

    fwd = jax.jit(functools.partial(conv_lstm_cell, kernel=kernel))
    h_new, c_new = fwd(x, h, c, weight, bias)
    jax.block_until_ready((h_new, c_new))

    h_ref, c_ref = _reference(x, h, c, weight, bias, kernel)
    # bf16 MXU operands + bf16 h writeback (f32 accumulation / f32 cell state)
    # -> slightly looser tolerance than pure f32.
    assert jnp.allclose(h_new.astype(jnp.float32), h_ref, atol=2e-2, rtol=2e-2)
    assert jnp.allclose(c_new, c_ref, atol=2e-2, rtol=2e-2)

    print("KERNEL_OK")
</pallas_src>

<mosaic_0001>
module attributes {stable_mosaic.version = 11 : i64} {
  func.func @_convlstm_kernel(%arg0: i32, %arg1: i32, %arg2: memref<1x37x422xbf16, #tpu.memory_space<vmem>>, %arg3: memref<1x32x384xf32, #tpu.memory_space<vmem>>, %arg4: memref<9x128x37xbf16, #tpu.memory_space<vmem>>, %arg5: memref<1x32x384xbf16, #tpu.memory_space<vmem>>, %arg6: memref<1x32x384xf32, #tpu.memory_space<vmem>>) attributes {dimension_semantics = [#tpu.dimension_semantics<parallel>, #tpu.dimension_semantics<parallel>], iteration_bounds = array<i64: 2, 1>, scalar_prefetch = 0 : i64, scratch_operands = 0 : i64, tpu.core_type = #tpu.core_type<tc>, window_params = [{transform_indices = @transform_0, window_bounds = array<i64: 1, 37, 422>}, {transform_indices = @transform_1, window_bounds = array<i64: 1, 32, 384>}, {pipeline_mode = #tpu.pipeline_mode<synchronous>, transform_indices = @transform_2, window_bounds = array<i64: 9, 128, 37>}, {transform_indices = @transform_3, window_bounds = array<i64: 1, 32, 384>}, {transform_indices = @transform_4, window_bounds = array<i64: 1, 32, 384>}]} {
    %c0 = arith.constant 0 : index
    %c0_0 = arith.constant 0 : index
    %c0_1 = arith.constant 0 : index
    %0 = vector.load %arg2[%c0, %c0_0, %c0_1] : memref<1x37x422xbf16, #tpu.memory_space<vmem>>, vector<1x37x422xbf16>
    %1 = vector.shape_cast %0 : vector<1x37x422xbf16> to vector<37x422xbf16>
    %2 = vector.extract_strided_slice %1 {offsets = [0, 0], sizes = [37, 384], strides = [1, 1]} : vector<37x422xbf16> to vector<37x384xbf16>
    %c0_2 = arith.constant 0 : index
    %c0_3 = arith.constant 0 : index
    %c0_4 = arith.constant 0 : index
    %3 = vector.load %arg4[%c0_2, %c0_3, %c0_4] : memref<9x128x37xbf16, #tpu.memory_space<vmem>>, vector<1x128x37xbf16>
    %4 = vector.shape_cast %3 : vector<1x128x37xbf16> to vector<128x37xbf16>
    %cst = arith.constant dense<0.000000e+00> : vector<128x384xf32>
    %5 = tpu.matmul %4, %2, %cst {dimension_numbers = #tpu.dot_dimension_numbers<[1], [0], [0], [1], [0, 0, 1, 1], [], []>} : vector<128x37xbf16>, vector<37x384xbf16>, vector<128x384xf32> -> vector<128x384xf32>
    %6 = vector.extract_strided_slice %1 {offsets = [0, 1], sizes = [37, 384], strides = [1, 1]} : vector<37x422xbf16> to vector<37x384xbf16>
    %c1 = arith.constant 1 : index
    %c0_5 = arith.constant 0 : index
    %c0_6 = arith.constant 0 : index
    %7 = vector.load %arg4[%c1, %c0_5, %c0_6] : memref<9x128x37xbf16, #tpu.memory_space<vmem>>, vector<1x128x37xbf16>
    %8 = vector.shape_cast %7 : vector<1x128x37xbf16> to vector<128x37xbf16>
    %cst_7 = arith.constant dense<0.000000e+00> : vector<128x384xf32>
    %9 = tpu.matmul %8, %6, %cst_7 {dimension_numbers = #tpu.dot_dimension_numbers<[1], [0], [0], [1], [0, 0, 1, 1], [], []>} : vector<128x37xbf16>, vector<37x384xbf16>, vector<128x384xf32> -> vector<128x384xf32>
    %10 = arith.addf %5, %9 : vector<128x384xf32>
    %11 = vector.extract_strided_slice %1 {offsets = [0, 2], sizes = [37, 384], strides = [1, 1]} : vector<37x422xbf16> to vector<37x384xbf16>
    %c2 = arith.constant 2 : index
    %c0_8 = arith.constant 0 : index
    %c0_9 = arith.constant 0 : index
    %12 = vector.load %arg4[%c2, %c0_8, %c0_9] : memref<9x128x37xbf16, #tpu.memory_space<vmem>>, vector<1x128x37xbf16>
    %13 = vector.shape_cast %12 : vector<1x128x37xbf16> to vector<128x37xbf16>
    %cst_10 = arith.constant dense<0.000000e+00> : vector<128x384xf32>
    %14 = tpu.matmul %13, %11, %cst_10 {dimension_numbers = #tpu.dot_dimension_numbers<[1], [0], [0], [1], [0, 0, 1, 1], [], []>} : vector<128x37xbf16>, vector<37x384xbf16>, vector<128x384xf32> -> vector<128x384xf32>
    %15 = arith.addf %10, %14 : vector<128x384xf32>
    %16 = vector.extract_strided_slice %1 {offsets = [0, 18], sizes = [37, 384], strides = [1, 1]} : vector<37x422xbf16> to vector<37x384xbf16>
    %c3 = arith.constant 3 : index
    %c0_11 = arith.constant 0 : index
    %c0_12 = arith.constant 0 : index
    %17 = vector.load %arg4[%c3, %c0_11, %c0_12] : memref<9x128x37xbf16, #tpu.memory_space<vmem>>, vector<1x128x37xbf16>
    %18 = vector.shape_cast %17 : vector<1x128x37xbf16> to vector<128x37xbf16>
    %cst_13 = arith.constant dense<0.000000e+00> : vector<128x384xf32>
    %19 = tpu.matmul %18, %16, %cst_13 {dimension_numbers = #tpu.dot_dimension_numbers<[1], [0], [0], [1], [0, 0, 1, 1], [], []>} : vector<128x37xbf16>, vector<37x384xbf16>, vector<128x384xf32> -> vector<128x384xf32>
    %20 = arith.addf %15, %19 : vector<128x384xf32>
    %21 = vector.extract_strided_slice %1 {offsets = [0, 19], sizes = [37, 384], strides = [1, 1]} : vector<37x422xbf16> to vector<37x384xbf16>
    %c4 = arith.constant 4 : index
    %c0_14 = arith.constant 0 : index
    %c0_15 = arith.constant 0 : index
    %22 = vector.load %arg4[%c4, %c0_14, %c0_15] : memref<9x128x37xbf16, #tpu.memory_space<vmem>>, vector<1x128x37xbf16>
    %23 = vector.shape_cast %22 : vector<1x128x37xbf16> to vector<128x37xbf16>
    %cst_16 = arith.constant dense<0.000000e+00> : vector<128x384xf32>
    %24 = tpu.matmul %23, %21, %cst_16 {dimension_numbers = #tpu.dot_dimension_numbers<[1], [0], [0], [1], [0, 0, 1, 1], [], []>} : vector<128x37xbf16>, vector<37x384xbf16>, vector<128x384xf32> -> vector<128x384xf32>
    %25 = arith.addf %20, %24 : vector<128x384xf32>
    %26 = vector.extract_strided_slice %1 {offsets = [0, 20], sizes = [37, 384], strides = [1, 1]} : vector<37x422xbf16> to vector<37x384xbf16>
    %c5 = arith.constant 5 : index
    %c0_17 = arith.constant 0 : index
    %c0_18 = arith.constant 0 : index
    %27 = vector.load %arg4[%c5, %c0_17, %c0_18] : memref<9x128x37xbf16, #tpu.memory_space<vmem>>, vector<1x128x37xbf16>
    %28 = vector.shape_cast %27 : vector<1x128x37xbf16> to vector<128x37xbf16>
    %cst_19 = arith.constant dense<0.000000e+00> : vector<128x384xf32>
    %29 = tpu.matmul %28, %26, %cst_19 {dimension_numbers = #tpu.dot_dimension_numbers<[1], [0], [0], [1], [0, 0, 1, 1], [], []>} : vector<128x37xbf16>, vector<37x384xbf16>, vector<128x384xf32> -> vector<128x384xf32>
    %30 = arith.addf %25, %29 : vector<128x384xf32>
    %31 = vector.extract_strided_slice %1 {offsets = [0, 36], sizes = [37, 384], strides = [1, 1]} : vector<37x422xbf16> to vector<37x384xbf16>
    %c6 = arith.constant 6 : index
    %c0_20 = arith.constant 0 : index
    %c0_21 = arith.constant 0 : index
    %32 = vector.load %arg4[%c6, %c0_20, %c0_21] : memref<9x128x37xbf16, #tpu.memory_space<vmem>>, vector<1x128x37xbf16>
    %33 = vector.shape_cast %32 : vector<1x128x37xbf16> to vector<128x37xbf16>
    %cst_22 = arith.constant dense<0.000000e+00> : vector<128x384xf32>
    %34 = tpu.matmul %33, %31, %cst_22 {dimension_numbers = #tpu.dot_dimension_numbers<[1], [0], [0], [1], [0, 0, 1, 1], [], []>} : vector<128x37xbf16>, vector<37x384xbf16>, vector<128x384xf32> -> vector<128x384xf32>
    %35 = arith.addf %30, %34 : vector<128x384xf32>
    %36 = vector.extract_strided_slice %1 {offsets = [0, 37], sizes = [37, 384], strides = [1, 1]} : vector<37x422xbf16> to vector<37x384xbf16>
    %c7 = arith.constant 7 : index
    %c0_23 = arith.constant 0 : index
    %c0_24 = arith.constant 0 : index
    %37 = vector.load %arg4[%c7, %c0_23, %c0_24] : memref<9x128x37xbf16, #tpu.memory_space<vmem>>, vector<1x128x37xbf16>
    %38 = vector.shape_cast %37 : vector<1x128x37xbf16> to vector<128x37xbf16>
    %cst_25 = arith.constant dense<0.000000e+00> : vector<128x384xf32>
    %39 = tpu.matmul %38, %36, %cst_25 {dimension_numbers = #tpu.dot_dimension_numbers<[1], [0], [0], [1], [0, 0, 1, 1], [], []>} : vector<128x37xbf16>, vector<37x384xbf16>, vector<128x384xf32> -> vector<128x384xf32>
    %40 = arith.addf %35, %39 : vector<128x384xf32>
    %41 = vector.extract_strided_slice %1 {offsets = [0, 38], sizes = [37, 384], strides = [1, 1]} : vector<37x422xbf16> to vector<37x384xbf16>
    %c8 = arith.constant 8 : index
    %c0_26 = arith.constant 0 : index
    %c0_27 = arith.constant 0 : index
    %42 = vector.load %arg4[%c8, %c0_26, %c0_27] : memref<9x128x37xbf16, #tpu.memory_space<vmem>>, vector<1x128x37xbf16>
    %43 = vector.shape_cast %42 : vector<1x128x37xbf16> to vector<128x37xbf16>
    %cst_28 = arith.constant dense<0.000000e+00> : vector<128x384xf32>
    %44 = tpu.matmul %43, %41, %cst_28 {dimension_numbers = #tpu.dot_dimension_numbers<[1], [0], [0], [1], [0, 0, 1, 1], [], []>} : vector<128x37xbf16>, vector<37x384xbf16>, vector<128x384xf32> -> vector<128x384xf32>
    %45 = arith.addf %40, %44 : vector<128x384xf32>
    %46 = vector.extract_strided_slice %45 {offsets = [0, 0], sizes = [32, 384], strides = [1, 1]} : vector<128x384xf32> to vector<32x384xf32>
    %47 = arith.negf %46 : vector<32x384xf32>
    %48 = math.exp %47 : vector<32x384xf32>
    %cst_29 = arith.constant 1.000000e+00 : f32
    %49 = vector.broadcast %cst_29 : f32 to vector<32x384xf32>
    %50 = arith.addf %49, %48 : vector<32x384xf32>
    %51 = arith.divf %49, %50 : vector<32x384xf32>
    %52 = vector.extract_strided_slice %45 {offsets = [32, 0], sizes = [32, 384], strides = [1, 1]} : vector<128x384xf32> to vector<32x384xf32>
    %53 = arith.negf %52 : vector<32x384xf32>
    %54 = math.exp %53 : vector<32x384xf32>
    %cst_30 = arith.constant 1.000000e+00 : f32
    %55 = vector.broadcast %cst_30 : f32 to vector<32x384xf32>
    %56 = arith.addf %55, %54 : vector<32x384xf32>
    %57 = arith.divf %55, %56 : vector<32x384xf32>
    %58 = vector.extract_strided_slice %45 {offsets = [64, 0], sizes = [32, 384], strides = [1, 1]} : vector<128x384xf32> to vector<32x384xf32>
    %59 = arith.negf %58 : vector<32x384xf32>
    %60 = math.exp %59 : vector<32x384xf32>
    %cst_31 = arith.constant 1.000000e+00 : f32
    %61 = vector.broadcast %cst_31 : f32 to vector<32x384xf32>
    %62 = arith.addf %61, %60 : vector<32x384xf32>
    %63 = arith.divf %61, %62 : vector<32x384xf32>
    %64 = vector.extract_strided_slice %45 {offsets = [96, 0], sizes = [32, 384], strides = [1, 1]} : vector<128x384xf32> to vector<32x384xf32>
    %65 = math.tanh %64 : vector<32x384xf32>
    %c0_32 = arith.constant 0 : index
    %c0_33 = arith.constant 0 : index
    %c0_34 = arith.constant 0 : index
    %66 = vector.load %arg3[%c0_32, %c0_33, %c0_34] : memref<1x32x384xf32, #tpu.memory_space<vmem>>, vector<1x32x384xf32>
    %67 = vector.shape_cast %66 : vector<1x32x384xf32> to vector<32x384xf32>
    %68 = arith.mulf %57, %67 : vector<32x384xf32>
    %69 = arith.mulf %51, %65 : vector<32x384xf32>
    %70 = arith.addf %68, %69 : vector<32x384xf32>
    %71 = math.tanh %70 : vector<32x384xf32>
    %72 = arith.mulf %63, %71 : vector<32x384xf32>
    %c0_35 = arith.constant 0 : index
    %c0_36 = arith.constant 0 : index
    %c0_37 = arith.constant 0 : index
    %73 = vector.load %arg6[%c0_35, %c0_36, %c0_37] : memref<1x32x384xf32, #tpu.memory_space<vmem>>, vector<1x32x384xf32>
    %74 = vector.shape_cast %73 : vector<1x32x384xf32> to vector<32x384xf32>
    %75 = vector.shape_cast %70 : vector<32x384xf32> to vector<1x32x384xf32>
    tpu.vector_store %arg6[%c0_35, %c0_36, %c0_37], %75 {strides = array<i32>} : memref<1x32x384xf32, #tpu.memory_space<vmem>>, vector<1x32x384xf32>,
    %76 = arith.truncf %72 : vector<32x384xf32> to vector<32x384xbf16>
    %c0_38 = arith.constant 0 : index
    %c0_39 = arith.constant 0 : index
    %c0_40 = arith.constant 0 : index
    %77 = vector.load %arg5[%c0_38, %c0_39, %c0_40] : memref<1x32x384xbf16, #tpu.memory_space<vmem>>, vector<1x32x384xbf16>
    %78 = vector.shape_cast %77 : vector<1x32x384xbf16> to vector<32x384xbf16>
    %79 = vector.shape_cast %76 : vector<32x384xbf16> to vector<1x32x384xbf16>
    tpu.vector_store %arg5[%c0_38, %c0_39, %c0_40], %79 {strides = array<i32>} : memref<1x32x384xbf16, #tpu.memory_space<vmem>>, vector<1x32x384xbf16>,
    return
  }
  func.func @transform_0(%arg0: i32, %arg1: i32) -> (i32, i32, i32) {
    %c0_i32 = arith.constant 0 : i32
    %c0_i32_0 = arith.constant 0 : i32
    %c0_i32_1 = arith.constant 0 : i32
    return %arg0, %c0_i32, %c0_i32_0 : i32, i32, i32
  }
  func.func @transform_1(%arg0: i32, %arg1: i32) -> (i32, i32, i32) {
    %c0_i32 = arith.constant 0 : i32
    %c0_i32_0 = arith.constant 0 : i32
    return %arg0, %c0_i32, %arg1 : i32, i32, i32
  }
  func.func @transform_2(%arg0: i32, %arg1: i32) -> (i32, i32, i32) {
    %c0_i32 = arith.constant 0 : i32
    %c0_i32_0 = arith.constant 0 : i32
    %c0_i32_1 = arith.constant 0 : i32
    %c0_i32_2 = arith.constant 0 : i32
    return %c0_i32, %c0_i32_0, %c0_i32_1 : i32, i32, i32
  }
  func.func @transform_3(%arg0: i32, %arg1: i32) -> (i32, i32, i32) {
    %c0_i32 = arith.constant 0 : i32
    %c0_i32_0 = arith.constant 0 : i32
    return %arg0, %c0_i32, %arg1 : i32, i32, i32
  }
  func.func @transform_4(%arg0: i32, %arg1: i32) -> (i32, i32, i32) {
    %c0_i32 = arith.constant 0 : i32
    %c0_i32_0 = arith.constant 0 : i32
    return %arg0, %c0_i32, %arg1 : i32, i32, i32
  }
}

</mosaic_0001>

<bundles_post_ra>
// kernel: conv_lstm_cell.1
= control target key start
LH: loop header
LB: loop body
LE: loop exit
PB: predicated region body
PF: predicated region fallthrough
CT: control target
= control target key end

     0   :  { %s5307_s15 = smov 0   ;;  %s5309_s16 = smov 0   ;;  %s7521_s0 = inlined_call_operand.vmem [shape: bf16[2,37,422], index: 0, kind: input, shape index: {}]   ;;  %s7522_s1 = inlined_call_operand.vmem [shape: f32[2,32,384], index: 1, kind: input, shape index: {}, may-alias: {1,4}]   ;;  %s7523_s2 = inlined_call_operand.vmem [shape: bf16[9,128,37], index: 2, kind: input, shape index: {}]   ;;  %s7524_s3 = inlined_call_operand.vmem [shape: bf16[2,32,384], index: 3, kind: output, shape index: {0}]   ;;  %s7525_s4 = inlined_call_operand.vmem [shape: f32[2,32,384], index: 4, kind: output, shape index: {1}, may-alias: {1,4}]  }
   0x1   :  { %s5311_s17 = smov 0  }
   0x2 LB: > { %s27_s18 = sadd.s32 1, %s5266_s16  ;;  %p4213_p0 = scmp.ge.s32.totalorder %s5270_s17, 1  ;;  %s5270_s17 = sphi %s5311_s17, %s15_s17   ;;  %s5266_s16 = sphi %s5309_s16, %s7606_s16   ;;  %s5262_s15 = sphi %s5307_s15, %s7605_s15  }
   0x3   : > { %p29_p1 = scmp.ge.s32.totalorder %s27_s18, 2  ;;  %p198_p2 = scmp.lt.s32.totalorder %s5270_s17, 3 }
   0x5   : > { %s7608_s18 = smov (%p29_p1, %s27_s18), 0  ;;  %p199_p3 = pnand %p4213_p0, %p198_p2 }
   0x7   : > { %202 = sbr.rel (%p199_p3) target bundleno = 847 (0x34f), region = 32 }
   0xc   : > { %p246_p4 = scmp.lt.s32.totalorder %s5262_s15, 1  ;;  %s5272_s23 = smov 127   ;;  %v7526_v8 = vmov 0   ;;  %vm472_vm0 = vcmask 1041408   ;;  %vm431_vm1 = vcmask 1039360   ;;  %vm473_vm2 = vcmask 1042432  }
   0xd   : > { %517 = vmatprep.mubr.bf16.mxu0 %v7526_v8  ;;  %577 = vmatprep.mubr.bf16.mxu1 %v7526_v8  ;;  %s5274_s24 = smov 126   ;;  %s5275_s25 = smov 110   ;;  %v5278_v17 = vmov 65535   ;;  %v4984_v38 = vld [vmem:[%s7523_s2 + $0x40] sm:$0xff]   ;;  %v5448_v39 = vld [vmem:[%s7523_s2 + $0x70] sm:$0xff]   ;;  %vm447_vm3 = vcmask 302080  }
   0xe   : > { %s7610_s15 = smov (!%p246_p4, %s5262_s15), 1  ;;  %s5276_s26 = smov 109   ;;  %v474_v18 = vsel %vm472_vm0, 4294967295, %v5278_v17  ;;  %vm1065_vm4 = vcmask 1031168   ;;  %v4986_v45 = vld [vmem:[%s7523_s2 + $0x48] sm:$0xff]   ;;  %v5468_v46 = vld [vmem:[%s7523_s2 + $0x78] sm:$0xff]  }
   0xf   : > { %s4931_s19 = smul.u32 80, %s7610_s15  ;;  %s5277_s27 = smov 108   ;;  %v5418_v22 = vsel %vm473_vm2, %v474_v18, 0  ;;  %v4988_v54 = vld [vmem:[%s7523_s2 + $0x50] sm:$0xff]   ;;  %v4989_v58 = vld [vmem:[%s7523_s2 + $0x58] sm:$0xff]   ;;  %v4990_v61 = vld [vmem:[%s7523_s2 + $0x60] sm:$0xff]  }
  0x10   : > { %s5279_s28 = smov 92   ;;  %s5280_s13 = smov 91   ;;  %vm1453_vm5 = vcmask 900096   ;;  %vm1841_vm6 = vcmask 891904   ;;  %vm2229_vm7 = vcmask 883712   ;;  %vm2617_vm8 = vcmask 752640  }
  0x11   : > { %s250_s22 = scalar_lea.vmem %s7521_s0, %s4931_s19  ;;  %s5281_s10 = smov 90   ;;  %vm3005_vm9 = vcmask 744448   ;;  %vm3393_vm10 = vcmask 736256  }
  0x12   : > { %v290_v0 = vld [vmem:[%s250_s22 + $0x40] sm:$0x77]  ;;  %v291_v1 = vld [vmem:[%s250_s22 + $0x48] sm:$0x77]  ;;  %s4932_s21 = smul.u32 96, %s7610_s15 }
  0x13   : > { %v5331_v2 = vcombine.high %v290_v0, %v290_v0  ;;  %v5333_v3 = vcombine.low %v290_v0, %v290_v0  ;;  %v5335_v4 = vld [vmem:[%s250_s22 + $0x24] ss:$16 sps:$4 sm:$0xff]   ;;  %v5339_v5 = vcombine.low %v291_v1, %v291_v1  ;;  %v5341_v6 = vld [vmem:[%s250_s22 + $0x28] ss:$16 sps:$4 sm:$0xff]   ;;  %v5343_v7 = vld [vmem:[%s250_s22 + $0x20] ss:$16 sps:$4 sm:$0xff]   ;;  %v5359_v12 = vcombine.high %v291_v1, %v291_v1 }
  0x14   : > { %v5349_v9 = vld [vmem:[%s250_s22 + $0x8] ss:$16 sps:$4 sm:$0xff]   ;;  %v5351_v10 = vld [vmem:[%s250_s22 + $0x4] ss:$16 sps:$4 sm:$0xff]   ;;  %v5355_v11 = vld [vmem:[%s250_s22] ss:$16 sps:$4 sm:$0xff]  }
  0x15   : > { %425 = vrot.lane.b32.xlu0 %v5331_v2, %s5272_s23  ;;  %423 = vrot.lane.b32.xlu1 %v5333_v3, %s5272_s23  ;;  %v5361_v13 = vld [vmem:[%s250_s22 + $0xc] ss:$16 sps:$4 sm:$0xff]   ;;  %v772_v33 = vand.u32 %v5339_v5, %v5418_v22  ;;  %v769_v50 = vand.u32 %v5331_v2, %v5418_v22  ;;  %v766_v55 = vand.u32 %v5333_v3, %v5418_v22 }
  0x16   : > { %v5363_v14 = vld [vmem:[%s250_s22 + $0x2c] ss:$16 sps:$4 sm:$0xff]  }
  0x17   : > { %v4991_v0 = vld [vmem:[%s7523_s2 + $0x68] sm:$0xff]  }
  0x19   : > { %427 = vrot.lane.b32.xlu0 %v5339_v5, %s5272_s23  ;;  %417 = vrot.lane.b32.xlu1 %v5335_v4, %s5272_s23 }
  0x1d   : > { %419 = vrot.lane.b32.xlu0 %v5341_v6, %s5272_s23  ;;  %415 = vrot.lane.b32.xlu1 %v5343_v7, %s5272_s23 }
  0x21   : > { %411 = vrot.lane.b32.xlu1 %v5349_v9, %s5272_s23  ;;  %409 = vrot.lane.b32.xlu0 %v5351_v10, %s5272_s23 }
  0x25   : > { %429 = vrot.lane.b32.xlu1 %v5359_v12, %s5272_s23  ;;  %407 = vrot.lane.b32.xlu0 %v5355_v11, %s5272_s23 }
  0x29   : > { %413 = vrot.lane.b32.xlu1 %v5361_v13, %s5272_s23  ;;  %421 = vrot.lane.b32.xlu0 %v5363_v14, %s5272_s23 }
  0x2d   : > { %1061 = vrot.lane.b32.xlu1 %v5339_v5, %s5274_s24  ;;  %1059 = vrot.lane.b32.xlu0 %v5331_v2, %s5274_s24 }
  0x31   : > { %1051 = vrot.lane.b32.xlu1 %v5335_v4, %s5274_s24  ;;  %1057 = vrot.lane.b32.xlu0 %v5333_v3, %s5274_s24 }
  0x35   : > { %1049 = vrot.lane.b32.xlu1 %v5343_v7, %s5274_s24  ;;  %1053 = vrot.lane.b32.xlu0 %v5341_v6, %s5274_s24 }
  0x39   : > { %1045 = vrot.lane.b32.xlu1 %v5349_v9, %s5274_s24  ;;  %1043 = vrot.lane.b32.xlu0 %v5351_v10, %s5274_s24 }
  0x3d   : > { %1063 = vrot.lane.b32.xlu1 %v5359_v12, %s5274_s24  ;;  %1041 = vrot.lane.b32.xlu0 %v5355_v11, %s5274_s24 }
  0x41   : > { %1047 = vrot.lane.b32.xlu1 %v5361_v13, %s5274_s24  ;;  %1055 = vrot.lane.b32.xlu0 %v5363_v14, %s5274_s24  ;;  %s7385_s24 = scalar_lea.vmem %s7522_s1, %s4932_s21 }
  0x45   : > { %1449 = vrot.lane.b32.xlu1 %v5339_v5, %s5275_s25  ;;  %1447 = vrot.lane.b32.xlu0 %v5331_v2, %s5275_s25 }
  0x49   : > { %1451 = vrot.lane.b32.xlu1 %v5359_v12, %s5275_s25  ;;  %1445 = vrot.lane.b32.xlu0 %v5333_v3, %s5275_s25 }
  0x4d   : > { %1441 = vrot.lane.b32.xlu1 %v5341_v6, %s5275_s25  ;;  %1439 = vrot.lane.b32.xlu0 %v5335_v4, %s5275_s25 }
  0x51   : > { %1443 = vrot.lane.b32.xlu1 %v5363_v14, %s5275_s25  ;;  %1437 = vrot.lane.b32.xlu0 %v5343_v7, %s5275_s25 }
  0x55   : > { %1433 = vrot.lane.b32.xlu1 %v5349_v9, %s5275_s25  ;;  %1431 = vrot.lane.b32.xlu0 %v5351_v10, %s5275_s25 }
  0x59   : > { %1435 = vrot.lane.b32.xlu1 %v5361_v13, %s5275_s25  ;;  %1429 = vrot.lane.b32.xlu0 %v5355_v11, %s5275_s25 }
  0x5d   : > { %1837 = vrot.lane.b32.xlu1 %v5339_v5, %s5276_s26  ;;  %1835 = vrot.lane.b32.xlu0 %v5331_v2, %s5276_s26 }
  0x61   : > { %1827 = vrot.lane.b32.xlu1 %v5335_v4, %s5276_s26  ;;  %1833 = vrot.lane.b32.xlu0 %v5333_v3, %s5276_s26 }
  0x65   : > { %1825 = vrot.lane.b32.xlu1 %v5343_v7, %s5276_s26  ;;  %1829 = vrot.lane.b32.xlu0 %v5341_v6, %s5276_s26 }
  0x69   : > { %1821 = vrot.lane.b32.xlu1 %v5349_v9, %s5276_s26  ;;  %1819 = vrot.lane.b32.xlu0 %v5351_v10, %s5276_s26 }
  0x6d   : > { %1839 = vrot.lane.b32.xlu1 %v5359_v12, %s5276_s26  ;;  %1817 = vrot.lane.b32.xlu0 %v5355_v11, %s5276_s26 }
  0x71   : > { %1823 = vrot.lane.b32.xlu1 %v5361_v13, %s5276_s26  ;;  %1831 = vrot.lane.b32.xlu0 %v5363_v14, %s5276_s26 }
  0x75   : > { %2225 = vrot.lane.b32.xlu1 %v5339_v5, %s5277_s27  ;;  %2223 = vrot.lane.b32.xlu0 %v5331_v2, %s5277_s27 }
  0x79   : > { %2227 = vrot.lane.b32.xlu1 %v5359_v12, %s5277_s27  ;;  %2221 = vrot.lane.b32.xlu0 %v5333_v3, %s5277_s27 }
  0x7d   : > { %2217 = vrot.lane.b32.xlu1 %v5341_v6, %s5277_s27  ;;  %2215 = vrot.lane.b32.xlu0 %v5335_v4, %s5277_s27 }
  0x81   : > { %2219 = vrot.lane.b32.xlu1 %v5363_v14, %s5277_s27  ;;  %2213 = vrot.lane.b32.xlu0 %v5343_v7, %s5277_s27 }
  0x85   : > { %2209 = vrot.lane.b32.xlu1 %v5349_v9, %s5277_s27  ;;  %2207 = vrot.lane.b32.xlu0 %v5351_v10, %s5277_s27 }
  0x87   : > { %v426_v15 = vpop.permute.xlu0 %425  ;;  %v424_v16 = vpop.permute.xlu1 %423 }
  0x88   : > { %v438_v19 = vsel %vm431_vm1, %v424_v16, %v426_v15 }
  0x89   : > { %2211 = vrot.lane.b32.xlu1 %v5361_v13, %s5277_s27  ;;  %2205 = vrot.lane.b32.xlu0 %v5355_v11, %s5277_s27  ;;  %v477_v25 = vand.u32 %v5418_v22, %v438_v19  ;;  %s7417_s27 = scalar_lea.vmem %s7525_s4, %s4932_s21 }
  0x8b   : > { %v428_v20 = vpop.permute.xlu0 %427  ;;  %v418_v21 = vpop.permute.xlu1 %417 }
  0x8c   : > { %v439_v23 = vsel %vm431_vm1, %v426_v15, %v428_v20  ;;  %v4992_v15 = vld [vmem:[%s7523_s2] sm:$0xff]  }
  0x8d   : > { %v480_v24 = vand.u32 %v5418_v22, %v439_v23  ;;  %2613 = vrot.lane.b32.xlu1 %v5339_v5, %s5279_s28  ;;  %2611 = vrot.lane.b32.xlu0 %v5331_v2, %s5279_s28 }
  0x8f   : > { %495 = vmatprep.subr.bf16.mxu0 %v480_v24  ;;  %4925 = vmatprep.subr.bf16.mxu1 %v480_v24  ;;  %v420_v26 = vpop.permute.xlu0 %419  ;;  %v416_v27 = vpop.permute.xlu1 %415 }
  0x90   : > { %496 = vmatpush1.bf16.msra.mxu0 %v477_v25  ;;  %4928 = vmatpush1.bf16.msra.mxu1 %v477_v25  ;;  %v436_v28 = vsel %vm431_vm1, %v418_v21, %v420_v26  ;;  %v435_v31 = vsel %vm431_vm1, %v416_v27, %v418_v21 }
  0x91   : > { %497 = vmatprep.subr.bf16.mxu0 %v436_v28  ;;  %4926 = vmatprep.subr.bf16.mxu1 %v436_v28 }
  0x92   : > { %2603 = vrot.lane.b32.xlu1 %v5335_v4, %s5279_s28  ;;  %2609 = vrot.lane.b32.xlu0 %v5333_v3, %s5279_s28 }
  0x93   : > { %v412_v29 = vpop.permute.xlu1 %411  ;;  %v410_v30 = vpop.permute.xlu0 %409 }
  0x94   : > { %498 = vmatpush1.bf16.msra.mxu0 %v435_v31  ;;  %4929 = vmatpush1.bf16.msra.mxu1 %v435_v31  ;;  %v433_v32 = vsel %vm431_vm1, %v410_v30, %v412_v29 }
  0x95   : > { %499 = vmatprep.subr.bf16.mxu0 %v433_v32  ;;  %4927 = vmatprep.subr.bf16.mxu1 %v433_v32  ;;  %v4995_v32 = vld [vmem:[%s7523_s2 + $0x18] sm:$0xff]  }
  0x96   : > { %2601 = vrot.lane.b32.xlu1 %v5343_v7, %s5279_s28  ;;  %2605 = vrot.lane.b32.xlu0 %v5341_v6, %s5279_s28 }
  0x97   : > { %v430_v34 = vpop.permute.xlu1 %429  ;;  %v408_v35 = vpop.permute.xlu0 %407 }
  0x98   : > { %v440_v36 = vsel %vm431_vm1, %v428_v20, %v430_v34  ;;  %v432_v37 = vsel %vm431_vm1, %v408_v35, %v410_v30  ;;  %v4993_v20 = vld [vmem:[%s7523_s2 + $0x8] sm:$0xff]  }
  0x99   : > { %v483_v40 = vand.u32 %v5418_v22, %v440_v36  ;;  %500 = vmatpush1.bf16.msra.mxu0 %v432_v37  ;;  %4930 = vmatpush1.bf16.msra.mxu1 %v432_v37  ;;  %v4996_v36 = vld [vmem:[%s7523_s2 + $0x20] sm:$0xff]  }
  0x9a   : > { %4749 = vmatprep.subr.bf16.mxu0 %v772_v33  ;;  %2597 = vrot.lane.b32.xlu1 %v5349_v9, %s5279_s28 }
  0x9b   : > { %v414_v41 = vpop.permute.xlu1 %413  ;;  %4727 = vmatprep.subr.bf16.mxu1 %v483_v40  ;;  %v422_v42 = vpop.permute.xlu0 %421  ;;  %2595 = vrot.lane.b32.xlu0 %v5351_v10, %s5279_s28 }
  0x9c   : > { %4254 = vmatmul.mubr.msk.bf16.vlgmr.msra.gmra.mxu0 %vm447_vm3, %v4984_v38  ;;  %4260 = vmatmul.mubr.msk.bf16.vlgmr.msra.gmra.mxu1 %vm447_vm3, %v5448_v39  ;;  %v437_v43 = vsel %vm431_vm1, %v420_v26, %v422_v42  ;;  %v434_v48 = vsel %vm431_vm1, %v412_v29, %v414_v41  ;;  %v4994_v26 = vld [vmem:[%s7523_s2 + $0x10] sm:$0xff]  }
  0x9d   : > { %4728 = vmatpush3.bf16.msra.mxu1 %v483_v40  ;;  %4750 = vmatpush3.bf16.msra.mxu0 %v772_v33  ;;  %v4997_v40 = vld [vmem:[%s7523_s2 + $0x28] sm:$0xff]   ;;  %v4998_v41 = vld [vmem:[%s7523_s2 + $0x30] sm:$0xff]  }
  0x9e   : > { %4729 = vmatprep.subr.bf16.mxu1 %v437_v43  ;;  %527 = vmatprep.mubr.bf16.mxu0 %v7526_v8 }
  0x9f   : > { %587 = vmatprep.mubr.bf16.mxu1 %v7526_v8  ;;  %v1062_v44 = vpop.permute.xlu1 %1061  ;;  %4751 = vmatprep.subr.bf16.mxu0 %v5341_v6  ;;  %v5470_v47 = vpop.permute.xlu0 %1059 }
  0xa0   : > { %2615 = vrot.lane.b32.xlu1 %v5359_v12, %s5279_s28  ;;  %2593 = vrot.lane.b32.xlu0 %v5355_v11, %s5279_s28  ;;  %v1073_v49 = vsel %vm1065_vm4, %v5470_v47, %v1062_v44 }
  0xa1   : > { %4730 = vmatpush3.bf16.msra.mxu1 %v437_v43  ;;  %4752 = vmatpush3.bf16.msra.mxu0 %v5341_v6  ;;  %v1109_v52 = vand.u32 %v1073_v49, %v5418_v22  ;;  %v5003_v49 = vld [vmem:[%s7523_s2 + $0x98] sm:$0xff]  }
  0xa2   : > { %4731 = vmatprep.subr.bf16.mxu1 %v434_v48  ;;  %4753 = vmatprep.subr.bf16.mxu0 %v5349_v9 }
  0xa3   : > { %v5483_v51 = vpop.permute.xlu1 %1051  ;;  %v1058_v60 = vpop.permute.xlu0 %1057 }
  0xa4   : > { %4255 = vmatmul.mubr.msk.bf16.gmra.mxu0 %vm447_vm3, %v4986_v45  ;;  %4261 = vmatmul.mubr.msk.bf16.gmra.mxu1 %vm447_vm3, %v5468_v46  ;;  %v1072_v18 = vsel %vm1065_vm4, %v1058_v60, %v5470_v47 }
  0xa5   : > { %4732 = vmatpush3.bf16.msra.mxu1 %v434_v48  ;;  %537 = vmatprep.mubr.bf16.mxu0 %v7526_v8  ;;  %v1106_v23 = vand.u32 %v1072_v18, %v5418_v22 }
  0xa6   : > { %4733 = vmatprep.mubr.msk.bf16.mxu1 %vm447_vm3, %v4984_v38  ;;  %784 = vmatprep.subr.bf16.mxu1 %v769_v50 }
  0xa7   : > { %v5491_v53 = vpop.permute.xlu1 %1049  ;;  %4754 = vmatpush3.bf16.msra.mxu0 %v5349_v9  ;;  %2599 = vrot.lane.b32.xlu1 %v5361_v13, %s5279_s28  ;;  %v1054_v63 = vpop.permute.xlu0 %1053 }
  0xa8   : > { %1124 = vmatprep.subr.bf16.mxu0 %v1109_v52  ;;  %2607 = vrot.lane.b32.xlu0 %v5363_v14, %s5279_s28  ;;  %v1070_v24 = vsel %vm1065_vm4, %v5483_v51, %v1054_v63  ;;  %v1069_v29 = vsel %vm1065_vm4, %v5491_v53, %v5483_v51  ;;  %v5004_v53 = vld [vmem:[%s7523_s2 + $0xa0] sm:$0xff]   ;;  %s4933_s28 = smul.u32 48, %s7610_s15 }
  0xaa   : > { %s7484_s30 = scalar_lea.vmem %s7524_s3, %s4933_s28 }
  0xab   : > { %v5503_v56 = vpop.permute.xlu1 %1045  ;;  %3001 = vrot.lane.b32.xlu1 %v5339_v5, %s5280_s13  ;;  %v1044_v1 = vpop.permute.xlu0 %1043 }
  0xac   : > { %4256 = vmatmul.mubr.msk.bf16.gmra.mxu0 %vm447_vm3, %v4988_v54  ;;  %4734 = vmatmul.mubr.msk.bf16.vlgmr.msra.gmra.mxu1 %vm447_vm3, %v4986_v45  ;;  %v1067_v30 = vsel %vm1065_vm4, %v1044_v1, %v5503_v56 }
  0xad   : > { %785 = vmatpush1.bf16.msra.mxu1 %v766_v55  ;;  %547 = vmatprep.mubr.bf16.mxu0 %v7526_v8 }
  0xae   : > { %4737 = vmatprep.mubr.msk.bf16.mxu1 %vm447_vm3, %v4988_v54  ;;  %786 = vmatprep.subr.bf16.mxu1 %v5335_v4 }
  0xaf   : > { %v1064_v57 = vpop.permute.xlu1 %1063  ;;  %2999 = vrot.lane.b32.xlu0 %v5331_v2, %s5280_s13  ;;  %3003 = vrot.lane.b32.xlu1 %v5359_v12, %s5280_s13  ;;  %v1042_v16 = vpop.permute.xlu0 %1041 }
  0xb0   : > { %v1074_v59 = vsel %vm1065_vm4, %v1062_v44, %v1064_v57  ;;  %v1066_v35 = vsel %vm1065_vm4, %v1042_v16, %v1044_v1  ;;  %v4999_v44 = vld [vmem:[%s7523_s2 + $0x38] sm:$0xff]   ;;  %v5006_v1 = vld [vmem:[%s7523_s2 + $0xb0] sm:$0xff]  }
  0xb1   : > { %787 = vmatpush1.bf16.msra.mxu1 %v5343_v7  ;;  %v1112_v62 = vand.u32 %v1074_v59, %v5418_v22  ;;  %v5005_v59 = vld [vmem:[%s7523_s2 + $0xa8] sm:$0xff]   ;;  %v5007_v16 = vld [vmem:[%s7523_s2 + $0xb8] sm:$0xff]  }
  0xb2   : > { %788 = vmatprep.subr.bf16.mxu1 %v5351_v10 }
  0xb3   : > { %2997 = vrot.lane.b32.xlu0 %v5333_v3, %s5280_s13  ;;  %2993 = vrot.lane.b32.xlu1 %v5341_v6, %s5280_s13  ;;  %v1048_v17 = vpop.permute.xlu1 %1047  ;;  %v1056_v21 = vpop.permute.xlu0 %1055 }
  0xb4   : > { %4257 = vmatmul.mubr.msk.bf16.gmra.mxu0 %vm447_vm3, %v4989_v58  ;;  %4738 = vmatmul.mubr.msk.bf16.gmra.mxu1 %vm447_vm3, %v4989_v58  ;;  %v1071_v25 = vsel %vm1065_vm4, %v1054_v63, %v1056_v21  ;;  %v1068_v31 = vsel %vm1065_vm4, %v5503_v56, %v1048_v17  ;;  %v5008_v17 = vld [vmem:[%s7523_s2 + $0xc0] sm:$0xff]  }
  0xb5   : > { %557 = vmatprep.mubr.bf16.mxu0 %v7526_v8  ;;  %4741 = vmatprep.mubr.msk.bf16.mxu1 %vm447_vm3, %v4990_v61 }
  0xb6   : > { %789 = vmatpush1.bf16.msra.mxu1 %v5355_v11 }
  0xb7   : > { %4771 = vmatprep.subr.bf16.mxu1 %v1112_v62  ;;  %2991 = vrot.lane.b32.xlu0 %v5335_v4, %s5280_s13  ;;  %v1450_v19 = vpop.permute.xlu1 %1449  ;;  %v5579_v28 = vpop.permute.xlu0 %1447 }
  0xb8   : > { %2995 = vrot.lane.b32.xlu1 %v5363_v14, %s5280_s13  ;;  %v1461_v34 = vsel %vm1453_vm5, %v5579_v28, %v1450_v19 }
  0xb9   : > { %v1497_v38 = vand.u32 %v1461_v34, %v5418_v22  ;;  %v5011_v34 = vld [vmem:[%s7523_s2 + $0xd8] sm:$0xff]  }
  0xbb   : > { %2989 = vrot.lane.b32.xlu0 %v5343_v7, %s5280_s13  ;;  %v1452_v27 = vpop.permute.xlu1 %1451 }
  0xbc   : > { %4258 = vmatmul.mubr.msk.bf16.gmra.mxu0 %vm447_vm3, %v4990_v61  ;;  %4742 = vmatmul.mubr.msk.bf16.gmra.mxu1 %vm447_vm3, %v4991_v0  ;;  %v1462_v33 = vsel %vm1453_vm5, %v1450_v19, %v1452_v27 }
  0xbd   : > { %567 = vmatprep.mubr.bf16.mxu0 %v7526_v8  ;;  %4745 = vmatprep.mubr.msk.bf16.mxu1 %vm447_vm3, %v5448_v39  ;;  %v1500_v37 = vand.u32 %v1462_v33, %v5418_v22  ;;  %v5602_v39 = vpop.permute.xlu0 %1445 }
  0xbe   : > { %2985 = vrot.lane.b32.xlu1 %v5349_v9, %s5280_s13  ;;  %v1460_v51 = vsel %vm1453_vm5, %v5602_v39, %v5579_v28  ;;  %v5010_v28 = vld [vmem:[%s7523_s2 + $0xd0] sm:$0xff]  }
  0xbf   : > { %2983 = vrot.lane.b32.xlu0 %v5351_v10, %s5280_s13  ;;  %v5618_v42 = vpop.permute.xlu1 %1441  ;;  %v1494_v54 = vand.u32 %v1460_v51, %v5418_v22 }
  0xc1   : > { %v5620_v43 = vpop.permute.xlu0 %1439 }
  0xc2   : > { %2987 = vrot.lane.b32.xlu1 %v5361_v13, %s5280_s13  ;;  %v1458_v55 = vsel %vm1453_vm5, %v5620_v43, %v5618_v42 }
  0xc3   : > { %2981 = vrot.lane.b32.xlu0 %v5355_v11, %s5280_s13 }
  0xc4   : > { %4259 = vmatmul.mubr.msk.bf16.gmra.mxu0 %vm447_vm3, %v4991_v0  ;;  %4746 = vmatmul.mubr.msk.bf16.gmra.mxu1 %vm447_vm3, %v5468_v46 }
  0xc5   : > { %806 = vmatprep.mubr.bf16.mxu1 %v7526_v8  ;;  %4755 = vmatprep.mubr.msk.bf16.mxu0 %vm447_vm3, %v4992_v15 }
  0xc6   : > { %3389 = vrot.lane.b32.xlu1 %v5339_v5, %s5281_s10  ;;  %v5630_v5 = vpop.permute.xlu0 %1437 }
  0xc7   : > { %3387 = vrot.lane.b32.xlu0 %v5331_v2, %s5281_s10  ;;  %v1444_v2 = vpop.permute.xlu1 %1443  ;;  %v1457_v57 = vsel %vm1453_vm5, %v5630_v5, %v5620_v43  ;;  %v5014_v43 = vld [vmem:[%s7523_s2 + $0xf0] sm:$0xff]  }
  0xca   : > { %3379 = vrot.lane.b32.xlu1 %v5335_v4, %s5281_s10  ;;  %v5643_v4 = vpop.permute.xlu0 %1431 }
  0xcb   : > { %3385 = vrot.lane.b32.xlu0 %v5333_v3, %s5281_s10  ;;  %v1434_v3 = vpop.permute.xlu1 %1433 }
  0xcc   : > { %4278 = vmatmul.mubr.msk.bf16.vlgmr.msra.gmra.mxu1 %vm447_vm3, %v4992_v15  ;;  %4756 = vmatmul.mubr.msk.bf16.vlgmr.msra.gmra.mxu0 %vm447_vm3, %v4993_v20  ;;  %v1455_v58 = vsel %vm1453_vm5, %v5643_v4, %v1434_v3 }
  0xcd   : > { %1125 = vmatpush1.bf16.msra.mxu0 %v1106_v23  ;;  %4772 = vmatpush3.bf16.msra.mxu1 %v1112_v62  ;;  %v5009_v23 = vld [vmem:[%s7523_s2 + $0xc8] sm:$0xff]  }
  0xce   : > { %1126 = vmatprep.subr.bf16.mxu0 %v1070_v24  ;;  %4773 = vmatprep.subr.bf16.mxu1 %v1071_v25  ;;  %v1430_v46 = vpop.permute.xlu0 %1429 }
  0xcf   : > { %816 = vmatprep.mubr.bf16.mxu1 %v7526_v8  ;;  %4759 = vmatprep.mubr.msk.bf16.mxu0 %vm447_vm3, %v4994_v26  ;;  %v1436_v45 = vpop.permute.xlu1 %1435  ;;  %v1454_v62 = vsel %vm1453_vm5, %v1430_v46, %v5643_v4  ;;  %v5015_v4 = vld [vmem:[%s7523_s2 + $0xf8] sm:$0xff]  }
  0xd0   : > { %3377 = vrot.lane.b32.xlu1 %v5343_v7, %s5281_s10  ;;  %3381 = vrot.lane.b32.xlu0 %v5341_v6, %s5281_s10  ;;  %v5000_v6 = vld [vmem:[%s7523_s2 + $0x80] sm:$0xff]   ;;  %v1459_v7 = vsel %vm1453_vm5, %v5618_v42, %v1444_v2  ;;  %v5013_v42 = vld [vmem:[%s7523_s2 + $0xe8] sm:$0xff]  }
  0xd1   : > { %1127 = vmatpush1.bf16.msra.mxu0 %v1069_v29  ;;  %4774 = vmatpush3.bf16.msra.mxu1 %v1071_v25 }
  0xd2   : > { %1128 = vmatprep.subr.bf16.mxu0 %v1067_v30  ;;  %4775 = vmatprep.subr.bf16.mxu1 %v1068_v31 }
  0xd4   : > { %4279 = vmatmul.mubr.msk.bf16.gmra.mxu1 %vm447_vm3, %v4993_v20  ;;  %4760 = vmatmul.mubr.msk.bf16.gmra.mxu0 %vm447_vm3, %v4995_v32 }
  0xd5   : > { %4776 = vmatpush3.bf16.msra.mxu1 %v1068_v31  ;;  %1129 = vmatpush1.bf16.msra.mxu0 %v1066_v35 }
  0xd6   : > { %826 = vmatprep.mubr.bf16.mxu1 %v7526_v8  ;;  %4763 = vmatprep.mubr.msk.bf16.mxu0 %vm447_vm3, %v4996_v36 }
  0xd7   : > { %1512 = vmatprep.subr.bf16.mxu1 %v1497_v38  ;;  %4793 = vmatprep.subr.bf16.mxu0 %v1500_v37  ;;  %v5012_v38 = vld [vmem:[%s7523_s2 + $0xe0] sm:$0xff]  }
  0xd8   : > { %3373 = vrot.lane.b32.xlu1 %v5349_v9, %s5281_s10  ;;  %3371 = vrot.lane.b32.xlu0 %v5351_v10, %s5281_s10  ;;  %v1838_v9 = vpop.permute.xlu1 %1837  ;;  %v1456_v10 = vsel %vm1453_vm5, %v1434_v3, %v1436_v45  ;;  %v5016_v45 = vld [vmem:[%s7523_s2 + $0x100] sm:$0xff]  }
  0xdc   : > { %4280 = vmatmul.mubr.msk.bf16.gmra.mxu1 %vm447_vm3, %v4994_v26  ;;  %4764 = vmatmul.mubr.msk.bf16.gmra.mxu0 %vm447_vm3, %v4997_v40 }
  0xdd   : > { %836 = vmatprep.mubr.bf16.mxu1 %v7526_v8  ;;  %4767 = vmatprep.mubr.msk.bf16.mxu0 %vm447_vm3, %v4998_v41 }
  0xde   : > { %3391 = vrot.lane.b32.xlu1 %v5359_v12, %s5281_s10  ;;  %3369 = vrot.lane.b32.xlu0 %v5355_v11, %s5281_s10  ;;  %v5663_v11 = vpop.permute.xlu0 %1835  ;;  %v5001_v12 = vld [vmem:[%s7523_s2 + $0x88] sm:$0xff]  }
  0xdf   : > { %v1849_v47 = vsel %vm1841_vm6, %v5663_v11, %v1838_v9 }
  0xe0   : > { %v1885_v48 = vand.u32 %v1849_v47, %v5418_v22 }
  0xe2   : > { %3375 = vrot.lane.b32.xlu1 %v5361_v13, %s5281_s10  ;;  %3383 = vrot.lane.b32.xlu0 %v5363_v14, %s5281_s10  ;;  %v5002_v13 = vld [vmem:[%s7523_s2 + $0x90] sm:$0xff]   ;;  %v5682_v14 = vpop.permute.xlu1 %1827  ;;  %v1834_v61 = vpop.permute.xlu0 %1833 }
  0xe3   : > { %v1848_v20 = vsel %vm1841_vm6, %v1834_v61, %v5663_v11 }
  0xe4   : > { %4281 = vmatmul.mubr.msk.bf16.gmra.mxu1 %vm447_vm3, %v4995_v32  ;;  %4768 = vmatmul.mubr.msk.bf16.gmra.mxu0 %vm447_vm3, %v4999_v44  ;;  %v1882_v25 = vand.u32 %v1848_v20, %v5418_v22 }
  0xe5   : > { %846 = vmatprep.mubr.bf16.mxu1 %v7526_v8  ;;  %1146 = vmatprep.mubr.bf16.mxu0 %v7526_v8 }
  0xe6   : > { %v5691_v50 = vpop.permute.xlu1 %1825  ;;  %v1830_v0 = vpop.permute.xlu0 %1829 }
  0xe7   : > { %v1846_v26 = vsel %vm1841_vm6, %v5682_v14, %v1830_v0  ;;  %v1845_v31 = vsel %vm1841_vm6, %v5691_v50, %v5682_v14 }
  0xea   : > { %v1822_v52 = vpop.permute.xlu1 %1821  ;;  %v1820_v15 = vpop.permute.xlu0 %1819 }
  0xeb   : > { %v1843_v32 = vsel %vm1841_vm6, %v1820_v15, %v1822_v52 }
  0xec   : > { %4282 = vmatmul.mubr.msk.bf16.gmra.mxu1 %vm447_vm3, %v4996_v36  ;;  %4318 = vmatmul.mubr.msk.bf16.vlgmr.msra.gmra.mxu0 %vm447_vm3, %v5000_v6 }
  0xed   : > { %4794 = vmatpush3.bf16.msra.mxu0 %v1500_v37  ;;  %856 = vmatprep.mubr.bf16.mxu1 %v7526_v8 }
  0xee   : > { %1156 = vmatprep.mubr.bf16.mxu0 %v7526_v8  ;;  %4795 = vmatprep.subr.bf16.mxu0 %v1459_v7  ;;  %v1840_v56 = vpop.permute.xlu1 %1839  ;;  %v1818_v18 = vpop.permute.xlu0 %1817 }
  0xef   : > { %v1850_v60 = vsel %vm1841_vm6, %v1838_v9, %v1840_v56  ;;  %v1842_v37 = vsel %vm1841_vm6, %v1818_v18, %v1820_v15  ;;  %v5020_v18 = vld [vmem:[%s7523_s2 + $0x120] sm:$0xff]  }
  0xf0   : > { %v1888_v63 = vand.u32 %v1850_v60, %v5418_v22 }
  0xf1   : > { %4796 = vmatpush3.bf16.msra.mxu0 %v1459_v7 }
  0xf2   : > { %4797 = vmatprep.subr.bf16.mxu0 %v1456_v10  ;;  %v1824_v19 = vpop.permute.xlu1 %1823  ;;  %v1832_v24 = vpop.permute.xlu0 %1831 }
  0xf3   : > { %v1847_v27 = vsel %vm1841_vm6, %v1830_v0, %v1832_v24  ;;  %v1844_v33 = vsel %vm1841_vm6, %v1822_v52, %v1824_v19 }
  0xf4   : > { %4283 = vmatmul.mubr.msk.bf16.gmra.mxu1 %vm447_vm3, %v4997_v40  ;;  %4319 = vmatmul.mubr.msk.bf16.gmra.mxu0 %vm447_vm3, %v5001_v12 }
  0xf5   : > { %866 = vmatprep.mubr.bf16.mxu1 %v7526_v8  ;;  %1166 = vmatprep.mubr.bf16.mxu0 %v7526_v8 }
  0xf6   : > { %4798 = vmatpush3.bf16.msra.mxu0 %v1456_v10  ;;  %v2226_v21 = vpop.permute.xlu1 %2225  ;;  %v5758_v30 = vpop.permute.xlu0 %2223 }
  0xf7   : > { %1900 = vmatprep.subr.bf16.mxu0 %v1885_v48  ;;  %v2237_v36 = vsel %vm2229_vm7, %v5758_v30, %v2226_v21  ;;  %v5017_v48 = vld [vmem:[%s7523_s2 + $0x108] sm:$0xff]  }
  0xf8   : > { %v2273_v40 = vand.u32 %v2237_v36, %v5418_v22 }
  0xfa   : > { %v2228_v29 = vpop.permute.xlu1 %2227 }
  0xfb   : > { %v2238_v35 = vsel %vm2229_vm7, %v2226_v21, %v2228_v29 }
  0xfc   : > { %4284 = vmatmul.mubr.msk.bf16.gmra.mxu1 %vm447_vm3, %v4998_v41  ;;  %4320 = vmatmul.mubr.msk.bf16.gmra.mxu0 %vm447_vm3, %v5002_v13  ;;  %v2276_v39 = vand.u32 %v2238_v35, %v5418_v22  ;;  %v5779_v41 = vpop.permute.xlu0 %2221 }
  0xfd   : > { %876 = vmatprep.mubr.bf16.mxu1 %v7526_v8  ;;  %1176 = vmatprep.mubr.bf16.mxu0 %v7526_v8 }
  0xfe   : > { %v5791_v2 = vpop.permute.xlu1 %2217 }
 0x100   : > { %v5793_v5 = vpop.permute.xlu0 %2215 }
 0x104   : > { %4285 = vmatmul.mubr.msk.bf16.gmra.mxu1 %vm447_vm3, %v4999_v44  ;;  %4321 = vmatmul.mubr.msk.bf16.gmra.mxu0 %vm447_vm3, %v5003_v49  ;;  %v2220_v44 = vpop.permute.xlu1 %2219  ;;  %v5799_v3 = vpop.permute.xlu0 %2213 }
 0x105   : > { %1186 = vmatprep.mubr.bf16.mxu0 %v7526_v8  ;;  %4777 = vmatprep.mubr.msk.bf16.mxu1 %vm447_vm3, %v5000_v6  ;;  %v2235_v46 = vsel %vm2229_vm7, %v5791_v2, %v2220_v44 }
 0x108   : > { %v5808_v6 = vpop.permute.xlu1 %2209  ;;  %v5810_v7 = vpop.permute.xlu0 %2207 }
 0x10c   : > { %4322 = vmatmul.mubr.msk.bf16.gmra.mxu0 %vm447_vm3, %v5004_v53  ;;  %4778 = vmatmul.mubr.msk.bf16.vlgmr.msra.gmra.mxu1 %vm447_vm3, %v5001_v12  ;;  %v2212_v9 = vpop.permute.xlu1 %2211  ;;  %v5817_v10 = vpop.permute.xlu0 %2205 }
 0x10d   : > { %1513 = vmatpush1.bf16.msra.mxu1 %v1494_v54  ;;  %1196 = vmatprep.mubr.bf16.mxu0 %v7526_v8  ;;  %v2232_v12 = vsel %vm2229_vm7, %v5808_v6, %v2212_v9 }
 0x10e   : > { %1514 = vmatprep.subr.bf16.mxu1 %v1458_v55  ;;  %4781 = vmatprep.mubr.msk.bf16.mxu1 %vm447_vm3, %v5002_v13 }
 0x110   : > { %v5823_v11 = vpop.permute.xlu1 %2613  ;;  %v5827_v47 = vpop.permute.xlu0 %2611 }
 0x111   : > { %1515 = vmatpush1.bf16.msra.mxu1 %v1457_v57  ;;  %v2625_v13 = vsel %vm2617_vm8, %v5827_v47, %v5823_v11  ;;  %v5019_v57 = vld [vmem:[%s7523_s2 + $0x118] sm:$0xff]  }
 0x112   : > { %1516 = vmatprep.subr.bf16.mxu1 %v1455_v58  ;;  %v2661_v14 = vand.u32 %v2625_v13, %v5418_v22 }
 0x114   : > { %4323 = vmatmul.mubr.msk.bf16.gmra.mxu0 %vm447_vm3, %v5005_v59  ;;  %4782 = vmatmul.mubr.msk.bf16.gmra.mxu1 %vm447_vm3, %v5003_v49  ;;  %v5018_v49 = vld [vmem:[%s7523_s2 + $0x110] sm:$0xff]   ;;  %v5843_v50 = vpop.permute.xlu1 %2603 }
 0x115   : > { %1206 = vmatprep.mubr.bf16.mxu0 %v7526_v8  ;;  %4785 = vmatprep.mubr.msk.bf16.mxu1 %vm447_vm3, %v5004_v53 }
 0x116   : > { %1517 = vmatpush1.bf16.msra.mxu1 %v1454_v62 }
 0x117   : > { %4815 = vmatprep.subr.bf16.mxu1 %v1888_v63 }
 0x118   : > { %v5864_v58 = vpop.permute.xlu1 %2601 }
 0x11c   : > { %4324 = vmatmul.mubr.msk.bf16.gmra.mxu0 %vm447_vm3, %v5006_v1  ;;  %4786 = vmatmul.mubr.msk.bf16.gmra.mxu1 %vm447_vm3, %v5005_v59  ;;  %v5885_v15 = vpop.permute.xlu1 %2597 }
 0x11d   : > { %1216 = vmatprep.mubr.bf16.mxu0 %v7526_v8  ;;  %4789 = vmatprep.mubr.msk.bf16.mxu1 %vm447_vm3, %v5006_v1 }
 0x124   : > { %4325 = vmatmul.mubr.msk.bf16.gmra.mxu0 %vm447_vm3, %v5007_v16  ;;  %4790 = vmatmul.mubr.msk.bf16.gmra.mxu1 %vm447_vm3, %v5007_v16 }
 0x125   : > { %1534 = vmatprep.mubr.bf16.mxu1 %v7526_v8  ;;  %4799 = vmatprep.mubr.msk.bf16.mxu0 %vm447_vm3, %v5008_v17 }
 0x12c   : > { %4358 = vmatmul.mubr.msk.bf16.vlgmr.msra.gmra.mxu1 %vm447_vm3, %v5008_v17  ;;  %4800 = vmatmul.mubr.msk.bf16.vlgmr.msra.gmra.mxu0 %vm447_vm3, %v5009_v23 }
 0x12d   : > { %1901 = vmatpush1.bf16.msra.mxu0 %v1882_v25  ;;  %4816 = vmatpush3.bf16.msra.mxu1 %v1888_v63  ;;  %v2236_v63 = vsel %vm2229_vm7, %v5779_v41, %v5758_v30  ;;  %v2231_v30 = vsel %vm2229_vm7, %v5810_v7, %v5808_v6 }
 0x12e   : > { %1902 = vmatprep.subr.bf16.mxu0 %v1846_v26  ;;  %4817 = vmatprep.subr.bf16.mxu1 %v1847_v27  ;;  %v2270_v19 = vand.u32 %v2236_v63, %v5418_v22  ;;  %v2616_v26 = vpop.permute.xlu1 %2615 }
 0x12f   : > { %1544 = vmatprep.mubr.bf16.mxu1 %v7526_v8  ;;  %4803 = vmatprep.mubr.msk.bf16.mxu0 %vm447_vm3, %v5010_v28  ;;  %v2626_v35 = vsel %vm2617_vm8, %v5823_v11, %v2616_v26 }
 0x131   : > { %1903 = vmatpush1.bf16.msra.mxu0 %v1845_v31  ;;  %4818 = vmatpush3.bf16.msra.mxu1 %v1847_v27  ;;  %v2233_v27 = vsel %vm2229_vm7, %v5799_v3, %v5793_v5  ;;  %v2610_v31 = vpop.permute.xlu0 %2609  ;;  %v5022_v3 = vld [vmem:[%s7523_s2 + $0x130] sm:$0xff]  }
 0x132   : > { %1904 = vmatprep.subr.bf16.mxu0 %v1843_v32  ;;  %4819 = vmatprep.subr.bf16.mxu1 %v1844_v33  ;;  %v2600_v63 = vpop.permute.xlu1 %2599 }
 0x134   : > { %4359 = vmatmul.mubr.msk.bf16.gmra.mxu1 %vm447_vm3, %v5009_v23  ;;  %4804 = vmatmul.mubr.msk.bf16.gmra.mxu0 %vm447_vm3, %v5011_v34  ;;  %v2234_v23 = vsel %vm2229_vm7, %v5793_v5, %v5791_v2 }
 0x135   : > { %4820 = vmatpush3.bf16.msra.mxu1 %v1844_v33  ;;  %1905 = vmatpush1.bf16.msra.mxu0 %v1842_v37 }
 0x136   : > { %1554 = vmatprep.mubr.bf16.mxu1 %v7526_v8  ;;  %4807 = vmatprep.mubr.msk.bf16.mxu0 %vm447_vm3, %v5012_v38 }
 0x137   : > { %2288 = vmatprep.subr.bf16.mxu1 %v2273_v40  ;;  %4837 = vmatprep.subr.bf16.mxu0 %v2276_v39 }
 0x13c   : > { %4360 = vmatmul.mubr.msk.bf16.gmra.mxu1 %vm447_vm3, %v5010_v28  ;;  %4808 = vmatmul.mubr.msk.bf16.gmra.mxu0 %vm447_vm3, %v5013_v42 }
 0x13d   : > { %1564 = vmatprep.mubr.bf16.mxu1 %v7526_v8  ;;  %4811 = vmatprep.mubr.msk.bf16.mxu0 %vm447_vm3, %v5014_v43 }
 0x144   : > { %4361 = vmatmul.mubr.msk.bf16.gmra.mxu1 %vm447_vm3, %v5011_v34  ;;  %4812 = vmatmul.mubr.msk.bf16.gmra.mxu0 %vm447_vm3, %v5015_v4  ;;  %v5021_v34 = vld [vmem:[%s7523_s2 + $0x128] sm:$0xff]  }
 0x145   : > { %1574 = vmatprep.mubr.bf16.mxu1 %v7526_v8  ;;  %1922 = vmatprep.mubr.bf16.mxu0 %v7526_v8 }
 0x14c   : > { %4362 = vmatmul.mubr.msk.bf16.gmra.mxu1 %vm447_vm3, %v5012_v38  ;;  %4398 = vmatmul.mubr.msk.bf16.vlgmr.msra.gmra.mxu0 %vm447_vm3, %v5016_v45  ;;  %v2230_v38 = vsel %vm2229_vm7, %v5817_v10, %v5810_v7 }
 0x14d   : > { %4838 = vmatpush3.bf16.msra.mxu0 %v2276_v39  ;;  %1584 = vmatprep.mubr.bf16.mxu1 %v7526_v8  ;;  %v2664_v39 = vand.u32 %v2626_v35, %v5418_v22 }
 0x14e   : > { %1932 = vmatprep.mubr.bf16.mxu0 %v7526_v8  ;;  %4839 = vmatprep.subr.bf16.mxu0 %v2235_v46 }
 0x151   : > { %4840 = vmatpush3.bf16.msra.mxu0 %v2235_v46 }
 0x152   : > { %4841 = vmatprep.subr.bf16.mxu0 %v2232_v12 }
 0x154   : > { %4363 = vmatmul.mubr.msk.bf16.gmra.mxu1 %vm447_vm3, %v5013_v42  ;;  %4399 = vmatmul.mubr.msk.bf16.gmra.mxu0 %vm447_vm3, %v5017_v48  ;;  %v2606_v42 = vpop.permute.xlu0 %2605 }
 0x155   : > { %1594 = vmatprep.mubr.bf16.mxu1 %v7526_v8  ;;  %1942 = vmatprep.mubr.bf16.mxu0 %v7526_v8 }
 0x156   : > { %4842 = vmatpush3.bf16.msra.mxu0 %v2232_v12 }
 0x157   : > { %2676 = vmatprep.subr.bf16.mxu0 %v2661_v14  ;;  %v5024_v14 = vld [vmem:[%s7523_s2 + $0x140] sm:$0xff]  }
 0x158   : > { %v5960_v7 = vpop.permute.xlu0 %2595 }
 0x15c   : > { %v5845_v51 = vpop.f32.mrf.mxu0  ;;  %v5847_v52 = vpop.f32.mrf.mxu1  ;;  %4364 = vmatmul.mubr.msk.bf16.gmra.mxu1 %vm447_vm3, %v5014_v43  ;;  %4400 = vmatmul.mubr.msk.bf16.gmra.mxu0 %vm447_vm3, %v5018_v49 }
 0x15d   : > { %1604 = vmatprep.mubr.bf16.mxu1 %v7526_v8  ;;  %1952 = vmatprep.mubr.bf16.mxu0 %v7526_v8  ;;  %v2594_v13 = vpop.permute.xlu0 %2593 }
 0x15e   : > { %v5853_v53 = vpop.f32.mrf.mxu0  ;;  %v5855_v54 = vpop.f32.mrf.mxu1 }
 0x15f   : > { %7528 = vst [vmem:[#allocation2_spill] sm:$0xff] %v5855_v54 }
 0x160   : > { %v5857_v55 = vpop.f32.mrf.mxu0  ;;  %v5859_v56 = vpop.f32.mrf.mxu1 }
 0x161   : > { %7529 = vst [vmem:[#allocation3_spill] sm:$0xff] %v5859_v56  ;;  %v2621_v56 = vsel %vm2617_vm8, %v5864_v58, %v5843_v50 }
 0x162   : > { %v5866_v59 = vpop.f32.mrf.mxu0  ;;  %v5868_v60 = vpop.f32.mrf.mxu1 }
 0x163   : > { %7530 = vst [vmem:[#allocation4_spill] sm:$0xff] %v5868_v60 }
 0x164   : > { %v5870_v61 = vpop.f32.mrf.mxu0  ;;  %v5872_v62 = vpop.f32.mrf.mxu1  ;;  %4365 = vmatmul.mubr.msk.bf16.gmra.mxu1 %vm447_vm3, %v5015_v4  ;;  %4401 = vmatmul.mubr.msk.bf16.gmra.mxu0 %vm447_vm3, %v5019_v57 }
 0x165   : > { %7531 = vst [vmem:[#allocation5_spill] sm:$0xff] %v5872_v62  ;;  %1962 = vmatprep.mubr.bf16.mxu0 %v7526_v8  ;;  %4821 = vmatprep.mubr.msk.bf16.mxu1 %vm447_vm3, %v5016_v45 }
 0x166   : > { %v5881_v0 = vpop.f32.mrf.mxu0  ;;  %v5883_v1 = vpop.f32.mrf.mxu1 }
 0x167   : > { %7532 = vst [vmem:[#allocation6_spill] sm:$0xff] %v5883_v1 }
 0x168   : > { %v5887_v16 = vpop.f32.mrf.mxu0  ;;  %v5889_v17 = vpop.f32.mrf.mxu1 }
 0x169   : > { %7533 = vst [vmem:[#allocation7_spill] sm:$0xff] %v5889_v17  ;;  %v6020_v17 = vld [vmem:[%s7523_s2 + $0x150] sm:$0xff]  }
 0x16a   : > { %v5895_v20 = vpop.f32.mrf.mxu0  ;;  %v5897_v21 = vpop.f32.mrf.mxu1 }
 0x16b   : > { %7534 = vst [vmem:[#allocation8_spill] sm:$0xff] %v5897_v21 }
 0x16c   : > { %v5902_v24 = vpop.f32.mrf.mxu0  ;;  %v5904_v25 = vpop.f32.mrf.mxu1  ;;  %4402 = vmatmul.mubr.msk.bf16.gmra.mxu0 %vm447_vm3, %v5020_v18  ;;  %4822 = vmatmul.mubr.msk.bf16.vlgmr.msra.gmra.mxu1 %vm447_vm3, %v5017_v48  ;;  %v5023_v48 = vld [vmem:[%s7523_s2 + $0x138] sm:$0xff]  }
 0x16d   : > { %2289 = vmatpush1.bf16.msra.mxu1 %v2270_v19  ;;  %1972 = vmatprep.mubr.bf16.mxu0 %v7526_v8 }
 0x16e   : > { %2290 = vmatprep.subr.bf16.mxu1 %v2234_v23  ;;  %v5912_v28 = vpop.f32.mrf.mxu0  ;;  %v5914_v29 = vpop.f32.mrf.mxu1  ;;  %4825 = vmatprep.mubr.msk.bf16.mxu1 %vm447_vm3, %v5018_v49  ;;  %v2624_v23 = vsel %vm2617_vm8, %v2610_v31, %v5827_v47  ;;  %v2622_v47 = vsel %vm2617_vm8, %v5843_v50, %v2606_v42 }
 0x170   : > { %v5920_v32 = vpop.f32.mrf.mxu0  ;;  %v5922_v33 = vpop.f32.mrf.mxu1 }
 0x171   : > { %2291 = vmatpush1.bf16.msra.mxu1 %v2233_v27 }
 0x172   : > { %v5929_v36 = vpop.f32.mrf.mxu0  ;;  %v5931_v37 = vpop.f32.mrf.mxu1  ;;  %2292 = vmatprep.subr.bf16.mxu1 %v2231_v30 }
 0x173   : > { %v2608_v30 = vpop.permute.xlu0 %2607 }
 0x174   : > { %v5937_v40 = vpop.f32.mrf.mxu0  ;;  %v5939_v41 = vpop.f32.mrf.mxu1  ;;  %4403 = vmatmul.mubr.msk.bf16.gmra.mxu0 %vm447_vm3, %v5021_v34  ;;  %4826 = vmatmul.mubr.msk.bf16.gmra.mxu1 %vm447_vm3, %v5019_v57  ;;  %v2623_v31 = vsel %vm2617_vm8, %v2606_v42, %v2608_v30 }
 0x175   : > { %1982 = vmatprep.mubr.bf16.mxu0 %v7526_v8  ;;  %4829 = vmatprep.mubr.msk.bf16.mxu1 %vm447_vm3, %v5020_v18 }
 0x176   : > { %v5945_v43 = vpop.f32.mrf.mxu0  ;;  %v5947_v2 = vpop.f32.mrf.mxu1  ;;  %2293 = vmatpush1.bf16.msra.mxu1 %v2230_v38 }
 0x177   : > { %4859 = vmatprep.subr.bf16.mxu1 %v2664_v39  ;;  %v6030_v30 = vpop.permute.xlu0 %2999 }
 0x178   : > { %v5949_v5 = vpop.f32.mrf.mxu0  ;;  %v5951_v44 = vpop.f32.mrf.mxu1 }
 0x17a   : > { %v5956_v4 = vpop.f32.mrf.mxu0  ;;  %v5958_v6 = vpop.f32.mrf.mxu1 }
 0x17c   : > { %v5962_v45 = vpop.f32.mrf.mxu0  ;;  %v5964_v46 = vpop.f32.mrf.mxu1  ;;  %4404 = vmatmul.mubr.msk.bf16.gmra.mxu0 %vm447_vm3, %v5022_v3  ;;  %4830 = vmatmul.mubr.msk.bf16.gmra.mxu1 %vm447_vm3, %v5021_v34 }
 0x17d   : > { %1992 = vmatprep.mubr.bf16.mxu0 %v7526_v8  ;;  %4833 = vmatprep.mubr.msk.bf16.mxu1 %vm447_vm3, %v5022_v3  ;;  %v3002_v34 = vpop.permute.xlu1 %3001  ;;  %v5025_v3 = vld [vmem:[%s7523_s2 + $0x148] sm:$0xff]  }
 0x17e   : > { %v5970_v9 = vpop.f32.mrf.mxu0  ;;  %v5972_v10 = vpop.f32.mrf.mxu1 }
 0x180   : > { %v5974_v11 = vpop.f32.mrf.mxu0  ;;  %v5976_v12 = vpop.f32.mrf.mxu1 }
 0x181   : > { %v3004_v42 = vpop.permute.xlu1 %3003 }
 0x182   : > { %v5984_v49 = vpop.f32.mrf.mxu0  ;;  %v5986_v57 = vpop.f32.mrf.mxu1 }
 0x184   : > { %v5988_v18 = vpop.f32.mrf.mxu0  ;;  %v5990_v19 = vpop.f32.mrf.mxu1  ;;  %4405 = vmatmul.mubr.msk.bf16.gmra.mxu0 %vm447_vm3, %v5023_v48  ;;  %4834 = vmatmul.mubr.msk.bf16.gmra.mxu1 %vm447_vm3, %v5023_v48  ;;  %v2658_v48 = vand.u32 %v2624_v23, %v5418_v22 }
 0x185   : > { %2310 = vmatprep.mubr.bf16.mxu1 %v7526_v8  ;;  %4843 = vmatprep.mubr.msk.bf16.mxu0 %vm447_vm3, %v5024_v14 }
 0x186   : > { %v5998_v26 = vpop.f32.mrf.mxu0  ;;  %v6000_v27 = vpop.f32.mrf.mxu1 }
 0x188   : > { %v6002_v35 = vpop.f32.mrf.mxu0  ;;  %v6004_v38 = vpop.f32.mrf.mxu1 }
 0x18a   : > { %v6010_v8 = vpop.f32.mrf.mxu0  ;;  %v6012_v21 = vpop.f32.mrf.mxu1 }
 0x18c   : > { %v808_v1 = vpop.f32.mrf.mxu1  ;;  %v4757_v62 = vpop.f32.mrf.mxu0  ;;  %4438 = vmatmul.mubr.msk.bf16.vlgmr.msra.gmra.mxu1 %vm447_vm3, %v5024_v14  ;;  %4844 = vmatmul.mubr.msk.bf16.vlgmr.msra.gmra.mxu0 %vm447_vm3, %v5025_v3 }
 0x18d   : > { %v6025_v23 = vadd.f32 %v808_v1, %v5845_v51  ;;  %v6028_v60 = vadd.f32 %v4757_v62, %v5904_v25  ;;  %2677 = vmatpush1.bf16.msra.mxu0 %v2658_v48  ;;  %4860 = vmatpush3.bf16.msra.mxu1 %v2664_v39  ;;  %v2619_v51 = vsel %vm2617_vm8, %v5960_v7, %v5885_v15  ;;  %v7535_v39 = vmov 0   ;;  %v6052_v48 = vld [vmem:[%s7523_s2 + $0x158] sm:$0xff]  }
 0x18e   : > { %2678 = vmatprep.subr.bf16.mxu0 %v2622_v47  ;;  %v810_v14 = vpop.f32.mrf.mxu1  ;;  %v921_v54 = vpop.f32.mrf.mxu0  ;;  %4861 = vmatprep.subr.bf16.mxu1 %v2623_v31  ;;  %v2620_v25 = vsel %vm2617_vm8, %v5885_v15, %v2600_v63  ;;  %v2618_v63 = vsel %vm2617_vm8, %v2594_v13, %v5960_v7 }
 0x18f   : > { %v6039_v62 = vadd.f32 %v810_v14, %v5853_v53  ;;  %v6042_v1 = vadd.f32 %v921_v54, %v5914_v29  ;;  %2320 = vmatprep.mubr.bf16.mxu1 %v7535_v39  ;;  %4847 = vmatprep.mubr.msk.bf16.mxu0 %vm447_vm3, %v6020_v17  ;;  %v3014_v53 = vsel %vm3005_vm9, %v3002_v34, %v3004_v42  ;;  %v6068_v42 = vld [vmem:[%s7523_s2 + $0x160] sm:$0xff]   ;;  %v6080_v13 = vpop.permute.xlu0 %2997 }
 0x190   : > { %v812_v50 = vpop.f32.mrf.mxu1  ;;  %v4758_v58 = vpop.f32.mrf.mxu0  ;;  %v3013_v54 = vsel %vm3005_vm9, %v6030_v30, %v3002_v34 }
 0x191   : > { %v6058_v29 = vadd.f32 %v812_v50, %v5857_v55  ;;  %v6061_v15 = vadd.f32 %v4758_v58, %v5922_v33  ;;  %2679 = vmatpush1.bf16.msra.mxu0 %v2621_v56  ;;  %4862 = vmatpush3.bf16.msra.mxu1 %v2623_v31  ;;  %v6077_v56 = vand.u32 %v3014_v53, %v5418_v22 }
 0x192   : > { %2680 = vmatprep.subr.bf16.mxu0 %v2619_v51  ;;  %4863 = vmatprep.subr.bf16.mxu1 %v2620_v25  ;;  %v814_v47 = vpop.f32.mrf.mxu1  ;;  %v924_v14 = vpop.f32.mrf.mxu0  ;;  %v3049_v7 = vand.u32 %v3013_v54, %v5418_v22 }
 0x193   : > { %v6071_v55 = vadd.f32 %v814_v47, %v5866_v59  ;;  %v6074_v33 = vadd.f32 %v924_v14, %v5931_v37 }
 0x194   : > { %v818_v34 = vpop.f32.mrf.mxu1  ;;  %v4761_v31 = vpop.f32.mrf.mxu0  ;;  %4439 = vmatmul.mubr.msk.bf16.gmra.mxu1 %vm447_vm3, %v5025_v3  ;;  %4848 = vmatmul.mubr.msk.bf16.gmra.mxu0 %vm447_vm3, %v6052_v48 }
 0x195   : > { %v6086_v59 = vadd.f32 %v818_v34, %v5870_v61  ;;  %v6089_v37 = vadd.f32 %v4761_v31, %v5939_v41  ;;  %4864 = vmatpush3.bf16.msra.mxu1 %v2620_v25  ;;  %2681 = vmatpush1.bf16.msra.mxu0 %v2618_v63  ;;  %v6104_v25 = vld [vmem:[%s7523_s2 + $0x168] sm:$0xff]   ;;  %v6119_v63 = vpop.permute.xlu0 %2991 }
 0x196   : > { %v820_v51 = vpop.f32.mrf.mxu1  ;;  %v937_v50 = vpop.f32.mrf.mxu0  ;;  %2330 = vmatprep.mubr.bf16.mxu1 %v7535_v39  ;;  %4851 = vmatprep.mubr.msk.bf16.mxu0 %vm447_vm3, %v6068_v42 }
 0x197   : > { %v6095_v3 = vadd.f32 %v820_v51, %v5881_v0  ;;  %v6098_v58 = vadd.f32 %v937_v50, %v5947_v2  ;;  %3064 = vmatprep.subr.bf16.mxu1 %v3049_v7  ;;  %4881 = vmatprep.subr.bf16.mxu0 %v6077_v56  ;;  %v6115_v0 = vld [vmem:[%s7523_s2 + $0x170] sm:$0xff]   ;;  %v6117_v2 = vpop.permute.xlu1 %2993 }
 0x198   : > { %v822_v61 = vpop.f32.mrf.mxu1  ;;  %v4762_v41 = vpop.f32.mrf.mxu0 }
 0x199   : > { %v6107_v53 = vadd.f32 %v822_v61, %v5887_v16  ;;  %v6110_v54 = vadd.f32 %v4762_v41, %v5951_v44  ;;  %v6146_v41 = vpop.permute.xlu0 %2989 }
 0x19a   : > { %v824_v47 = vpop.f32.mrf.mxu1  ;;  %v940_v14 = vpop.f32.mrf.mxu0 }
 0x19b   : > { %v6122_v7 = vadd.f32 %v824_v47, %v5895_v20  ;;  %v6125_v16 = vadd.f32 %v940_v14, %v5958_v6  ;;  %v2996_v61 = vpop.permute.xlu1 %2995 }
 0x19c   : > { %v828_v34 = vpop.f32.mrf.mxu1  ;;  %v4765_v44 = vpop.f32.mrf.mxu0  ;;  %4440 = vmatmul.mubr.msk.bf16.gmra.mxu1 %vm447_vm3, %v6020_v17  ;;  %4852 = vmatmul.mubr.msk.bf16.gmra.mxu0 %vm447_vm3, %v6104_v25 }
 0x19d   : > { %v6132_v31 = vadd.f32 %v828_v34, %v5902_v24  ;;  %v6135_v51 = vadd.f32 %v4765_v44, %v5964_v46  ;;  %2340 = vmatprep.mubr.bf16.mxu1 %v7535_v39  ;;  %4855 = vmatprep.mubr.msk.bf16.mxu0 %vm447_vm3, %v6115_v0  ;;  %v6151_v46 = vld [vmem:[%s7523_s2 + $0x178] sm:$0xff]  }
 0x19e   : > { %v830_v20 = vpop.f32.mrf.mxu1  ;;  %v953_v6 = vpop.f32.mrf.mxu0 }
 0x19f   : > { %v6141_v50 = vadd.f32 %v830_v20, %v5912_v28  ;;  %v6144_v17 = vadd.f32 %v953_v6, %v5972_v10 }
 0x1a0   : > { %v832_v24 = vpop.f32.mrf.mxu1  ;;  %v4766_v47 = vpop.f32.mrf.mxu0 }
 0x1a1   : > { %7536 = vst [vmem:[#allocation9_spill] sm:$0xff] %v6144_v17  ;;  %v6154_v14 = vadd.f32 %v832_v24, %v5920_v32  ;;  %v6157_v34 = vadd.f32 %v4766_v47, %v5976_v12 }
 0x1a2   : > { %v834_v28 = vpop.f32.mrf.mxu1  ;;  %v956_v44 = vpop.f32.mrf.mxu0 }
 0x1a3   : > { %7537 = vst [vmem:[#allocation10_spill] sm:$0xff] %v6157_v34  ;;  %v6160_v10 = vadd.f32 %v834_v28, %v5929_v36  ;;  %v6163_v20 = vadd.f32 %v956_v44, %v5986_v57  ;;  %v6177_v36 = vpop.permute.xlu1 %2985  ;;  %v6179_v57 = vpop.permute.xlu0 %2983 }
 0x1a4   : > { %v838_v6 = vpop.f32.mrf.mxu1  ;;  %v4769_v17 = vpop.f32.mrf.mxu0  ;;  %4441 = vmatmul.mubr.msk.bf16.gmra.mxu1 %vm447_vm3, %v6052_v48  ;;  %4856 = vmatmul.mubr.msk.bf16.gmra.mxu0 %vm447_vm3, %v6151_v46 }
 0x1a5   : > { %7538 = vst [vmem:[#allocation11_spill] sm:$0xff] %v6163_v20  ;;  %v6170_v32 = vadd.f32 %v838_v6, %v5937_v40  ;;  %v6173_v12 = vadd.f32 %v4769_v17, %v5990_v19  ;;  %2350 = vmatprep.mubr.bf16.mxu1 %v7535_v39  ;;  %2698 = vmatprep.mubr.bf16.mxu0 %v7535_v39  ;;  %v6190_v19 = vld [vmem:[%s7523_s2 + $0x180] sm:$0xff]  }
 0x1a6   : > { %v840_v24 = vpop.f32.mrf.mxu1  ;;  %v969_v47 = vpop.f32.mrf.mxu0 }
 0x1a7   : > { %7539 = vst [vmem:[#allocation12_spill] sm:$0xff] %v6173_v12  ;;  %v6182_v48 = vadd.f32 %v840_v24, %v5945_v43  ;;  %v6185_v28 = vadd.f32 %v969_v47, %v6000_v27  ;;  %v3011_v24 = vsel %vm3005_vm9, %v6117_v2, %v2996_v61  ;;  %v2988_v47 = vpop.permute.xlu1 %2987 }
 0x1a8   : > { %v842_v40 = vpop.f32.mrf.mxu1  ;;  %v4770_v44 = vpop.f32.mrf.mxu0 }
 0x1a9   : > { %7540 = vst [vmem:[#allocation13_spill] sm:$0xff] %v6185_v28  ;;  %v6193_v17 = vadd.f32 %v842_v40, %v5949_v5  ;;  %v6196_v6 = vadd.f32 %v4770_v44, %v6004_v38  ;;  %v6206_v28 = vpop.permute.xlu0 %2981  ;;  %v6236_v40 = vld [vmem:[%s7523_s2 + $0x188] sm:$0xff]  }
 0x1aa   : > { %v844_v12 = vpop.f32.mrf.mxu1  ;;  %v972_v20 = vpop.f32.mrf.mxu0 }
 0x1ab   : > { %v6199_v43 = vadd.f32 %v844_v12, %v5956_v4  ;;  %v6202_v27 = vadd.f32 %v972_v20, %v6012_v21 }
 0x1ac   : > { %v848_v34 = vpop.f32.mrf.mxu1  ;;  %v1148_v5 = vpop.f32.mrf.mxu0  ;;  %4442 = vmatmul.mubr.msk.bf16.gmra.mxu1 %vm447_vm3, %v6068_v42  ;;  %4478 = vmatmul.mubr.msk.bf16.vlgmr.msra.gmra.mxu0 %vm447_vm3, %v6190_v19 }
 0x1ad   : > { %7541 = vst [vmem:[#allocation14_spill] sm:$0xff] %v6202_v27  ;;  %v6213_v4 = vadd.f32 %v848_v34, %v5962_v45  ;;  %v6216_v21 = vadd.f32 %v1148_v5, %v6025_v23  ;;  %4882 = vmatpush3.bf16.msra.mxu0 %v6077_v56  ;;  %2360 = vmatprep.mubr.bf16.mxu1 %v7535_v39  ;;  %v6227_v45 = vpop.permute.xlu1 %3389  ;;  %v6231_v56 = vpop.permute.xlu0 %3387 }
 0x1ae   : > { %v850_v38 = vpop.f32.mrf.mxu1  ;;  %v1150_v61 = vpop.f32.mrf.mxu0  ;;  %2708 = vmatprep.mubr.bf16.mxu0 %v7535_v39  ;;  %4883 = vmatprep.subr.bf16.mxu0 %v3011_v24  ;;  %v3008_v23 = vsel %vm3005_vm9, %v6177_v36, %v2988_v47 }
 0x1af   : > { %7542 = vst [vmem:[#allocation15_spill] sm:$0xff] %v6216_v21  ;;  %v6222_v42 = vadd.f32 %v850_v38, %v5970_v9  ;;  %v6225_v20 = vadd.f32 %v1150_v61, %v6039_v62  ;;  %v3401_v9 = vsel %vm3393_vm10, %v6231_v56, %v6227_v45 }
 0x1b0   : > { %v852_v34 = vpop.f32.mrf.mxu1  ;;  %v1152_v12 = vpop.f32.mrf.mxu0 }
 0x1b1   : > { %7543 = vst [vmem:[#allocation16_spill] sm:$0xff] %v6225_v20  ;;  %v6242_v62 = vadd.f32 %v852_v34, %v5974_v11  ;;  %v6245_v44 = vadd.f32 %v1152_v12, %v6058_v29  ;;  %4884 = vmatpush3.bf16.msra.mxu0 %v3011_v24  ;;  %v3437_v20 = vand.u32 %v3401_v9, %v5418_v22 }
 0x1b2   : > { %v854_v47 = vpop.f32.mrf.mxu1  ;;  %v1154_v5 = vpop.f32.mrf.mxu0  ;;  %4885 = vmatprep.subr.bf16.mxu0 %v3008_v23 }
 0x1b3   : > { %v6248_v38 = vadd.f32 %v854_v47, %v5984_v49  ;;  %v6251_v61 = vadd.f32 %v1154_v5, %v6071_v55 }
 0x1b4   : > { %v858_v21 = vpop.f32.mrf.mxu1  ;;  %v1158_v27 = vpop.f32.mrf.mxu0  ;;  %4443 = vmatmul.mubr.msk.bf16.gmra.mxu1 %vm447_vm3, %v6104_v25  ;;  %4479 = vmatmul.mubr.msk.bf16.gmra.mxu0 %vm447_vm3, %v6236_v40 }
 0x1b5   : > { %v6259_v11 = vadd.f32 %v858_v21, %v5988_v18  ;;  %v6262_v29 = vadd.f32 %v1158_v27, %v6086_v59  ;;  %2370 = vmatprep.mubr.bf16.mxu1 %v7535_v39  ;;  %2718 = vmatprep.mubr.bf16.mxu0 %v7535_v39  ;;  %v5034_v59 = vld [vmem:[%s7523_s2 + $0x190] sm:$0xff]  }
 0x1b6   : > { %v860_v49 = vpop.f32.mrf.mxu1  ;;  %v1160_v55 = vpop.f32.mrf.mxu0  ;;  %4886 = vmatpush3.bf16.msra.mxu0 %v3008_v23 }
 0x1b7   : > { %v6267_v24 = vadd.f32 %v860_v49, %v5998_v26  ;;  %v6270_v25 = vadd.f32 %v1160_v55, %v6095_v3  ;;  %3452 = vmatprep.subr.bf16.mxu0 %v3437_v20  ;;  %v6287_v20 = vpop.permute.xlu1 %3379 }
 0x1b8   : > { %v862_v34 = vpop.f32.mrf.mxu1  ;;  %v1162_v18 = vpop.f32.mrf.mxu0 }
 0x1b9   : > { %v6276_v27 = vadd.f32 %v862_v34, %v6002_v35  ;;  %v6279_v21 = vadd.f32 %v1162_v18, %v6107_v53 }
 0x1ba   : > { %v864_v23 = vpop.f32.mrf.mxu1  ;;  %v1164_v12 = vpop.f32.mrf.mxu0 }
 0x1bb   : > { %v6282_v26 = vadd.f32 %v864_v23, %v6010_v8  ;;  %v6285_v3 = vadd.f32 %v1164_v12, %v6122_v7  ;;  %v6312_v55 = vpop.permute.xlu1 %3377 }
 0x1bc   : > { %v6289_v9 = vpop.f32.mrf.mxu1  ;;  %v1168_v47 = vpop.f32.mrf.mxu0  ;;  %4444 = vmatmul.mubr.msk.bf16.gmra.mxu1 %vm447_vm3, %v6115_v0  ;;  %4480 = vmatmul.mubr.msk.bf16.gmra.mxu0 %vm447_vm3, %v5034_v59  ;;  %v5035_v0 = vld [vmem:[%s7523_s2 + $0x198] sm:$0xff]  }
 0x1bd   : > { %v6295_v35 = vadd.f32 %v1168_v47, %v6132_v31  ;;  %2380 = vmatprep.mubr.bf16.mxu1 %v7535_v39  ;;  %2728 = vmatprep.mubr.bf16.mxu0 %v7535_v39 }
 0x1be   : > { %v6299_v8 = vpop.f32.mrf.mxu1  ;;  %v1170_v53 = vpop.f32.mrf.mxu0 }
 0x1bf   : > { %v6302_v7 = vadd.f32 %v1170_v53, %v6141_v50 }
 0x1c0   : > { %v6304_v5 = vpop.f32.mrf.mxu1  ;;  %v1172_v49 = vpop.f32.mrf.mxu0 }
 0x1c1   : > { %v6310_v31 = vadd.f32 %v1172_v49, %v6154_v14  ;;  %v3012_v14 = vsel %vm3005_vm9, %v6080_v13, %v6030_v30 }
 0x1c2   : > { %v6314_v34 = vpop.f32.mrf.mxu1  ;;  %v1174_v18 = vpop.f32.mrf.mxu0 }
 0x1c3   : > { %v6317_v23 = vadd.f32 %v1174_v18, %v6160_v10 }
 0x1c4   : > { %v6319_v50 = vpop.f32.mrf.mxu1  ;;  %v1178_v12 = vpop.f32.mrf.mxu0  ;;  %4445 = vmatmul.mubr.msk.bf16.gmra.mxu1 %vm447_vm3, %v6151_v46  ;;  %4481 = vmatmul.mubr.msk.bf16.gmra.mxu0 %vm447_vm3, %v5035_v0 }
 0x1c5   : > { %7544 = vst [vmem:[#allocation17_spill] sm:$0xff] %v6317_v23  ;;  %v6325_v47 = vadd.f32 %v1178_v12, %v6170_v32  ;;  %2738 = vmatprep.mubr.bf16.mxu0 %v7535_v39  ;;  %4865 = vmatprep.mubr.msk.bf16.mxu1 %vm447_vm3, %v6190_v19  ;;  %v6338_v46 = vpop.permute.xlu1 %3373  ;;  %v5036_v12 = vld [vmem:[%s7523_s2 + $0x1a0] sm:$0xff]   ;;  %v3046_v19 = vand.u32 %v3012_v14, %v5418_v22 }
 0x1c6   : > { %v6333_v10 = vpop.f32.mrf.mxu1  ;;  %v1180_v53 = vpop.f32.mrf.mxu0 }
 0x1c7   : > { %7545 = vst [vmem:[#allocation18_spill] sm:$0xff] %v6325_v47  ;;  %v6336_v49 = vadd.f32 %v1180_v53, %v6182_v48  ;;  %v3010_v53 = vsel %vm3005_vm9, %v6119_v63, %v6117_v2  ;;  %v3009_v2 = vsel %vm3005_vm9, %v6146_v41, %v6119_v63  ;;  %v5037_v63 = vld [vmem:[%s7523_s2 + $0x1a8] sm:$0xff]  }
 0x1c8   : > { %v6340_v18 = vpop.f32.mrf.mxu1  ;;  %v1182_v32 = vpop.f32.mrf.mxu0 }
 0x1c9   : > { %7546 = vst [vmem:[#allocation19_spill] sm:$0xff] %v6336_v49  ;;  %v6347_v47 = vadd.f32 %v1182_v32, %v6193_v17 }
 0x1ca   : > { %v6349_v30 = vpop.f32.mrf.mxu1  ;;  %v1184_v13 = vpop.f32.mrf.mxu0 }
 0x1cb   : > { %v6352_v48 = vadd.f32 %v1184_v13, %v6199_v43  ;;  %v3392_v43 = vpop.permute.xlu1 %3391 }
 0x1cc   : > { %v1188_v49 = vpop.f32.mrf.mxu0  ;;  %v4779_v23 = vpop.f32.mrf.mxu1  ;;  %4482 = vmatmul.mubr.msk.bf16.gmra.mxu0 %vm447_vm3, %v5036_v12  ;;  %4866 = vmatmul.mubr.msk.bf16.vlgmr.msra.gmra.mxu1 %vm447_vm3, %v6236_v40  ;;  %v3402_v41 = vsel %vm3393_vm10, %v6227_v45, %v3392_v43 }
 0x1cd   : > { %v6361_v17 = vadd.f32 %v1188_v49, %v6213_v4  ;;  %v6364_v14 = vadd.f32 %v4779_v23, %v6028_v60  ;;  %3065 = vmatpush1.bf16.msra.mxu1 %v3046_v19  ;;  %2748 = vmatprep.mubr.bf16.mxu0 %v7535_v39  ;;  %v3007_v60 = vsel %vm3005_vm9, %v6179_v57, %v6177_v36  ;;  %v6380_v23 = vpop.permute.xlu0 %3385 }
 0x1ce   : > { %3066 = vmatprep.subr.bf16.mxu1 %v3010_v53  ;;  %v1190_v32 = vpop.f32.mrf.mxu0  ;;  %v1261_v13 = vpop.f32.mrf.mxu1  ;;  %4869 = vmatprep.mubr.msk.bf16.mxu1 %vm447_vm3, %v5034_v59  ;;  %v3006_v53 = vsel %vm3005_vm9, %v6206_v28, %v6179_v57  ;;  %v6403_v45 = vand.u32 %v3402_v41, %v5418_v22 }
 0x1cf   : > { %v6372_v40 = vadd.f32 %v1190_v32, %v6222_v42  ;;  %v6375_v4 = vadd.f32 %v1261_v13, %v6042_v1 }
 0x1d0   : > { %v1192_v49 = vpop.f32.mrf.mxu0  ;;  %v4780_v19 = vpop.f32.mrf.mxu1 }
 0x1d1   : > { %v6388_v42 = vadd.f32 %v1192_v49, %v6242_v62  ;;  %v6391_v1 = vadd.f32 %v4780_v19, %v6061_v15  ;;  %3067 = vmatpush1.bf16.msra.mxu1 %v3009_v2 }
 0x1d2   : > { %v1194_v59 = vpop.f32.mrf.mxu0  ;;  %v1264_v36 = vpop.f32.mrf.mxu1  ;;  %3068 = vmatprep.subr.bf16.mxu1 %v3007_v60  ;;  %v5038_v60 = vld [vmem:[%s7523_s2 + $0x1b0] sm:$0xff]  }
 0x1d3   : > { %v6397_v32 = vadd.f32 %v1194_v59, %v6248_v38  ;;  %v6400_v13 = vadd.f32 %v1264_v36, %v6074_v33  ;;  %v6415_v33 = vpop.permute.xlu0 %3381 }
 0x1d4   : > { %v1198_v62 = vpop.f32.mrf.mxu0  ;;  %v4783_v15 = vpop.f32.mrf.mxu1  ;;  %4483 = vmatmul.mubr.msk.bf16.gmra.mxu0 %vm447_vm3, %v5037_v63  ;;  %4870 = vmatmul.mubr.msk.bf16.gmra.mxu1 %vm447_vm3, %v5035_v0 }
 0x1d5   : > { %v6408_v43 = vadd.f32 %v1198_v62, %v6259_v11  ;;  %v6411_v57 = vadd.f32 %v4783_v15, %v6089_v37  ;;  %2758 = vmatprep.mubr.bf16.mxu0 %v7535_v39  ;;  %4873 = vmatprep.mubr.msk.bf16.mxu1 %vm447_vm3, %v5036_v12 }
 0x1d6   : > { %v1200_v28 = vpop.f32.mrf.mxu0  ;;  %v1277_v38 = vpop.f32.mrf.mxu1  ;;  %3069 = vmatpush1.bf16.msra.mxu1 %v3006_v53 }
 0x1d7   : > { %v6418_v2 = vadd.f32 %v1200_v28, %v6267_v24  ;;  %v6421_v0 = vadd.f32 %v1277_v38, %v6098_v58  ;;  %4903 = vmatprep.subr.bf16.mxu1 %v6403_v45  ;;  %v869_v58 = vadd.f32 %v6289_v9, %v5847_v52  ;;  %v6441_v36 = vpop.permute.xlu0 %3371  ;;  %v7548_v9 = vld [vmem:[#allocation3_spill] sm:$0xff] }
 0x1d8   : > { %v1202_v11 = vpop.f32.mrf.mxu0  ;;  %v4784_v37 = vpop.f32.mrf.mxu1  ;;  %v873_v28 = vadd.f32 %v6304_v5, %v7548_v9 }
 0x1d9   : > { %v6428_v12 = vadd.f32 %v1202_v11, %v6276_v27  ;;  %v6431_v49 = vadd.f32 %v4784_v37, %v6110_v54  ;;  %v7547_v54 = vld [vmem:[#allocation2_spill] sm:$0xff] }
 0x1da   : > { %v1204_v19 = vpop.f32.mrf.mxu0  ;;  %v1280_v24 = vpop.f32.mrf.mxu1  ;;  %v871_v27 = vadd.f32 %v6299_v8, %v7547_v54 }
 0x1db   : > { %v6436_v41 = vadd.f32 %v1204_v19, %v6282_v26  ;;  %v6439_v59 = vadd.f32 %v1280_v24, %v6125_v16  ;;  %v7551_v19 = vld [vmem:[#allocation4_spill] sm:$0xff]  ;;  %v6471_v5 = vpop.permute.xlu0 %3369 }
 0x1dc   : > { %v1208_v53 = vpop.f32.mrf.mxu0  ;;  %v4787_v62 = vpop.f32.mrf.mxu1  ;;  %4484 = vmatmul.mubr.msk.bf16.gmra.mxu0 %vm447_vm3, %v5038_v60  ;;  %4874 = vmatmul.mubr.msk.bf16.gmra.mxu1 %vm447_vm3, %v5037_v63  ;;  %v7550_v63 = vld [vmem:[#allocation9_spill] sm:$0xff]  ;;  %v875_v24 = vadd.f32 %v6314_v34, %v7551_v19 }
 0x1dd   : > { %v6447_v15 = vadd.f32 %v1208_v53, %v869_v58  ;;  %v6450_v52 = vadd.f32 %v4787_v62, %v6135_v51  ;;  %2768 = vmatprep.mubr.bf16.mxu0 %v7535_v39  ;;  %4877 = vmatprep.mubr.msk.bf16.mxu1 %vm447_vm3, %v5038_v60  ;;  %v5039_v51 = vld [vmem:[%s7523_s2 + $0x1b8] sm:$0xff]   ;;  %v7553_v58 = vld [vmem:[#allocation10_spill] sm:$0xff] }
 0x1de   : > { %v1210_v16 = vpop.f32.mrf.mxu0  ;;  %v1293_v26 = vpop.f32.mrf.mxu1  ;;  %v5040_v62 = vld [vmem:[%s7523_s2 + $0x1c0] sm:$0xff]  }
 0x1df   : > { %v6456_v38 = vadd.f32 %v1210_v16, %v871_v27  ;;  %v6459_v11 = vadd.f32 %v1293_v26, %v7550_v63  ;;  %v7554_v16 = vld [vmem:[#allocation5_spill] sm:$0xff]  ;;  %v7556_v63 = vld [vmem:[#allocation11_spill] sm:$0xff] }
 0x1e0   : > { %v1212_v8 = vpop.f32.mrf.mxu0  ;;  %v4788_v37 = vpop.f32.mrf.mxu1  ;;  %v879_v26 = vadd.f32 %v6319_v50, %v7554_v16  ;;  %v3400_v50 = vsel %vm3393_vm10, %v6380_v23, %v6231_v56 }
 0x1e1   : > { %7549 = vst [vmem:[#allocation2_spill] sm:$0xff] %v6456_v38  ;;  %v6466_v60 = vadd.f32 %v1212_v8, %v873_v28  ;;  %v6469_v53 = vadd.f32 %v4788_v37, %v7553_v58  ;;  %v7557_v37 = vld [vmem:[#allocation6_spill] sm:$0xff]  ;;  %v3434_v23 = vand.u32 %v3400_v50, %v5418_v22 }
 0x1e2   : > { %v1214_v54 = vpop.f32.mrf.mxu0  ;;  %v1296_v27 = vpop.f32.mrf.mxu1  ;;  %v881_v19 = vadd.f32 %v6333_v10, %v7557_v37  ;;  %v7562_v10 = vld [vmem:[#allocation13_spill] sm:$0xff]  ;;  %v7563_v37 = vld [vmem:[#allocation8_spill] sm:$0xff] }
 0x1e3   : > { %7552 = vst [vmem:[#allocation3_spill] sm:$0xff] %v6466_v60  ;;  %v6478_v9 = vadd.f32 %v1214_v54, %v875_v24  ;;  %v6481_v34 = vadd.f32 %v1296_v27, %v7556_v63  ;;  %v7559_v60 = vld [vmem:[#allocation12_spill] sm:$0xff]  ;;  %v7560_v27 = vld [vmem:[#allocation7_spill] sm:$0xff]  ;;  %v885_v56 = vadd.f32 %v6349_v30, %v7563_v37 }
 0x1e4   : > { %v1218_v28 = vpop.f32.mrf.mxu0  ;;  %v4791_v8 = vpop.f32.mrf.mxu1  ;;  %4485 = vmatmul.mubr.msk.bf16.gmra.mxu0 %vm447_vm3, %v5039_v51  ;;  %4878 = vmatmul.mubr.msk.bf16.gmra.mxu1 %vm447_vm3, %v5039_v51  ;;  %v883_v51 = vadd.f32 %v6340_v18, %v7560_v27 }
 0x1e5   : > { %7555 = vst [vmem:[#allocation9_spill] sm:$0xff] %v6478_v9  ;;  %v6487_v58 = vadd.f32 %v1218_v28, %v879_v26  ;;  %v6490_v38 = vadd.f32 %v4791_v8, %v7559_v60  ;;  %3086 = vmatprep.mubr.bf16.mxu1 %v7535_v39  ;;  %4887 = vmatprep.mubr.msk.bf16.mxu0 %vm447_vm3, %v5040_v62  ;;  %v3384_v60 = vpop.permute.xlu0 %3383  ;;  %v5041_v8 = vld [vmem:[%s7523_s2 + $0x1c8] sm:$0xff]  }
 0x1e6   : > { %v1220_v24 = vpop.f32.mrf.mxu0  ;;  %v1309_v54 = vpop.f32.mrf.mxu1  ;;  %v3398_v9 = vsel %vm3393_vm10, %v6287_v20, %v6415_v33  ;;  %v3399_v22 = vsel %vm3393_vm10, %v6415_v33, %v3384_v60  ;;  %v3397_v33 = vsel %vm3393_vm10, %v6312_v55, %v6287_v20 }
 0x1e7   : > { %7558 = vst [vmem:[#allocation4_spill] sm:$0xff] %v6487_v58  ;;  %v6499_v16 = vadd.f32 %v1220_v24, %v881_v19  ;;  %v6502_v26 = vadd.f32 %v1309_v54, %v7562_v10  ;;  %v3376_v54 = vpop.permute.xlu1 %3375  ;;  %v7564_v10 = vld [vmem:[#allocation14_spill] sm:$0xff] }
 0x1e8   : > { %v1222_v63 = vpop.f32.mrf.mxu0  ;;  %v4792_v28 = vpop.f32.mrf.mxu1 }
 0x1e9   : > { %7561 = vst [vmem:[#allocation10_spill] sm:$0xff] %v6499_v16  ;;  %v6510_v58 = vadd.f32 %v1222_v63, %v883_v51  ;;  %v6513_v18 = vadd.f32 %v4792_v28, %v6196_v6  ;;  %v5042_v6 = vld [vmem:[%s7523_s2 + $0x1d0] sm:$0xff]   ;;  %v7565_v51 = vld [vmem:[#allocation15_spill] sm:$0xff] }
 0x1ea   : > { %v1224_v19 = vpop.f32.mrf.mxu0  ;;  %v1312_v24 = vpop.f32.mrf.mxu1 }
 0x1eb   : > { %v6515_v27 = vadd.f32 %v1224_v19, %v885_v56  ;;  %v6518_v16 = vadd.f32 %v1312_v24, %v7564_v10  ;;  %v7566_v56 = vld [vmem:[#allocation16_spill] sm:$0xff]  ;;  %v6568_v10 = vld [vmem:[%s7523_s2 + $0x1e0] sm:$0xff]  }
 0x1ec   : > { %v1536_v30 = vpop.f32.mrf.mxu1  ;;  %v4801_v50 = vpop.f32.mrf.mxu0  ;;  %4518 = vmatmul.mubr.msk.bf16.vlgmr.msra.gmra.mxu1 %vm447_vm3, %v5040_v62  ;;  %4888 = vmatmul.mubr.msk.bf16.vlgmr.msra.gmra.mxu0 %vm447_vm3, %v5041_v8  ;;  %v3395_v62 = vsel %vm3393_vm10, %v6441_v36, %v6338_v46 }
 0x1ed   : > { %v6531_v63 = vadd.f32 %v1536_v30, %v7565_v51  ;;  %v6534_v28 = vadd.f32 %v4801_v50, %v6364_v14  ;;  %3453 = vmatpush1.bf16.msra.mxu0 %v3434_v23  ;;  %4904 = vmatpush3.bf16.msra.mxu1 %v6403_v45  ;;  %v3396_v45 = vsel %vm3393_vm10, %v6338_v46, %v3376_v54 }
 0x1ee   : > { %3454 = vmatprep.subr.bf16.mxu0 %v3398_v9  ;;  %v1538_v60 = vpop.f32.mrf.mxu1  ;;  %v1649_v37 = vpop.f32.mrf.mxu0  ;;  %4905 = vmatprep.subr.bf16.mxu1 %v3399_v22  ;;  %v5043_v9 = vld [vmem:[%s7523_s2 + $0x1d8] sm:$0xff]   ;;  %v3394_v46 = vsel %vm3393_vm10, %v6471_v5, %v6441_v36 }
 0x1ef   : > { %v6544_v19 = vadd.f32 %v1538_v60, %v7566_v56  ;;  %v6547_v14 = vadd.f32 %v1649_v37, %v6375_v4  ;;  %3096 = vmatprep.mubr.bf16.mxu1 %v7535_v39  ;;  %4891 = vmatprep.mubr.msk.bf16.mxu0 %vm447_vm3, %v5042_v6 }
 0x1f0   : > { %v1540_v20 = vpop.f32.mrf.mxu1  ;;  %v4802_v55 = vpop.f32.mrf.mxu0 }
 0x1f1   : > { %v6557_v23 = vadd.f32 %v1540_v20, %v6245_v44  ;;  %v6560_v24 = vadd.f32 %v4802_v55, %v6391_v1  ;;  %3455 = vmatpush1.bf16.msra.mxu0 %v3397_v33  ;;  %4906 = vmatpush3.bf16.msra.mxu1 %v3399_v22 }
 0x1f2   : > { %3456 = vmatprep.subr.bf16.mxu0 %v3395_v62  ;;  %4907 = vmatprep.subr.bf16.mxu1 %v3396_v45  ;;  %v1542_v4 = vpop.f32.mrf.mxu1  ;;  %v1652_v54 = vpop.f32.mrf.mxu0 }
 0x1f3   : > { %v6571_v44 = vadd.f32 %v1542_v4, %v6251_v61  ;;  %v6574_v1 = vadd.f32 %v1652_v54, %v6400_v13 }
 0x1f4   : > { %v1546_v22 = vpop.f32.mrf.mxu1  ;;  %v4805_v30 = vpop.f32.mrf.mxu0  ;;  %4519 = vmatmul.mubr.msk.bf16.gmra.mxu1 %vm447_vm3, %v5041_v8  ;;  %4892 = vmatmul.mubr.msk.bf16.gmra.mxu0 %vm447_vm3, %v5043_v9 }
 0x1f5   : > { %v6579_v36 = vadd.f32 %v1546_v22, %v6262_v29  ;;  %v6582_v5 = vadd.f32 %v4805_v30, %v6411_v57  ;;  %4908 = vmatpush3.bf16.msra.mxu1 %v3396_v45  ;;  %3457 = vmatpush1.bf16.msra.mxu0 %v3394_v46  ;;  %v6596_v57 = vld [vmem:[%s7523_s2 + $0x1e8] sm:$0xff]  }
 0x1f6   : > { %v1548_v50 = vpop.f32.mrf.mxu1  ;;  %v1665_v61 = vpop.f32.mrf.mxu0  ;;  %3106 = vmatprep.mubr.bf16.mxu1 %v7535_v39  ;;  %4895 = vmatprep.mubr.msk.bf16.mxu0 %vm447_vm3, %v6568_v10 }
 0x1f7   : > { %v6588_v13 = vadd.f32 %v1548_v50, %v6270_v25  ;;  %v6591_v8 = vadd.f32 %v1665_v61, %v6421_v0  ;;  %v6607_v25 = vld [vmem:[%s7523_s2 + $0x1f0] sm:$0xff]  }
 0x1f8   : > { %v1550_v29 = vpop.f32.mrf.mxu1  ;;  %v4806_v51 = vpop.f32.mrf.mxu0 }
 0x1f9   : > { %v6599_v33 = vadd.f32 %v1550_v29, %v6279_v21  ;;  %v6602_v60 = vadd.f32 %v4806_v51, %v6431_v49 }
 0x1fa   : > { %v1552_v0 = vpop.f32.mrf.mxu1  ;;  %v1668_v37 = vpop.f32.mrf.mxu0 }
 0x1fb   : > { %v6610_v62 = vadd.f32 %v1552_v0, %v6285_v3  ;;  %v6613_v56 = vadd.f32 %v1668_v37, %v6439_v59  ;;  %v7569_v37 = vld [vmem:[#allocation19_spill] sm:$0xff] }
 0x1fc   : > { %v1556_v45 = vpop.f32.mrf.mxu1  ;;  %v4809_v20 = vpop.f32.mrf.mxu0  ;;  %4520 = vmatmul.mubr.msk.bf16.gmra.mxu1 %vm447_vm3, %v5042_v6  ;;  %4896 = vmatmul.mubr.msk.bf16.gmra.mxu0 %vm447_vm3, %v6596_v57 }
 0x1fd   : > { %v6619_v21 = vadd.f32 %v1556_v45, %v6295_v35  ;;  %v6622_v49 = vadd.f32 %v4809_v20, %v6450_v52  ;;  %3116 = vmatprep.mubr.bf16.mxu1 %v7535_v39  ;;  %4899 = vmatprep.mubr.msk.bf16.mxu0 %vm447_vm3, %v6607_v25  ;;  %v6636_v35 = vld [vmem:[%s7523_s2 + $0x1f8] sm:$0xff]  }
 0x1fe   : > { %v1558_v3 = vpop.f32.mrf.mxu1  ;;  %v1681_v59 = vpop.f32.mrf.mxu0 }
 0x1ff   : > { %v6628_v55 = vadd.f32 %v1558_v3, %v6302_v7  ;;  %v6631_v6 = vadd.f32 %v1681_v59, %v6459_v11  ;;  %v7567_v7 = vld [vmem:[#allocation17_spill] sm:$0xff]  ;;  %v6670_v59 = vld [vmem:[%s7523_s2 + $0x200] sm:$0xff]  }
 0x200   : > { %v1560_v46 = vpop.f32.mrf.mxu1  ;;  %v4810_v4 = vpop.f32.mrf.mxu0 }
 0x201   : > { %v6639_v52 = vadd.f32 %v1560_v46, %v6310_v31  ;;  %v6642_v54 = vadd.f32 %v4810_v4, %v6469_v53  ;;  %v7568_v31 = vld [vmem:[#allocation18_spill] sm:$0xff] }
 0x202   : > { %v1562_v22 = vpop.f32.mrf.mxu1  ;;  %v1684_v30 = vpop.f32.mrf.mxu0 }
 0x203   : > { %v6645_v50 = vadd.f32 %v1562_v22, %v7567_v7  ;;  %v6648_v11 = vadd.f32 %v1684_v30, %v6481_v34 }
 0x204   : > { %v1566_v61 = vpop.f32.mrf.mxu1  ;;  %v4813_v29 = vpop.f32.mrf.mxu0  ;;  %4521 = vmatmul.mubr.msk.bf16.gmra.mxu1 %vm447_vm3, %v5043_v9  ;;  %4900 = vmatmul.mubr.msk.bf16.gmra.mxu0 %vm447_vm3, %v6636_v35 }
 0x205   : > { %v6654_v51 = vadd.f32 %v1566_v61, %v7568_v31  ;;  %v6657_v53 = vadd.f32 %v4813_v29, %v6490_v38  ;;  %3126 = vmatprep.mubr.bf16.mxu1 %v7535_v39  ;;  %3474 = vmatprep.mubr.bf16.mxu0 %v7535_v39 }
 0x206   : > { %v1568_v0 = vpop.f32.mrf.mxu1  ;;  %v1697_v34 = vpop.f32.mrf.mxu0 }
 0x207   : > { %v6662_v45 = vadd.f32 %v1568_v0, %v7569_v37  ;;  %v6665_v9 = vadd.f32 %v1697_v34, %v6502_v26 }
 0x208   : > { %v1570_v20 = vpop.f32.mrf.mxu1  ;;  %v4814_v3 = vpop.f32.mrf.mxu0 }
 0x209   : > { %v6673_v38 = vadd.f32 %v1570_v20, %v6347_v47  ;;  %v6676_v46 = vadd.f32 %v4814_v3, %v6513_v18 }
 0x20a   : > { %v1572_v4 = vpop.f32.mrf.mxu1  ;;  %v1700_v22 = vpop.f32.mrf.mxu0 }
 0x20b   : > { %v6679_v30 = vadd.f32 %v1572_v4, %v6352_v48  ;;  %v6682_v26 = vadd.f32 %v1700_v22, %v6518_v16 }
 0x20c   : > { %v1576_v7 = vpop.f32.mrf.mxu1  ;;  %v1924_v61 = vpop.f32.mrf.mxu0  ;;  %4522 = vmatmul.mubr.msk.bf16.gmra.mxu1 %vm447_vm3, %v6568_v10  ;;  %4558 = vmatmul.mubr.msk.bf16.vlgmr.msra.gmra.mxu0 %vm447_vm3, %v6670_v59 }
 0x20d   : > { %v6689_v47 = vadd.f32 %v1576_v7, %v6361_v17  ;;  %v6692_v18 = vadd.f32 %v1924_v61, %v6531_v63  ;;  %3136 = vmatprep.mubr.bf16.mxu1 %v7535_v39  ;;  %3484 = vmatprep.mubr.bf16.mxu0 %v7535_v39  ;;  %v6705_v17 = vld [vmem:[%s7523_s2 + $0x208] sm:$0xff]  }
 0x20e   : > { %v1578_v48 = vpop.f32.mrf.mxu1  ;;  %v1926_v16 = vpop.f32.mrf.mxu0 }
 0x20f   : > { %v6697_v29 = vadd.f32 %v1578_v48, %v6372_v40  ;;  %v6700_v10 = vadd.f32 %v1926_v16, %v6544_v19 }
 0x210   : > { %v1580_v31 = vpop.f32.mrf.mxu1  ;;  %v1928_v0 = vpop.f32.mrf.mxu0 }
 0x211   : > { %v6708_v63 = vadd.f32 %v1580_v31, %v6388_v42  ;;  %v6711_v34 = vadd.f32 %v1928_v0, %v6557_v23 }
 0x212   : > { %v1582_v37 = vpop.f32.mrf.mxu1  ;;  %v1930_v20 = vpop.f32.mrf.mxu0 }
 0x213   : > { %v6714_v40 = vadd.f32 %v1582_v37, %v6397_v32  ;;  %v6717_v19 = vadd.f32 %v1930_v20, %v6571_v44  ;;  %v7570_v20 = vld [vmem:[#allocation2_spill] sm:$0xff] }
 0x214   : > { %v1586_v3 = vpop.f32.mrf.mxu1  ;;  %v1934_v4 = vpop.f32.mrf.mxu0  ;;  %4523 = vmatmul.mubr.msk.bf16.gmra.mxu1 %vm447_vm3, %v6596_v57  ;;  %4559 = vmatmul.mubr.msk.bf16.gmra.mxu0 %vm447_vm3, %v6705_v17 }
 0x215   : > { %v6724_v42 = vadd.f32 %v1586_v3, %v6408_v43  ;;  %v6727_v23 = vadd.f32 %v1934_v4, %v6579_v36  ;;  %3146 = vmatprep.mubr.bf16.mxu1 %v7535_v39  ;;  %3494 = vmatprep.mubr.bf16.mxu0 %v7535_v39  ;;  %v5050_v43 = vld [vmem:[%s7523_s2 + $0x210] sm:$0xff]  }
 0x216   : > { %v1588_v32 = vpop.f32.mrf.mxu1  ;;  %v1936_v44 = vpop.f32.mrf.mxu0 }
 0x217   : > { %v6732_v22 = vadd.f32 %v1588_v32, %v6418_v2  ;;  %v6735_v57 = vadd.f32 %v1936_v44, %v6588_v13 }
 0x218   : > { %v1590_v7 = vpop.f32.mrf.mxu1  ;;  %v1938_v61 = vpop.f32.mrf.mxu0 }
 0x219   : > { %v6741_v36 = vadd.f32 %v1590_v7, %v6428_v12  ;;  %v6744_v48 = vadd.f32 %v1938_v61, %v6599_v33 }
 0x21a   : > { %v1592_v16 = vpop.f32.mrf.mxu1  ;;  %v1940_v31 = vpop.f32.mrf.mxu0 }
 0x21b   : > { %v6747_v2 = vadd.f32 %v1592_v16, %v6436_v41  ;;  %v6750_v13 = vadd.f32 %v1940_v31, %v6610_v62  ;;  %v7572_v31 = vld [vmem:[#allocation9_spill] sm:$0xff] }
 0x21c   : > { %v1596_v0 = vpop.f32.mrf.mxu1  ;;  %v1944_v37 = vpop.f32.mrf.mxu0  ;;  %4524 = vmatmul.mubr.msk.bf16.gmra.mxu1 %vm447_vm3, %v6607_v25  ;;  %4560 = vmatmul.mubr.msk.bf16.gmra.mxu0 %vm447_vm3, %v5050_v43 }
 0x21d   : > { %v6756_v12 = vadd.f32 %v1596_v0, %v6447_v15  ;;  %v6759_v33 = vadd.f32 %v1944_v37, %v6619_v21  ;;  %3156 = vmatprep.mubr.bf16.mxu1 %v7535_v39  ;;  %3504 = vmatprep.mubr.bf16.mxu0 %v7535_v39  ;;  %v5051_v15 = vld [vmem:[%s7523_s2 + $0x218] sm:$0xff]   ;;  %v7571_v21 = vld [vmem:[#allocation3_spill] sm:$0xff] }
 0x21e   : > { %v1598_v41 = vpop.f32.mrf.mxu1  ;;  %v1946_v62 = vpop.f32.mrf.mxu0 }
 0x21f   : > { %v6764_v3 = vadd.f32 %v1598_v41, %v7570_v20  ;;  %v6767_v4 = vadd.f32 %v1946_v62, %v6628_v55  ;;  %v7573_v62 = vld [vmem:[#allocation4_spill] sm:$0xff] }
 0x220   : > { %v1600_v25 = vpop.f32.mrf.mxu1  ;;  %v1948_v32 = vpop.f32.mrf.mxu0 }
 0x221   : > { %v6773_v44 = vadd.f32 %v1600_v25, %v7571_v21  ;;  %v6776_v7 = vadd.f32 %v1948_v32, %v6639_v52  ;;  %v7574_v32 = vld [vmem:[#allocation10_spill] sm:$0xff] }
 0x222   : > { %v1602_v61 = vpop.f32.mrf.mxu1  ;;  %v1950_v16 = vpop.f32.mrf.mxu0 }
 0x223   : > { %v6779_v0 = vadd.f32 %v1602_v61, %v7572_v31  ;;  %v6782_v55 = vadd.f32 %v1950_v16, %v6645_v50 }
 0x224   : > { %v1606_v37 = vpop.f32.mrf.mxu1  ;;  %v1954_v41 = vpop.f32.mrf.mxu0  ;;  %4525 = vmatmul.mubr.msk.bf16.gmra.mxu1 %vm447_vm3, %v6636_v35  ;;  %4561 = vmatmul.mubr.msk.bf16.gmra.mxu0 %vm447_vm3, %v5051_v15 }
 0x225   : > { %v6788_v20 = vadd.f32 %v1606_v37, %v7573_v62  ;;  %v6791_v52 = vadd.f32 %v1954_v41, %v6654_v51  ;;  %3514 = vmatprep.mubr.bf16.mxu0 %v7535_v39  ;;  %4909 = vmatprep.mubr.msk.bf16.mxu1 %vm447_vm3, %v6670_v59  ;;  %v5052_v51 = vld [vmem:[%s7523_s2 + $0x220] sm:$0xff]  }
 0x226   : > { %v1608_v50 = vpop.f32.mrf.mxu1  ;;  %v1956_v25 = vpop.f32.mrf.mxu0 }
 0x227   : > { %v6797_v21 = vadd.f32 %v1608_v50, %v7574_v32  ;;  %v6800_v35 = vadd.f32 %v1956_v25, %v6662_v45 }
 0x228   : > { %v1610_v61 = vpop.f32.mrf.mxu1  ;;  %v1958_v16 = vpop.f32.mrf.mxu0 }
 0x229   : > { %v6806_v31 = vadd.f32 %v1610_v61, %v6510_v58  ;;  %v6809_v37 = vadd.f32 %v1958_v16, %v6673_v38 }
 0x22a   : > { %v1612_v59 = vpop.f32.mrf.mxu1  ;;  %v1960_v41 = vpop.f32.mrf.mxu0 }
 0x22b   : > { %v6812_v62 = vadd.f32 %v1612_v59, %v6515_v27  ;;  %v6815_v45 = vadd.f32 %v1960_v41, %v6679_v30 }
 0x22c   : > { %v1964_v50 = vpop.f32.mrf.mxu0  ;;  %v4823_v25 = vpop.f32.mrf.mxu1  ;;  %4562 = vmatmul.mubr.msk.bf16.gmra.mxu0 %vm447_vm3, %v5052_v51  ;;  %4910 = vmatmul.mubr.msk.bf16.vlgmr.msra.gmra.mxu1 %vm447_vm3, %v6705_v17 }
 0x22d   : > { %v6821_v58 = vadd.f32 %v1964_v50, %v6689_v47  ;;  %v6824_v38 = vadd.f32 %v4823_v25, %v6534_v28  ;;  %3524 = vmatprep.mubr.bf16.mxu0 %v7535_v39  ;;  %4913 = vmatprep.mubr.msk.bf16.mxu1 %vm447_vm3, %v5050_v43  ;;  %v5053_v47 = vld [vmem:[%s7523_s2 + $0x228] sm:$0xff]  }
 0x22e   : > { %v1966_v27 = vpop.f32.mrf.mxu0  ;;  %v2037_v30 = vpop.f32.mrf.mxu1 }
 0x22f   : > { %v6829_v32 = vadd.f32 %v1966_v27, %v6697_v29  ;;  %v6832_v61 = vadd.f32 %v2037_v30, %v6547_v14 }
 0x230   : > { %v1968_v16 = vpop.f32.mrf.mxu0  ;;  %v4824_v17 = vpop.f32.mrf.mxu1 }
 0x231   : > { %v6838_v28 = vadd.f32 %v1968_v16, %v6708_v63  ;;  %v6841_v59 = vadd.f32 %v4824_v17, %v6560_v24 }
 0x232   : > { %v1970_v43 = vpop.f32.mrf.mxu0  ;;  %v2040_v41 = vpop.f32.mrf.mxu1 }
 0x233   : > { %v6844_v29 = vadd.f32 %v1970_v43, %v6714_v40  ;;  %v6847_v14 = vadd.f32 %v2040_v41, %v6574_v1 }
 0x234   : > { %v1974_v50 = vpop.f32.mrf.mxu0  ;;  %v4827_v25 = vpop.f32.mrf.mxu1  ;;  %4563 = vmatmul.mubr.msk.bf16.gmra.mxu0 %vm447_vm3, %v5053_v47  ;;  %4914 = vmatmul.mubr.msk.bf16.gmra.mxu1 %vm447_vm3, %v5051_v15 }
 0x235   : > { %v6852_v63 = vadd.f32 %v1974_v50, %v6724_v42  ;;  %v6855_v24 = vadd.f32 %v4827_v25, %v6582_v5  ;;  %3534 = vmatprep.mubr.bf16.mxu0 %v7535_v39  ;;  %4917 = vmatprep.mubr.msk.bf16.mxu1 %vm447_vm3, %v5052_v51  ;;  %v5054_v42 = vld [vmem:[%s7523_s2 + $0x230] sm:$0xff]  }
 0x236   : > { %v1976_v40 = vpop.f32.mrf.mxu0  ;;  %v2053_v27 = vpop.f32.mrf.mxu1 }
 0x237   : > { %v6860_v1 = vadd.f32 %v1976_v40, %v6732_v22  ;;  %v6863_v30 = vadd.f32 %v2053_v27, %v6591_v8 }
 0x238   : > { %v1978_v16 = vpop.f32.mrf.mxu0  ;;  %v4828_v15 = vpop.f32.mrf.mxu1 }
 0x239   : > { %v6869_v5 = vadd.f32 %v1978_v16, %v6741_v36  ;;  %v6872_v17 = vadd.f32 %v4828_v15, %v6602_v60 }
 0x23a   : > { %v1980_v51 = vpop.f32.mrf.mxu0  ;;  %v2056_v43 = vpop.f32.mrf.mxu1 }
 0x23b   : > { %v6875_v22 = vadd.f32 %v1980_v51, %v6747_v2  ;;  %v6878_v8 = vadd.f32 %v2056_v43, %v6613_v56 }
 0x23c   : > { %v1984_v41 = vpop.f32.mrf.mxu0  ;;  %v4831_v50 = vpop.f32.mrf.mxu1  ;;  %4564 = vmatmul.mubr.msk.bf16.gmra.mxu0 %vm447_vm3, %v5054_v42  ;;  %4918 = vmatmul.mubr.msk.bf16.gmra.mxu1 %vm447_vm3, %v5053_v47 }
 0x23d   : > { %v6883_v36 = vadd.f32 %v1984_v41, %v6756_v12  ;;  %v6886_v60 = vadd.f32 %v4831_v50, %v6622_v49  ;;  %3544 = vmatprep.mubr.bf16.mxu0 %v7535_v39  ;;  %4921 = vmatprep.mubr.msk.bf16.mxu1 %vm447_vm3, %v5054_v42  ;;  %v5055_v12 = vld [vmem:[%s7523_s2 + $0x238] sm:$0xff]  }
 0x23e   : > { %v1986_v2 = vpop.f32.mrf.mxu0  ;;  %v2069_v25 = vpop.f32.mrf.mxu1 }
 0x23f   : > { %v6891_v56 = vadd.f32 %v1986_v2, %v6764_v3  ;;  %v6894_v40 = vadd.f32 %v2069_v25, %v6631_v6 }
 0x240   : > { %v1988_v27 = vpop.f32.mrf.mxu0  ;;  %v4832_v47 = vpop.f32.mrf.mxu1 }
 0x241   : > { %v6900_v49 = vadd.f32 %v1988_v27, %v6773_v44  ;;  %v6903_v39 = vadd.f32 %v4832_v47, %v6642_v54 }
 0x242   : > { %v1990_v16 = vpop.f32.mrf.mxu0  ;;  %v2072_v15 = vpop.f32.mrf.mxu1 }
 0x243   : > { %v6906_v3 = vadd.f32 %v1990_v16, %v6779_v0  ;;  %v6909_v6 = vadd.f32 %v2072_v15, %v6648_v11 }
 0x244   : > { %v1994_v42 = vpop.f32.mrf.mxu0  ;;  %v4835_v51 = vpop.f32.mrf.mxu1  ;;  %4565 = vmatmul.mubr.msk.bf16.gmra.mxu0 %vm447_vm3, %v5055_v12  ;;  %4922 = vmatmul.mubr.msk.bf16.gmra.mxu1 %vm447_vm3, %v5055_v12 }
 0x245   : > { %v6914_v44 = vadd.f32 %v1994_v42, %v6788_v20  ;;  %v6917_v54 = vadd.f32 %v4835_v51, %v6657_v53 }
 0x246   : > { %v1996_v43 = vpop.f32.mrf.mxu0  ;;  %v2085_v41 = vpop.f32.mrf.mxu1 }
 0x247   : > { %v6920_v0 = vadd.f32 %v1996_v43, %v6797_v21  ;;  %v6923_v11 = vadd.f32 %v2085_v41, %v6665_v9 }
 0x248   : > { %v1998_v50 = vpop.f32.mrf.mxu0  ;;  %v4836_v2 = vpop.f32.mrf.mxu1 }
 0x249   : > { %v6926_v25 = vadd.f32 %v1998_v50, %v6806_v31  ;;  %v6929_v27 = vadd.f32 %v4836_v2, %v6676_v46 }
 0x24a   : > { %v2000_v20 = vpop.f32.mrf.mxu0  ;;  %v2088_v47 = vpop.f32.mrf.mxu1 }
 0x24b   : > { %v6932_v53 = vadd.f32 %v2000_v20, %v6812_v62  ;;  %v6935_v12 = vadd.f32 %v2088_v47, %v6682_v26 }
 0x24c   : > { %v2312_v21 = vpop.f32.mrf.mxu1  ;;  %v4845_v16 = vpop.f32.mrf.mxu0 }
 0x24d   : > { %v6938_v9 = vadd.f32 %v2312_v21, %v6692_v18  ;;  %v6941_v15 = vadd.f32 %v4845_v16, %v6824_v38 }
 0x24e   : > { %v2314_v31 = vpop.f32.mrf.mxu1  ;;  %v2425_v42 = vpop.f32.mrf.mxu0 }
 0x24f   : > { %v6944_v46 = vadd.f32 %v2314_v31, %v6700_v10  ;;  %v6947_v51 = vadd.f32 %v2425_v42, %v6832_v61 }
 0x250   : > { %v2316_v62 = vpop.f32.mrf.mxu1  ;;  %v4846_v43 = vpop.f32.mrf.mxu0 }
 0x251   : > { %v6950_v26 = vadd.f32 %v2316_v62, %v6711_v34  ;;  %v6953_v41 = vadd.f32 %v4846_v43, %v6841_v59 }
 0x252   : > { %v2318_v18 = vpop.f32.mrf.mxu1  ;;  %v2428_v50 = vpop.f32.mrf.mxu0 }
 0x253   : > { %v6956_v38 = vadd.f32 %v2318_v18, %v6717_v19  ;;  %v6959_v2 = vadd.f32 %v2428_v50, %v6847_v14 }
 0x254   : > { %v2322_v10 = vpop.f32.mrf.mxu1  ;;  %v4849_v20 = vpop.f32.mrf.mxu0 }
 0x255   : > { %v6962_v61 = vadd.f32 %v2322_v10, %v6727_v23  ;;  %v6965_v47 = vadd.f32 %v4849_v20, %v6855_v24 }
 0x256   : > { %v2324_v34 = vpop.f32.mrf.mxu1  ;;  %v2441_v21 = vpop.f32.mrf.mxu0 }
 0x257   : > { %v6968_v59 = vadd.f32 %v2324_v34, %v6735_v57  ;;  %v6971_v16 = vadd.f32 %v2441_v21, %v6863_v30 }
 0x258   : > { %v2326_v19 = vpop.f32.mrf.mxu1  ;;  %v4850_v31 = vpop.f32.mrf.mxu0 }
 0x259   : > { %v6974_v14 = vadd.f32 %v2326_v19, %v6744_v48  ;;  %v6977_v42 = vadd.f32 %v4850_v31, %v6872_v17 }
 0x25a   : > { %v2328_v23 = vpop.f32.mrf.mxu1  ;;  %v2444_v62 = vpop.f32.mrf.mxu0 }
 0x25b   : > { %v6980_v24 = vadd.f32 %v2328_v23, %v6750_v13  ;;  %v6983_v43 = vadd.f32 %v2444_v62, %v6878_v8 }
 0x25c   : > { %v2332_v57 = vpop.f32.mrf.mxu1  ;;  %v4853_v18 = vpop.f32.mrf.mxu0 }
 0x25d   : > { %v6986_v30 = vadd.f32 %v2332_v57, %v6759_v33  ;;  %v6989_v50 = vadd.f32 %v4853_v18, %v6886_v60 }
 0x25e   : > { %v2334_v48 = vpop.f32.mrf.mxu1  ;;  %v2457_v10 = vpop.f32.mrf.mxu0 }
 0x25f   : > { %v6992_v17 = vadd.f32 %v2334_v48, %v6767_v4  ;;  %v6995_v20 = vadd.f32 %v2457_v10, %v6894_v40 }
 0x260   : > { %v2336_v13 = vpop.f32.mrf.mxu1  ;;  %v4854_v34 = vpop.f32.mrf.mxu0 }
 0x261   : > { %v6998_v8 = vadd.f32 %v2336_v13, %v6776_v7  ;;  %v7001_v21 = vadd.f32 %v4854_v34, %v6903_v39 }
 0x262   : > { %v2338_v33 = vpop.f32.mrf.mxu1  ;;  %v2460_v19 = vpop.f32.mrf.mxu0 }
 0x263   : > { %v7004_v60 = vadd.f32 %v2338_v33, %v6782_v55  ;;  %v7007_v31 = vadd.f32 %v2460_v19, %v6909_v6 }
 0x264   : > { %v2342_v4 = vpop.f32.mrf.mxu1  ;;  %v4857_v23 = vpop.f32.mrf.mxu0 }
 0x265   : > { %v7010_v40 = vadd.f32 %v2342_v4, %v6791_v52  ;;  %v7013_v62 = vadd.f32 %v4857_v23, %v6917_v54 }
 0x266   : > { %v2344_v7 = vpop.f32.mrf.mxu1  ;;  %v2473_v57 = vpop.f32.mrf.mxu0 }
 0x267   : > { %v7016_v39 = vadd.f32 %v2344_v7, %v6800_v35  ;;  %v7019_v18 = vadd.f32 %v2473_v57, %v6923_v11 }
 0x268   : > { %v2346_v55 = vpop.f32.mrf.mxu1  ;;  %v4858_v48 = vpop.f32.mrf.mxu0 }
 0x269   : > { %v7022_v6 = vadd.f32 %v2346_v55, %v6809_v37  ;;  %v7025_v10 = vadd.f32 %v4858_v48, %v6929_v27 }
 0x26a   : > { %v2348_v52 = vpop.f32.mrf.mxu1  ;;  %v2476_v13 = vpop.f32.mrf.mxu0 }
 0x26b   : > { %v7028_v54 = vadd.f32 %v2348_v52, %v6815_v45  ;;  %v7031_v34 = vadd.f32 %v2476_v13, %v6935_v12 }
 0x26c   : > { %v2352_v35 = vpop.f32.mrf.mxu1  ;;  %v2700_v33 = vpop.f32.mrf.mxu0 }
 0x26d   : > { %v7034_v11 = vadd.f32 %v2352_v35, %v6821_v58  ;;  %v7037_v19 = vadd.f32 %v2700_v33, %v6938_v9 }
 0x26e   : > { %v2354_v37 = vpop.f32.mrf.mxu1  ;;  %v2702_v4 = vpop.f32.mrf.mxu0 }
 0x26f   : > { %v7040_v27 = vadd.f32 %v2354_v37, %v6829_v32  ;;  %v7043_v23 = vadd.f32 %v2702_v4, %v6944_v46 }
 0x270   : > { %v2356_v45 = vpop.f32.mrf.mxu1  ;;  %v2704_v7 = vpop.f32.mrf.mxu0 }
 0x271   : > { %v7046_v12 = vadd.f32 %v2356_v45, %v6838_v28  ;;  %v7049_v57 = vadd.f32 %v2704_v7, %v6950_v26 }
 0x272   : > { %v2358_v58 = vpop.f32.mrf.mxu1  ;;  %v2706_v55 = vpop.f32.mrf.mxu0 }
 0x273   : > { %v7052_v9 = vadd.f32 %v2358_v58, %v6844_v29  ;;  %v7055_v48 = vadd.f32 %v2706_v55, %v6956_v38 }
 0x274   : > { %v2362_v32 = vpop.f32.mrf.mxu1  ;;  %v2710_v52 = vpop.f32.mrf.mxu0 }
 0x275   : > { %v7058_v46 = vadd.f32 %v2362_v32, %v6852_v63  ;;  %v7061_v13 = vadd.f32 %v2710_v52, %v6962_v61 }
 0x276   : > { %v2364_v28 = vpop.f32.mrf.mxu1  ;;  %v2712_v35 = vpop.f32.mrf.mxu0 }
 0x277   : > { %v7064_v26 = vadd.f32 %v2364_v28, %v6860_v1  ;;  %v7067_v33 = vadd.f32 %v2712_v35, %v6968_v59 }
 0x278   : > { %v2366_v29 = vpop.f32.mrf.mxu1  ;;  %v2714_v37 = vpop.f32.mrf.mxu0 }
 0x279   : > { %v7070_v38 = vadd.f32 %v2366_v29, %v6869_v5  ;;  %v7073_v4 = vadd.f32 %v2714_v37, %v6974_v14 }
 0x27a   : > { %v2368_v63 = vpop.f32.mrf.mxu1  ;;  %v2716_v45 = vpop.f32.mrf.mxu0 }
 0x27b   : > { %v7076_v61 = vadd.f32 %v2368_v63, %v6875_v22  ;;  %v7079_v7 = vadd.f32 %v2716_v45, %v6980_v24 }
 0x27c   : > { %v2372_v1 = vpop.f32.mrf.mxu1  ;;  %v2720_v58 = vpop.f32.mrf.mxu0 }
 0x27d   : > { %v7082_v59 = vadd.f32 %v2372_v1, %v6883_v36  ;;  %v7085_v55 = vadd.f32 %v2720_v58, %v6986_v30 }
 0x27e   : > { %v2374_v5 = vpop.f32.mrf.mxu1  ;;  %v2722_v32 = vpop.f32.mrf.mxu0 }
 0x27f   : > { %v7088_v14 = vadd.f32 %v2374_v5, %v6891_v56  ;;  %v7091_v52 = vadd.f32 %v2722_v32, %v6992_v17 }
 0x280   : > { %v2376_v22 = vpop.f32.mrf.mxu1  ;;  %v2724_v28 = vpop.f32.mrf.mxu0 }
 0x281   : > { %v7094_v24 = vadd.f32 %v2376_v22, %v6900_v49  ;;  %v7097_v35 = vadd.f32 %v2724_v28, %v6998_v8 }
 0x282   : > { %v2378_v36 = vpop.f32.mrf.mxu1  ;;  %v2726_v29 = vpop.f32.mrf.mxu0 }
 0x283   : > { %v7100_v30 = vadd.f32 %v2378_v36, %v6906_v3  ;;  %v7103_v37 = vadd.f32 %v2726_v29, %v7004_v60 }
 0x284   : > { %v2382_v56 = vpop.f32.mrf.mxu1  ;;  %v2730_v63 = vpop.f32.mrf.mxu0 }
 0x285   : > { %v7106_v17 = vadd.f32 %v2382_v56, %v6914_v44  ;;  %v7109_v45 = vadd.f32 %v2730_v63, %v7010_v40 }
 0x286   : > { %v2384_v49 = vpop.f32.mrf.mxu1  ;;  %v2732_v1 = vpop.f32.mrf.mxu0 }
 0x287   : > { %v7112_v8 = vadd.f32 %v2384_v49, %v6920_v0  ;;  %v7115_v58 = vadd.f32 %v2732_v1, %v7016_v39 }
 0x288   : > { %v2386_v3 = vpop.f32.mrf.mxu1  ;;  %v2734_v5 = vpop.f32.mrf.mxu0 }
 0x289   : > { %v7118_v60 = vadd.f32 %v2386_v3, %v6926_v25  ;;  %v7121_v32 = vadd.f32 %v2734_v5, %v7022_v6 }
 0x28a   : > { %v2388_v44 = vpop.f32.mrf.mxu1  ;;  %v2736_v22 = vpop.f32.mrf.mxu0 }
 0x28b   : > { %v7124_v40 = vadd.f32 %v2388_v44, %v6932_v53  ;;  %v7127_v28 = vadd.f32 %v2736_v22, %v7028_v54 }
 0x28c   : > { %v2740_v0 = vpop.f32.mrf.mxu0  ;;  %v4867_v36 = vpop.f32.mrf.mxu1 }
 0x28d   : > { %v7130_v39 = vadd.f32 %v2740_v0, %v7034_v11  ;;  %v7133_v29 = vadd.f32 %v4867_v36, %v6941_v15 }
 0x28e   : > { %v2742_v25 = vpop.f32.mrf.mxu0  ;;  %v2813_v56 = vpop.f32.mrf.mxu1 }
 0x28f   : > { %v7136_v6 = vadd.f32 %v2742_v25, %v7040_v27  ;;  %v2878_v63 = vadd.f32 %v2813_v56, %v6947_v51 }
 0x290   : > { %v2744_v53 = vpop.f32.mrf.mxu0  ;;  %v4868_v49 = vpop.f32.mrf.mxu1 }
 0x291   : > { %v7140_v54 = vadd.f32 %v2744_v53, %v7046_v12  ;;  %v2887_v1 = vadd.f32 %v4868_v49, %v6953_v41 }
 0x292   : > { %v2746_v3 = vpop.f32.mrf.mxu0  ;;  %v2816_v11 = vpop.f32.mrf.mxu1 }
 0x293   : > { %v7144_v5 = vadd.f32 %v2746_v3, %v7052_v9  ;;  %v2881_v15 = vadd.f32 %v2816_v11, %v6959_v2 }
 0x294   : > { %v2750_v44 = vpop.f32.mrf.mxu0  ;;  %v4871_v22 = vpop.f32.mrf.mxu1 }
 0x295   : > { %v7148_v27 = vadd.f32 %v2750_v44, %v7058_v46  ;;  %v2896_v51 = vadd.f32 %v4871_v22, %v6965_v47 }
 0x296   : > { %v2752_v0 = vpop.f32.mrf.mxu0  ;;  %v2829_v36 = vpop.f32.mrf.mxu1 }
 0x297   : > { %v7152_v12 = vadd.f32 %v2752_v0, %v7064_v26  ;;  %v2890_v41 = vadd.f32 %v2829_v36, %v6971_v16 }
 0x298   : > { %v2754_v25 = vpop.f32.mrf.mxu0  ;;  %v4872_v56 = vpop.f32.mrf.mxu1 }
 0x299   : > { %v7156_v9 = vadd.f32 %v2754_v25, %v7070_v38  ;;  %v2899_v2 = vadd.f32 %v4872_v56, %v6977_v42 }
 0x29a   : > { %v2756_v53 = vpop.f32.mrf.mxu0  ;;  %v2832_v49 = vpop.f32.mrf.mxu1 }
 0x29b   : > { %v7160_v46 = vadd.f32 %v2756_v53, %v7076_v61  ;;  %v2893_v47 = vadd.f32 %v2832_v49, %v6983_v43 }
 0x29c   : > { %v2760_v3 = vpop.f32.mrf.mxu0  ;;  %v4875_v11 = vpop.f32.mrf.mxu1 }
 0x29d   : > { %v7164_v26 = vadd.f32 %v2760_v3, %v7082_v59  ;;  %v2908_v16 = vadd.f32 %v4875_v11, %v6989_v50 }
 0x29e   : > { %v2762_v44 = vpop.f32.mrf.mxu0  ;;  %v2845_v22 = vpop.f32.mrf.mxu1 }
 0x29f   : > { %v7168_v38 = vadd.f32 %v2762_v44, %v7088_v14  ;;  %v2902_v42 = vadd.f32 %v2845_v22, %v6995_v20 }
 0x2a0   : > { %v2764_v0 = vpop.f32.mrf.mxu0  ;;  %v4876_v36 = vpop.f32.mrf.mxu1 }
 0x2a1   : > { %7575 = vst [vmem:[#allocation5_spill] sm:$0xff] %v7168_v38  ;;  %v7172_v61 = vadd.f32 %v2764_v0, %v7094_v24  ;;  %v2911_v43 = vadd.f32 %v4876_v36, %v7001_v21 }
 0x2a2   : > { %v2766_v25 = vpop.f32.mrf.mxu0  ;;  %v2848_v56 = vpop.f32.mrf.mxu1 }
 0x2a3   : > { %7576 = vst [vmem:[#allocation11_spill] sm:$0xff] %v7172_v61  ;;  %v7176_v59 = vadd.f32 %v2766_v25, %v7100_v30  ;;  %v2905_v50 = vadd.f32 %v2848_v56, %v7007_v31 }
 0x2a4   : > { %v2770_v53 = vpop.f32.mrf.mxu0  ;;  %v4879_v49 = vpop.f32.mrf.mxu1 }
 0x2a5   : > { %7577 = vst [vmem:[#allocation6_spill] sm:$0xff] %v7176_v59  ;;  %v7180_v14 = vadd.f32 %v2770_v53, %v7106_v17  ;;  %v2920_v20 = vadd.f32 %v4879_v49, %v7013_v62 }
 0x2a6   : > { %v2772_v3 = vpop.f32.mrf.mxu0  ;;  %v2861_v11 = vpop.f32.mrf.mxu1 }
 0x2a7   : > { %7578 = vst [vmem:[#allocation12_spill] sm:$0xff] %v7180_v14  ;;  %v7184_v24 = vadd.f32 %v2772_v3, %v7112_v8  ;;  %v2914_v21 = vadd.f32 %v2861_v11, %v7019_v18 }
 0x2a8   : > { %v2774_v44 = vpop.f32.mrf.mxu0  ;;  %v4880_v22 = vpop.f32.mrf.mxu1 }
 0x2a9   : > { %7579 = vst [vmem:[#allocation7_spill] sm:$0xff] %v7184_v24  ;;  %v7188_v30 = vadd.f32 %v2774_v44, %v7118_v60  ;;  %v2923_v31 = vadd.f32 %v4880_v22, %v7025_v10 }
 0x2aa   : > { %v2776_v0 = vpop.f32.mrf.mxu0  ;;  %v2864_v36 = vpop.f32.mrf.mxu1 }
 0x2ab   : > { %7580 = vst [vmem:[#allocation13_spill] sm:$0xff] %v7188_v30  ;;  %v7192_v17 = vadd.f32 %v2776_v0, %v7124_v40  ;;  %v2917_v62 = vadd.f32 %v2864_v36, %v7031_v34 }
 0x2ac   : > { %v3088_v25 = vpop.f32.mrf.mxu1  ;;  %v4889_v56 = vpop.f32.mrf.mxu0 }
 0x2ad   : > { %7581 = vst [vmem:[#allocation8_spill] sm:$0xff] %v7192_v17  ;;  %v7196_v8 = vadd.f32 %v4889_v56, %v7133_v29 }
 0x2ae   : > { %v3090_v18 = vpop.f32.mrf.mxu1  ;;  %v3201_v53 = vpop.f32.mrf.mxu0 }
 0x2af   : > { %v7198_v49 = vadd.f32 %v3201_v53, %v2878_v63 }
 0x2b0   : > { %v3092_v60 = vpop.f32.mrf.mxu1  ;;  %v4890_v3 = vpop.f32.mrf.mxu0 }
 0x2b1   : > { %v7200_v11 = vadd.f32 %v4890_v3, %v2887_v1 }
 0x2b2   : > { %v3094_v10 = vpop.f32.mrf.mxu1  ;;  %v3204_v44 = vpop.f32.mrf.mxu0 }
 0x2b3   : > { %v7202_v22 = vadd.f32 %v3204_v44, %v2881_v15 }
 0x2b4   : > { %v3098_v40 = vpop.f32.mrf.mxu1  ;;  %v4893_v0 = vpop.f32.mrf.mxu0 }
 0x2b5   : > { %v7204_v34 = vadd.f32 %v4893_v0, %v2896_v51 }
 0x2b6   : > { %v3100_v36 = vpop.f32.mrf.mxu1  ;;  %v3217_v17 = vpop.f32.mrf.mxu0 }
 0x2b7   : > { %v7206_v29 = vadd.f32 %v3217_v17, %v2890_v41 }
 0x2b8   : > { %v3102_v56 = vpop.f32.mrf.mxu1  ;;  %v4894_v30 = vpop.f32.mrf.mxu0 }
 0x2b9   : > { %v7209_v63 = vadd.f32 %v3102_v56, %v7073_v4  ;;  %v7211_v53 = vadd.f32 %v4894_v30, %v2899_v2 }
 0x2ba   : > { %v3104_v1 = vpop.f32.mrf.mxu1  ;;  %v3220_v3 = vpop.f32.mrf.mxu0 }
 0x2bb   : > { %v7214_v15 = vadd.f32 %v3104_v1, %v7079_v7  ;;  %v7216_v44 = vadd.f32 %v3220_v3, %v2893_v47 }
 0x2bc   : > { %v7218_v51 = vpop.f32.mrf.mxu1  ;;  %v4897_v0 = vpop.f32.mrf.mxu0 }
 0x2bd   : > { %v7220_v24 = vadd.f32 %v4897_v0, %v2908_v16 }
 0x2be   : > { %v7222_v41 = vpop.f32.mrf.mxu1  ;;  %v3233_v17 = vpop.f32.mrf.mxu0 }
 0x2bf   : > { %7582 = vst [vmem:[#allocation14_spill] sm:$0xff] %v7220_v24  ;;  %v7224_v14 = vadd.f32 %v3233_v17, %v2902_v42 }
 0x2c0   : > { %v7226_v4 = vpop.f32.mrf.mxu1  ;;  %v4898_v2 = vpop.f32.mrf.mxu0 }
 0x2c1   : > { %7583 = vst [vmem:[#allocation15_spill] sm:$0xff] %v7224_v14  ;;  %v7228_v30 = vadd.f32 %v4898_v2, %v2911_v43 }
 0x2c2   : > { %v7230_v56 = vpop.f32.mrf.mxu1  ;;  %v3236_v7 = vpop.f32.mrf.mxu0 }
 0x2c3   : > { %7584 = vst [vmem:[#allocation16_spill] sm:$0xff] %v7228_v30  ;;  %v7232_v47 = vadd.f32 %v3236_v7, %v2905_v50  ;;  %v3264_v7 = vadd.f32 %v3088_v25, %v7037_v19  ;;  %v3268_v25 = vadd.f32 %v3094_v10, %v7055_v48 }
 0x2c4   : > { %v7234_v1 = vpop.f32.mrf.mxu1  ;;  %v4901_v3 = vpop.f32.mrf.mxu0 }
 0x2c5   : > { %7585 = vst [vmem:[#allocation17_spill] sm:$0xff] %v7232_v47  ;;  %v7236_v16 = vadd.f32 %v4901_v3, %v2920_v20 }
 0x2c6   : > { %v7238_v0 = vpop.f32.mrf.mxu1  ;;  %v3249_v59 = vpop.f32.mrf.mxu0 }
 0x2c7   : > { %7586 = vst [vmem:[#allocation18_spill] sm:$0xff] %v7236_v16  ;;  %v7240_v42 = vadd.f32 %v3249_v59, %v2914_v21  ;;  %v3265_v21 = vadd.f32 %v3090_v18, %v7043_v23 }
 0x2c8   : > { %v7242_v17 = vpop.f32.mrf.mxu1  ;;  %v4902_v14 = vpop.f32.mrf.mxu0 }
 0x2c9   : > { %7587 = vst [vmem:[#allocation19_spill] sm:$0xff] %v7240_v42  ;;  %v7244_v43 = vadd.f32 %v4902_v14, %v2923_v31  ;;  %v3267_v31 = vadd.f32 %v3092_v60, %v7049_v57 }
 0x2ca   : > { %v7246_v2 = vpop.f32.mrf.mxu1  ;;  %v3252_v30 = vpop.f32.mrf.mxu0 }
 0x2cb   : > { %7588 = vst [vmem:[#allocation2_spill] sm:$0xff] %v7244_v43  ;;  %v7248_v50 = vadd.f32 %v3252_v30, %v2917_v62 }
 0x2cc   : > { %v7251_v47 = vpop.f32.mrf.mxu1  ;;  %v3476_v20 = vpop.f32.mrf.mxu0 }
 0x2cd   : > { %7589 = vst [vmem:[#allocation3_spill] sm:$0xff] %v7248_v50  ;;  %v3652_v3 = vadd.f32 %v3476_v20, %v3264_v7  ;;  %v3270_v20 = vadd.f32 %v3098_v40, %v7061_v13 }
 0x2ce   : > { %v7253_v16 = vpop.f32.mrf.mxu1  ;;  %v3478_v59 = vpop.f32.mrf.mxu0 }
 0x2cf   : > { %v4574_v43 = vmul.f32 -1.442695, %v3652_v3  ;;  %v3653_v61 = vadd.f32 %v3478_v59, %v3265_v21  ;;  %v3271_v3 = vadd.f32 %v3100_v36, %v7067_v33  ;;  %v3276_v33 = vadd.f32 %v7218_v51, %v7085_v55 }
 0x2d0   : > { %v7256_v42 = vpop.f32.mrf.mxu1  ;;  %v3480_v14 = vpop.f32.mrf.mxu0  ;;  %v3280_v55 = vadd.f32 %v7230_v56, %v7103_v37  ;;  %v3283_v37 = vadd.f32 %v7238_v0, %v7115_v58  ;;  %v3286_v58 = vadd.f32 %v7246_v2, %v7127_v28 }
 0x2d1   : > { %v3655_v19 = vadd.f32 %v3480_v14, %v3267_v31  ;;  %5056 = vpow2.f32 %v4574_v43  ;;  %v4575_v23 = vmul.f32 -1.442695, %v3653_v61 }
 0x2d2   : > { %v7259_v62 = vpop.f32.mrf.mxu1  ;;  %v3482_v30 = vpop.f32.mrf.mxu0 }
 0x2d3   : > { %v3656_v18 = vadd.f32 %v3482_v30, %v3268_v25  ;;  %v4577_v57 = vmul.f32 -1.442695, %v3655_v19  ;;  %5058 = vpow2.f32 %v4575_v23  ;;  %v3277_v25 = vadd.f32 %v7222_v41, %v7091_v52 }
 0x2d4   : > { %v7262_v50 = vpop.f32.mrf.mxu1  ;;  %v3486_v7 = vpop.f32.mrf.mxu0  ;;  %v3282_v52 = vadd.f32 %v7234_v1, %v7109_v45  ;;  %v3285_v45 = vadd.f32 %v7242_v17, %v7121_v32  ;;  %v3288_v17 = vadd.f32 %v7251_v47, %v7130_v39  ;;  %v3289_v39 = vadd.f32 %v7253_v16, %v7136_v6 }
 0x2d5   : > { %v3658_v60 = vadd.f32 %v3486_v7, %v3270_v20  ;;  %v4578_v48 = vmul.f32 -1.442695, %v3656_v18  ;;  %5060 = vpow2.f32 %v4577_v57  ;;  %v3279_v18 = vadd.f32 %v7226_v4, %v7097_v35 }
 0x2d6   : > { %v7265_v24 = vpop.f32.mrf.mxu1  ;;  %v3488_v38 = vpop.f32.mrf.mxu0 }
 0x2d7   : > { %v3659_v10 = vadd.f32 %v3488_v38, %v3271_v3  ;;  %v4580_v13 = vmul.f32 -1.442695, %v3658_v60  ;;  %5062 = vpow2.f32 %v4578_v48 }
 0x2d8   : > { %v7268_v59 = vpop.f32.mrf.mxu1  ;;  %v3490_v21 = vpop.f32.mrf.mxu0 }
 0x2d9   : > { %v3661_v61 = vadd.f32 %v3490_v21, %v7209_v63  ;;  %v4581_v36 = vmul.f32 -1.442695, %v3659_v10  ;;  %5064 = vpow2.f32 %v4580_v13 }
 0x2da   : > { %v7270_v14 = vpop.f32.mrf.mxu1  ;;  %v3492_v31 = vpop.f32.mrf.mxu0 }
 0x2db   : > { %v3662_v40 = vadd.f32 %v3492_v31, %v7214_v15  ;;  %v4583_v7 = vmul.f32 -1.442695, %v3661_v61  ;;  %5066 = vpow2.f32 %v4581_v36 }
 0x2dc   : > { %v7274_v43 = vpop.f32.mrf.mxu1  ;;  %v3496_v30 = vpop.f32.mrf.mxu0 }
 0x2dd   : > { %v3664_v20 = vadd.f32 %v3496_v30, %v3276_v33  ;;  %v4584_v63 = vmul.f32 -1.442695, %v3662_v40  ;;  %5068 = vpow2.f32 %v4583_v7 }
 0x2de   : > { %v7278_v19 = vpop.f32.mrf.mxu1  ;;  %v3498_v38 = vpop.f32.mrf.mxu0 }
 0x2df   : > { %v3665_v57 = vadd.f32 %v3498_v38, %v3277_v25  ;;  %v5057_v3 = vpop.eup %5056  ;;  %v4586_v41 = vmul.f32 -1.442695, %v3664_v20  ;;  %5070 = vpow2.f32 %v4584_v63 }
 0x2e0   : > { %v7282_v23 = vpop.f32.mrf.mxu1  ;;  %v3500_v15 = vpop.f32.mrf.mxu0  ;;  %v3736_v56 = vadd.f32 1.0, %v5057_v3 }
 0x2e1   : > { %v3667_v21 = vadd.f32 %v3500_v15, %v3279_v18  ;;  %v4587_v4 = vmul.f32 -1.442695, %v3665_v57  ;;  %v5059_v40 = vpop.eup %5058  ;;  %5072 = vpow2.f32 %v4586_v41 }
 0x2e2   : > { %v7288_v51 = vpop.f32.mrf.mxu1  ;;  %v3502_v60 = vpop.f32.mrf.mxu0  ;;  %v3737_v0 = vadd.f32 1.0, %v5059_v40 }
 0x2e3   : > { %v3668_v48 = vadd.f32 %v3502_v60, %v3280_v55  ;;  %v4589_v1 = vmul.f32 -1.442695, %v3667_v21  ;;  %v5061_v30 = vpop.eup %5060  ;;  %5074 = vpow2.f32 %v4587_v4 }
 0x2e4   : > { %v7292_v10 = vpop.f32.mrf.mxu1  ;;  %v3506_v35 = vpop.f32.mrf.mxu0  ;;  %5076 = vrcp.f32 %v3736_v56  ;;  %v3739_v18 = vadd.f32 1.0, %v5061_v30 }
 0x2e5   : > { %v3670_v31 = vadd.f32 %v3506_v35, %v3282_v52  ;;  %v4590_v33 = vmul.f32 -1.442695, %v3668_v48  ;;  %v5063_v32 = vpop.eup %5062  ;;  %5078 = vpow2.f32 %v4589_v1 }
 0x2e6   : > { %v7296_v13 = vpop.f32.mrf.mxu1  ;;  %v3508_v61 = vpop.f32.mrf.mxu0  ;;  %v3740_v2 = vadd.f32 1.0, %v5063_v32 }
 0x2e7   : > { %v3671_v36 = vadd.f32 %v3508_v61, %v3283_v37  ;;  %v4592_v7 = vmul.f32 -1.442695, %v3670_v31  ;;  %v5065_v57 = vpop.eup %5064  ;;  %5080 = vpow2.f32 %v4590_v33 }
 0x2e8   : > { %v7300_v38 = vpop.f32.mrf.mxu1  ;;  %v3510_v25 = vpop.f32.mrf.mxu0  ;;  %v3742_v4 = vadd.f32 1.0, %v5065_v57 }
 0x2e9   : > { %v3673_v20 = vadd.f32 %v3510_v25, %v3285_v45  ;;  %v4593_v55 = vmul.f32 -1.442695, %v3671_v36  ;;  %5082 = vpow2.f32 %v4592_v7  ;;  %v5067_v35 = vpop.eup %5066  ;;  %v3291_v25 = vadd.f32 %v7256_v42, %v7140_v54 }
 0x2ea   : > { %v7304_v63 = vpop.f32.mrf.mxu1  ;;  %v3512_v15 = vpop.f32.mrf.mxu0  ;;  %5084 = vrcp.f32 %v3737_v0  ;;  %v3743_v45 = vadd.f32 1.0, %v5067_v35  ;;  %v3292_v42 = vadd.f32 %v7259_v62, %v7144_v5 }
 0x2eb   : > { %v3674_v60 = vadd.f32 %v3512_v15, %v3286_v58  ;;  %v4595_v41 = vmul.f32 -1.442695, %v3673_v20  ;;  %5086 = vrcp.f32 %v3739_v18  ;;  %v5069_v31 = vpop.eup %5068 }
 0x2ec   : > { %v3516_v3 = vpop.f32.mrf.mxu0  ;;  %v4911_v52 = vpop.f32.mrf.mxu1  ;;  %5088 = vpow2.f32 %v4593_v55  ;;  %v3745_v33 = vadd.f32 1.0, %v5069_v31 }
 0x2ed   : > { %v3676_v28 = vadd.f32 %v3516_v3, %v3288_v17  ;;  %v4596_v47 = vmul.f32 -1.442695, %v3674_v60  ;;  %v5071_v37 = vpop.eup %5070  ;;  %5090 = vpow2.f32 %v4595_v41  ;;  %v3660_v61 = vadd.f32 %v4911_v52, %v7196_v8 }
 0x2ee   : > { %v3518_v21 = vpop.f32.mrf.mxu0  ;;  %v3589_v48 = vpop.f32.mrf.mxu1  ;;  %5092 = vrcp.f32 %v3740_v2  ;;  %v3746_v7 = vadd.f32 1.0, %v5071_v37 }
 0x2ef   : > { %v4598_v56 = vmul.f32 -1.442695, %v3676_v28  ;;  %v3677_v1 = vadd.f32 %v3518_v21, %v3289_v39  ;;  %5094 = vrcp.f32 %v3742_v4  ;;  %v5073_v36 = vpop.eup %5072  ;;  %v3654_v6 = vadd.f32 %v3589_v48, %v7198_v49 }
 0x2f0   : > { %v4912_v40 = vpop.f32.mrf.mxu1  ;;  %v3520_v30 = vpop.f32.mrf.mxu0  ;;  %5096 = vpow2.f32 %v4596_v47  ;;  %v4582_v16 = vmul.f32 -1.442695, %v3660_v61  ;;  %v3808_v17 = vadd.f32 1.0, %v5073_v36 }
 0x2f1   : > { %5098 = vpow2.f32 %v4598_v56  ;;  %v5075_v58 = vpop.eup %5074  ;;  %v4599_v8 = vmul.f32 -1.442695, %v3677_v1  ;;  %v3679_v0 = vadd.f32 %v3520_v30, %v3291_v25  ;;  %v4576_v57 = vmul.f32 -1.442695, %v3654_v6 }
 0x2f2   : > { %v3592_v20 = vpop.f32.mrf.mxu1  ;;  %5100 = vrcp.f32 %v3743_v45  ;;  %v3522_v15 = vpop.f32.mrf.mxu0  ;;  %v3809_v49 = vadd.f32 1.0, %v5075_v58  ;;  %v3663_v52 = vadd.f32 %v4912_v40, %v7200_v11  ;;  %v3294_v30 = vadd.f32 %v7262_v50, %v7148_v27 }
 0x2f3   : > { %v7314_v32 = vpop.eup %5076  ;;  %5102 = vrcp.f32 %v3745_v33  ;;  %v4601_v3 = vmul.f32 -1.442695, %v3679_v0  ;;  %v3680_v21 = vadd.f32 %v3522_v15, %v3292_v42  ;;  %v3657_v47 = vadd.f32 %v3592_v20, %v7202_v22 }
 0x2f4   : > { %v5079_v18 = vpop.eup %5078  ;;  %5104 = vrcp.f32 %v3746_v7  ;;  %v4915_v55 = vpop.f32.mrf.mxu1  ;;  %v4585_v39 = vmul.f32 -1.442695, %v3663_v52  ;;  %v3295_v0 = vadd.f32 %v7265_v24, %v7152_v12 }
 0x2f5   : > { %v5081_v54 = vpop.eup %5080  ;;  %5106 = vpow2.f32 %v4582_v16  ;;  %v3526_v41 = vpop.f32.mrf.mxu0  ;;  %v3811_v2 = vadd.f32 1.0, %v5079_v18  ;;  %v4602_v56 = vmul.f32 -1.442695, %v3680_v21  ;;  %v3672_v61 = vadd.f32 %v4915_v55, %v7204_v34 }
 0x2f6   : > { %v5083_v60 = vpop.eup %5082  ;;  %5108 = vpow2.f32 %v4599_v8  ;;  %v3812_v35 = vadd.f32 1.0, %v5081_v54  ;;  %v3605_v62 = vpop.f32.mrf.mxu1  ;;  %v4579_v22 = vmul.f32 -1.442695, %v3657_v47  ;;  %v3682_v34 = vadd.f32 %v3526_v41, %v3294_v30 }
 0x2f7   : > { %v7319_v28 = vpop.eup %5084  ;;  %5110 = vrcp.f32 %v3808_v17  ;;  %v3814_v5 = vadd.f32 1.0, %v5083_v60  ;;  %v3528_v11 = vpop.f32.mrf.mxu0  ;;  %v3666_v7 = vadd.f32 %v3605_v62, %v7206_v29  ;;  %v4594_v20 = vmul.f32 -1.442695, %v3672_v61  ;;  %v7590_v61 = vld [vmem:[#allocation5_spill] sm:$0xff] }
 0x2f8   : > { %v7321_v48 = vpop.eup %5086  ;;  %5112 = vpow2.f32 %v4576_v57  ;;  %v4916_v36 = vpop.f32.mrf.mxu1  ;;  %v4604_v54 = vmul.f32 -1.442695, %v3682_v34  ;;  %v3683_v42 = vadd.f32 %v3528_v11, %v3295_v0  ;;  %v3300_v21 = vadd.f32 %v7274_v43, %v7164_v26 }
 0x2f9   : > { %v5089_v4 = vpop.eup %5088  ;;  %5114 = vrcp.f32 %v3809_v49  ;;  %v3530_v6 = vpop.f32.mrf.mxu0  ;;  %v3675_v27 = vadd.f32 %v4916_v36, %v7211_v53  ;;  %v4588_v17 = vmul.f32 -1.442695, %v3666_v7  ;;  %v3298_v11 = vadd.f32 %v7270_v14, %v7160_v46  ;;  %v7591_v7 = vld [vmem:[#allocation14_spill] sm:$0xff] }
 0x2fa   : > { %v5091_v31 = vpop.eup %5090  ;;  %5116 = vpow2.f32 %v4601_v3  ;;  %v3815_v45 = vadd.f32 1.0, %v5089_v4  ;;  %v3608_v49 = vpop.f32.mrf.mxu1  ;;  %v3297_v3 = vadd.f32 %v7268_v59, %v7156_v9 }
 0x2fb   : > { %v7324_v37 = vpop.eup %5092  ;;  %5118 = vrcp.f32 %v3811_v2  ;;  %v3817_v33 = vadd.f32 1.0, %v5091_v31  ;;  %v3532_v18 = vpop.f32.mrf.mxu0  ;;  %v4597_v53 = vmul.f32 -1.442695, %v3675_v27  ;;  %v3669_v9 = vadd.f32 %v3608_v49, %v7216_v44 }
 0x2fc   : > { %v7327_v40 = vpop.eup %5094  ;;  %5120 = vrcp.f32 %v3812_v35  ;;  %v4605_v35 = vmul.f32 -1.442695, %v3683_v42  ;;  %v3685_v4 = vadd.f32 %v3530_v6, %v3297_v3 }
 0x2fd   : > { %v5097_v1 = vpop.eup %5096  ;;  %5122 = vrcp.f32 %v3814_v5  ;;  %v3536_v41 = vpop.f32.mrf.mxu0  ;;  %v4591_v36 = vmul.f32 -1.442695, %v3669_v9 }
 0x2fe   : > { %v5099_v25 = vpop.eup %5098  ;;  %5124 = vpow2.f32 %v4585_v39  ;;  %v3818_v8 = vadd.f32 1.0, %v5097_v1  ;;  %v4919_v5 = vpop.f32.mrf.mxu1  ;;  %v3688_v39 = vadd.f32 %v3536_v41, %v3300_v21  ;;  %v4607_v1 = vmul.f32 -1.442695, %v3685_v4 }
 0x2ff   : > { %v7332_v16 = vpop.eup %5100  ;;  %5126 = vpow2.f32 %v4602_v56  ;;  %v3880_v15 = vadd.f32 1.0, %v5099_v25  ;;  %v3538_v43 = vpop.f32.mrf.mxu0  ;;  %v3684_v6 = vadd.f32 %v4919_v5, %v7591_v7 }
 0x300   : > { %v7334_v58 = vpop.eup %5102  ;;  %5128 = vrcp.f32 %v3815_v45  ;;  %v3301_v45 = vadd.f32 %v7278_v19, %v7590_v61  ;;  %v3621_v30 = vpop.f32.mrf.mxu1 }
 0x301   : > { %v7337_v50 = vpop.eup %5104  ;;  %5130 = vrcp.f32 %v3817_v33  ;;  %v3686_v33 = vadd.f32 %v3532_v18, %v3298_v11  ;;  %v3540_v34 = vpop.f32.mrf.mxu0  ;;  %v4606_v49 = vmul.f32 -1.442695, %v3684_v6  ;;  %v7596_v11 = vld [vmem:[#allocation12_spill] sm:$0xff] }
 0x302   : > { %v5107_v29 = vpop.eup %5106  ;;  %5132 = vpow2.f32 %v4579_v22  ;;  %v3689_v22 = vadd.f32 %v3538_v43, %v3301_v45  ;;  %v4920_v0 = vpop.f32.mrf.mxu1 }
 0x303   : > { %v5109_v57 = vpop.eup %5108  ;;  %5134 = vpow2.f32 %v4594_v20  ;;  %v3744_v12 = vadd.f32 1.0, %v5107_v29  ;;  %v7592_v20 = vld [vmem:[#allocation11_spill] sm:$0xff]  ;;  %v4608_v29 = vmul.f32 -1.442695, %v3686_v33 }
 0x304   : > { %v7341_v55 = vpop.eup %5110  ;;  %5136 = vrcp.f32 %v3818_v8  ;;  %v3881_v52 = vadd.f32 1.0, %v5109_v57  ;;  %v3303_v8 = vadd.f32 %v7282_v23, %v7592_v20 }
 0x305   : > { %v5113_v60 = vpop.eup %5112  ;;  %5138 = vrcp.f32 %v3880_v15 }
 0x306   : > { %v7345_v24 = vpop.eup %5114  ;;  %5140 = vpow2.f32 %v4588_v17  ;;  %v3738_v31 = vadd.f32 1.0, %v5113_v60  ;;  %v7593_v17 = vld [vmem:[#allocation15_spill] sm:$0xff]  ;;  %v7594_v60 = vld [vmem:[#allocation6_spill] sm:$0xff] }
 0x307   : > { %v5117_v2 = vpop.eup %5116  ;;  %5142 = vpow2.f32 %v4604_v54  ;;  %v3678_v18 = vadd.f32 %v3621_v30, %v7593_v17  ;;  %v3691_v54 = vadd.f32 %v3540_v34, %v3303_v8  ;;  %v3304_v3 = vadd.f32 %v7288_v51, %v7594_v60  ;;  %v7597_v30 = vld [vmem:[#allocation17_spill] sm:$0xff]  ;;  %v7599_v34 = vld [vmem:[#allocation7_spill] sm:$0xff]  ;;  %v3934_v60 = vld [vmem:[%s7385_s24 + $0x30] sm:$0xff] }
 0x308   : > { %v7349_v62 = vpop.eup %5118  ;;  %5144 = vpow2.f32 %v4597_v53  ;;  %v3883_v26 = vadd.f32 1.0, %v5117_v2  ;;  %v3542_v53 = vpop.f32.mrf.mxu0  ;;  %v3307_v20 = vadd.f32 %v7296_v13, %v7599_v34 }
 0x309   : > { %v7352_v59 = vpop.eup %5120  ;;  %5146 = vrcp.f32 %v3744_v12  ;;  %v3624_v2 = vpop.f32.mrf.mxu1  ;;  %v3692_v5 = vadd.f32 %v3542_v53, %v3304_v3  ;;  %v3931_v53 = vld [vmem:[%s7385_s24 + $0x18] sm:$0xff] }
 0x30a   : > { %v7354_v47 = vpop.eup %5122  ;;  %5148 = vrcp.f32 %v3881_v52  ;;  %v7595_v52 = vld [vmem:[#allocation16_spill] sm:$0xff]  ;;  %v3546_v9 = vpop.f32.mrf.mxu0  ;;  %v3943_v34 = vmul.f32 %v7349_v62, %v3931_v53 }
 0x30b   : > { %v5125_v56 = vpop.eup %5124  ;;  %5150 = vpow2.f32 %v4605_v35  ;;  %v3687_v41 = vadd.f32 %v4920_v0, %v7595_v52  ;;  %v4600_v35 = vmul.f32 -1.442695, %v3678_v18  ;;  %v3929_v0 = vld [vmem:[%s7385_s24 + $0x8] sm:$0xff]  ;;  %v7432_v52 = vld [vmem:[%s7385_s24 + $0x38] sm:$0xff] }
 0x30c   : > { %v5127_v44 = vpop.eup %5126  ;;  %5152 = vrcp.f32 %v3738_v31  ;;  %v3747_v14 = vadd.f32 1.0, %v5125_v56  ;;  %v4923_v56 = vpop.f32.mrf.mxu1  ;;  %v7426_v18 = vld [vmem:[%s7385_s24 + $0x28] sm:$0xff] }
 0x30d   : > { %v7360_v25 = vpop.eup %5128  ;;  %5154 = vtanh.f32 %v3688_v39  ;;  %v3884_v27 = vadd.f32 1.0, %v5127_v44  ;;  %v4609_v43 = vmul.f32 -1.442695, %v3687_v41  ;;  %v3681_v44 = vadd.f32 %v3624_v2, %v7597_v30  ;;  %v3548_v7 = vpop.f32.mrf.mxu0  ;;  %v7600_v41 = vld [vmem:[#allocation19_spill] sm:$0xff] }
 0x30e   : > { %v7362_v46 = vpop.eup %5130  ;;  %5156 = vrcp.f32 %v3883_v26  ;;  %v3306_v26 = vadd.f32 %v7292_v10, %v7596_v11  ;;  %v7598_v10 = vld [vmem:[#allocation18_spill] sm:$0xff]  ;;  %v3695_v3 = vadd.f32 %v3548_v7, %v3307_v20  ;;  %v7603_v7 = vld [vmem:[#allocation8_spill] sm:$0xff] }
 0x30f   : > { %v7365_v19 = vpop.eup %5132  ;;  %5158 = vpow2.f32 %v4607_v1  ;;  %v3928_v1 = vld [vmem:[%s7385_s24] sm:$0xff]  ;;  %v4603_v13 = vmul.f32 -1.442695, %v3681_v44 }
 0x310   : > { %v5135_v15 = vpop.eup %5134  ;;  %5160 = vpow2.f32 %v4591_v36  ;;  %v3694_v36 = vadd.f32 %v3546_v9, %v3306_v26  ;;  %v3940_v8 = vmul.f32 %v7341_v55, %v3928_v1  ;;  %v7420_v55 = vld [vmem:[%s7385_s24 + $0x10] sm:$0xff]  ;;  %v7601_v9 = vld [vmem:[#allocation13_spill] sm:$0xff]  ;;  %v3941_v26 = vmul.f32 %v7345_v24, %v3929_v0 }
 0x311   : > { %v7370_v57 = vpop.eup %5136  ;;  %5162 = vtanh.f32 %v3689_v22  ;;  %v3816_v12 = vadd.f32 1.0, %v5135_v15  ;;  %v7408_v15 = vld [vmem:[%s7385_s24 + $0x40] sm:$0xff]  ;;  %v3309_v11 = vadd.f32 %v7300_v38, %v7601_v9  ;;  %v3741_v0 = vadd.f32 1.0, %v7365_v19 }
 0x312   : > { %v7373_v42 = vpop.eup %5138  ;;  %5164 = vrcp.f32 %v3747_v14  ;;  %v3696_v14 = vadd.f32 %v4923_v56, %v7598_v10  ;;  %v7602_v38 = vld [vmem:[#allocation2_spill] sm:$0xff] }
 0x313   : > { %v5141_v23 = vpop.eup %5140  ;;  %5166 = vrcp.f32 %v3884_v27 }
 0x314   : > { %v7378_v21 = vpop.eup %5142  ;;  %5168 = vpow2.f32 %v4608_v29  ;;  %v3810_v31 = vadd.f32 1.0, %v5141_v23  ;;  %v3637_v29 = vpop.f32.mrf.mxu1  ;;  %v3932_v23 = vld [vmem:[%s7385_s24 + $0x20] sm:$0xff] }
 0x315   : > { %v5145_v4 = vpop.eup %5144  ;;  %5170 = vtanh.f32 %v3691_v54  ;;  %v3690_v2 = vadd.f32 %v3637_v29, %v7600_v41  ;;  %v3944_v62 = vmul.f32 %v7352_v59, %v3932_v23  ;;  %v3886_v41 = vadd.f32 1.0, %v7378_v21 }
 0x316   : > { %v7387_v51 = vpop.eup %5146  ;;  %5172 = vpow2.f32 %v4606_v49  ;;  %v3819_v45 = vadd.f32 1.0, %v5145_v4  ;;  %v7436_v4 = vld [vmem:[%s7385_s24 + $0x48] sm:$0xff]  ;;  %v4924_v56 = vpop.f32.mrf.mxu1  ;;  %v3946_v59 = vmul.f32 %v7354_v47, %v3934_v60 }
 0x317   : > { %v7389_v39 = vpop.eup %5148  ;;  %5174 = vrcp.f32 %v3816_v12  ;;  %v3699_v10 = vadd.f32 %v4924_v56, %v7602_v38 }
 0x318   : > { %v7393_v61 = vpop.eup %5150  ;;  %5176 = vpow2.f32 %v4600_v35  ;;  %v3550_v35 = vpop.f32.mrf.mxu0 }
 0x319   : > { %v7397_v33 = vpop.eup %5152  ;;  %5178 = vtanh.f32 %v3692_v5  ;;  %v7439_v5 = vld [vmem:[%s7385_s24 + $0x50] sm:$0xff]  ;;  %v3887_v56 = vadd.f32 1.0, %v7393_v61 }
 0x31a   : > { %v5155_v22 = vpop.eup %5154  ;;  %5180 = vrcp.f32 %v3810_v31 }
 0x31b   : > { %v7400_v6 = vpop.eup %5156  ;;  %v3952_v27 = vmul.f32 %v5155_v22, %v7314_v32  ;;  %5182 = vpow2.f32 %v4609_v43  ;;  %v7423_v32 = vld [vmem:[%s7385_s24 + $0x58] sm:$0xff] }
 0x31c   : > { %v7410_v17 = vpop.eup %5158  ;;  %5184 = vrcp.f32 %v3819_v45 }
 0x31d   : > { %v5161_v54 = vpop.eup %5160  ;;  %v3964_v49 = vadd.f32 %v3952_v27, %v3940_v8  ;;  %5186 = vtanh.f32 %v3694_v36  ;;  %v3697_v36 = vadd.f32 %v3550_v35, %v3309_v11  ;;  %v3640_v8 = vpop.f32.mrf.mxu1 }
 0x31e   : > { %v5163_v12 = vpop.eup %5162  ;;  %5188 = vtanh.f32 %v3696_v14  ;;  %v3813_v1 = vadd.f32 1.0, %v5161_v54  ;;  %v3552_v14 = vpop.f32.mrf.mxu0 }
 0x31f   : > { %v7441_v31 = vpop.eup %5164  ;;  %5190 = vtanh.f32 %v3964_v49  ;;  %v3953_v43 = vmul.f32 %v5163_v12, %v7319_v28  ;;  %4000 = vst [vmem:[%s7417_s27] sm:$0xff] %v3964_v49  ;;  %v3310_v28 = vadd.f32 %v7304_v63, %v7603_v7 }
 0x320   : > { %v7448_v45 = vpop.eup %5166  ;;  %5192 = vpow2.f32 %v4603_v13 }
 0x321   : > { %v7450_v30 = vpop.eup %5168  ;;  %v3965_v44 = vadd.f32 %v3953_v43, %v3941_v26  ;;  %5194 = vtanh.f32 %v3695_v3  ;;  %v3698_v54 = vadd.f32 %v3552_v14, %v3310_v28  ;;  %v7604_v3 = vld [vmem:[#allocation3_spill] sm:$0xff] }
 0x322   : > { %v5171_v22 = vpop.eup %5170  ;;  %5196 = vtanh.f32 %v3690_v2  ;;  %v3693_v63 = vadd.f32 %v3640_v8, %v7604_v3  ;;  %v3890_v8 = vadd.f32 1.0, %v7450_v30 }
 0x323   : > { %v5173_v24 = vpop.eup %5172  ;;  %5198 = vtanh.f32 %v3965_v44  ;;  %v3955_v20 = vmul.f32 %v5171_v22, %v7321_v48  ;;  %4001 = vst [vmem:[%s7417_s27 + $0x8] sm:$0xff] %v3965_v44 }
 0x324   : > { %v5175_v27 = vpop.eup %5174  ;;  %5200 = vrcp.f32 %v3813_v1  ;;  %v3888_v9 = vadd.f32 1.0, %v5173_v24 }
 0x325   : > { %v5177_v29 = vpop.eup %5176  ;;  %v3967_v13 = vadd.f32 %v3955_v20, %v3943_v34  ;;  %5202 = vtanh.f32 %v3697_v36  ;;  %v3948_v11 = vmul.f32 %v5175_v27, %v7408_v15 }
 0x326   : > { %v5179_v49 = vpop.eup %5178  ;;  %5204 = vtanh.f32 %v3699_v10  ;;  %v3882_v36 = vadd.f32 1.0, %v5177_v29  ;;  %v3889_v10 = vadd.f32 1.0, %v7410_v17 }
 0x327   : > { %v5181_v12 = vpop.eup %5180  ;;  %5206 = vtanh.f32 %v3967_v13  ;;  %v3956_v48 = vmul.f32 %v5179_v49, %v7324_v37  ;;  %4003 = vst [vmem:[%s7417_s27 + $0x18] sm:$0xff] %v3967_v13 }
 0x328   : > { %v5183_v53 = vpop.eup %5182  ;;  %5208 = vrcp.f32 %v3741_v0 }
 0x329   : > { %v5185_v19 = vpop.eup %5184  ;;  %v3968_v2 = vadd.f32 %v3956_v48, %v3944_v62  ;;  %5210 = vtanh.f32 %v3698_v54 }
 0x32a   : > { %v5187_v35 = vpop.eup %5186  ;;  %5212 = vtanh.f32 %v3693_v63 }
 0x32b   : > { %v5189_v26 = vpop.eup %5188  ;;  %5214 = vtanh.f32 %v3968_v2  ;;  %v3958_v37 = vmul.f32 %v5187_v35, %v7327_v40  ;;  %4004 = vst [vmem:[%s7417_s27 + $0x20] sm:$0xff] %v3968_v2  ;;  %v3942_v40 = vmul.f32 %v5181_v12, %v7420_v55 }
 0x32c   : > { %v5191_v23 = vpop.eup %5190  ;;  %v3960_v43 = vmul.f32 %v5189_v26, %v7387_v51  ;;  %5216 = vrcp.f32 %v3886_v41  ;;  %v3947_v51 = vmul.f32 %v7360_v25, %v7432_v52 }
 0x32d   : > { %v5193_v21 = vpop.eup %5192  ;;  %v3988_v1 = vmul.f32 %v5191_v23, %v7373_v42  ;;  %v3970_v15 = vadd.f32 %v3958_v37, %v3946_v59  ;;  %5218 = vrcp.f32 %v3888_v9 }
 0x32e   : > { %v5195_v44 = vpop.eup %5194  ;;  %v3972_v47 = vadd.f32 %v3960_v43, %v3948_v11 }
 0x32f   : > { %v5197_v60 = vpop.eup %5196  ;;  %5220 = vtanh.f32 %v3970_v15  ;;  %v3959_v22 = vmul.f32 %v5195_v44, %v7332_v16  ;;  %4006 = vst [vmem:[%s7417_s27 + $0x30] sm:$0xff] %v3970_v15  ;;  %v3891_v16 = vadd.f32 1.0, %v5183_v53 }
 0x330   : > { %v5199_v61 = vpop.eup %5198  ;;  %5222 = vtanh.f32 %v3972_v47  ;;  %v3954_v42 = vmul.f32 %v5197_v60, %v7397_v33  ;;  %4008 = vst [vmem:[%s7417_s27 + $0x40] sm:$0xff] %v3972_v47  ;;  %v3951_v33 = vmul.f32 %v5185_v19, %v7423_v32 }
 0x331   : > { %v5201_v38 = vpop.eup %5200  ;;  %5224 = vrcp.f32 %v3887_v56  ;;  %v3989_v55 = vmul.f32 %v5199_v61, %v7389_v39  ;;  %v3971_v14 = vadd.f32 %v3959_v22, %v3947_v51  ;;  %v3949_v39 = vmul.f32 %v7362_v46, %v7436_v4 }
 0x332   : > { %v5203_v24 = vpop.eup %5202  ;;  %5226 = vrcp.f32 %v3882_v36  ;;  %v3966_v25 = vadd.f32 %v3954_v42, %v3942_v40  ;;  %v3885_v46 = vadd.f32 1.0, %v5193_v21  ;;  %v3945_v4 = vmul.f32 %v5201_v38, %v7426_v18 }
 0x333   : > { %v5205_v52 = vpop.eup %5204  ;;  %v4620_v7 = vpack.c.bf16 %v3989_v55, %v3988_v1  ;;  %5228 = vtanh.f32 %v3971_v14  ;;  %v3961_v17 = vmul.f32 %v5203_v24, %v7334_v58  ;;  %4007 = vst [vmem:[%s7417_s27 + $0x38] sm:$0xff] %v3971_v14 }
 0x334   : > { %v5207_v28 = vpop.eup %5206  ;;  %5230 = vtanh.f32 %v3966_v25  ;;  %v3963_v34 = vmul.f32 %v5205_v52, %v7441_v31  ;;  %4002 = vst [vmem:[%s7417_s27 + $0x10] sm:$0xff] %v3966_v25  ;;  %v3950_v31 = vmul.f32 %v7370_v57, %v7439_v5 }
 0x335   : > { %v5209_v20 = vpop.eup %5208  ;;  %5232 = vrcp.f32 %v3889_v10  ;;  %4052 = vst [vmem:[%s7484_s30] sm:$0xff] %v4620_v7  ;;  %v3991_v32 = vmul.f32 %v5207_v28, %v7400_v6  ;;  %v3973_v27 = vadd.f32 %v3961_v17, %v3949_v39 }
 0x336   : > { %v5211_v0 = vpop.eup %5210  ;;  %5234 = vrcp.f32 %v3891_v16  ;;  %v3975_v58 = vadd.f32 %v3963_v34, %v3951_v33 }
 0x337   : > { %v5213_v29 = vpop.eup %5212  ;;  %5236 = vtanh.f32 %v3973_v27  ;;  %v3962_v13 = vmul.f32 %v5211_v0, %v7337_v50  ;;  %4009 = vst [vmem:[%s7417_s27 + $0x48] sm:$0xff] %v3973_v27 }
 0x338   : > { %v5215_v30 = vpop.eup %5214  ;;  %5238 = vtanh.f32 %v3975_v58  ;;  %v3957_v6 = vmul.f32 %v5213_v29, %v5209_v20  ;;  %4011 = vst [vmem:[%s7417_s27 + $0x58] sm:$0xff] %v3975_v58 }
 0x339   : > { %5240 = vrcp.f32 %v3890_v8  ;;  %v3992_v54 = vmul.f32 %v5215_v30, %v7448_v45  ;;  %v3974_v49 = vadd.f32 %v3962_v13, %v3950_v31  ;;  %v5217_v18 = vpop.eup %5216 }
 0x33a   : > { %5242 = vrcp.f32 %v3885_v46  ;;  %v3969_v3 = vadd.f32 %v3957_v6, %v3945_v4  ;;  %v5219_v63 = vpop.eup %5218 }
 0x33b   : > { %v4622_v12 = vpack.c.bf16 %v3992_v54, %v3991_v32  ;;  %5244 = vtanh.f32 %v3974_v49  ;;  %4010 = vst [vmem:[%s7417_s27 + $0x50] sm:$0xff] %v3974_v49 }
 0x33c   : > { %v5221_v50 = vpop.eup %5220  ;;  %5246 = vtanh.f32 %v3969_v3  ;;  %4005 = vst [vmem:[%s7417_s27 + $0x28] sm:$0xff] %v3969_v3 }
 0x33d   : > { %v5223_v57 = vpop.eup %5222  ;;  %4054 = vst [vmem:[%s7484_s30 + $0xc] sm:$0xff] %v4622_v12  ;;  %v3994_v5 = vmul.f32 %v5221_v50, %v5217_v18 }
 0x33e   : > { %v5225_v62 = vpop.eup %5224  ;;  %v3996_v48 = vmul.f32 %v5223_v57, %v5219_v63 }
 0x33f   : > { %v5227_v53 = vpop.eup %5226 }
 0x340   : > { %v5229_v45 = vpop.eup %5228  ;;  %v4625_v19 = vpack.c.bf16 %v3996_v48, %v3996_v48 }
 0x341   : > { %v5231_v41 = vpop.eup %5230  ;;  %v3995_v2 = vmul.f32 %v5229_v45, %v5225_v62 }
 0x342   : > { %v5233_v35 = vpop.eup %5232  ;;  %4057 = vst [vmem:[%s7484_s30 + $0x20] sm:$0xf] %v4625_v19  ;;  %v3990_v9 = vmul.f32 %v5231_v41, %v5227_v53 }
 0x343   : > { %v5235_v11 = vpop.eup %5234  ;;  %v4624_v26 = vpack.c.bf16 %v3995_v2, %v3994_v5 }
 0x344   : > { %v5237_v59 = vpop.eup %5236  ;;  %v4621_v37 = vpack.c.bf16 %v3990_v9, %v3990_v9 }
 0x345   : > { %v5239_v23 = vpop.eup %5238  ;;  %4056 = vst [vmem:[%s7484_s30 + $0x18] sm:$0xff] %v4624_v26  ;;  %v3997_v43 = vmul.f32 %v5237_v59, %v5233_v35 }
 0x346   : > { %v5241_v21 = vpop.eup %5240  ;;  %4053 = vst [vmem:[%s7484_s30 + $0x8] sm:$0xf] %v4621_v37  ;;  %v3999_v56 = vmul.f32 %v5239_v23, %v5235_v11 }
 0x347   : > { %v5243_v1 = vpop.eup %5242 }
 0x348   : > { %v5245_v15 = vpop.eup %5244  ;;  %v4627_v44 = vpack.c.bf16 %v3999_v56, %v3999_v56 }
 0x349   : > { %v5247_v36 = vpop.eup %5246  ;;  %v3998_v47 = vmul.f32 %v5245_v15, %v5241_v21 }
 0x34a   : > { %4059 = vst [vmem:[%s7484_s30 + $0x2c] sm:$0xf] %v4627_v44  ;;  %v3993_v40 = vmul.f32 %v5247_v36, %v5243_v1 }
 0x34b   : > { %v4626_v60 = vpack.c.bf16 %v3998_v47, %v3997_v43 }
 0x34c   : > { %v4623_v51 = vpack.c.bf16 %v3993_v40, %v3993_v40 }
 0x34d   : > { %4058 = vst [vmem:[%s7484_s30 + $0x24] sm:$0xff] %v4626_v60 }
 0x34e   : > { %4055 = vst [vmem:[%s7484_s30 + $0x14] sm:$0xf] %v4623_v51 }
 0x34f PF: > { %s15_s17 = sadd.s32 1, %s5270_s17   ;;  %s7605_s15 = smov %s5266_s16 }
 0x350   : > { %p12_p5 = scmp.ge.s32.totalorder %s15_s17, 4   ;;  %s7606_s16 = smov %s7608_s18 }
 0x352   :  { %14 = sbr.rel (!%p12_p5) target bundleno = 2 (0x2), region = 85 }

</bundles_post_ra>
